<compile_context>
chip_gen: v7x
topology: tpu7x:2x2x1
jax: 0.10.0
libtpu: 0.0.40
codegen_flags: <defaults>
</compile_context>

<pallas_src>
import functools

import jax
import jax.numpy as jnp
from jax.experimental import pallas as pl
from jax.experimental.pallas import tpu as pltpu

IN_DIM, H1, H2, OUT_DIM = 3264, 400, 300, 1
LEAKY_SLOPE = 0.01
MAX_BATCH_TILE = 256


def _leaky_relu(x, slope=LEAKY_SLOPE):
    return jnp.where(x > 0, x, slope * x)


def _round_up(x, m):
    return ((x + m - 1) // m) * m


def _batch_tiling(B, max_tile=MAX_BATCH_TILE):
    """Pick a batch tile (multiple of 8 sublanes) that minimizes padding waste."""
    n_tiles = -(-B // max_tile)                 # ceil(B / max_tile)
    tb = _round_up(-(-B // n_tiles), 8)         # per-tile rows, padded to sublanes
    return tb, tb * n_tiles                     # (tile, padded batch)


def actor_kernel(x_ref, w1_ref, b1_ref, w2_ref, b2_ref, w3_ref, b3_ref, o_ref):
    # Layer 1: (TB, 3264) @ (3264, 400)  bf16 MXU matmul, f32 accumulation.
    x = x_ref[...].astype(jnp.bfloat16)
    h = jnp.dot(x, w1_ref[...], preferred_element_type=jnp.float32)
    h = _leaky_relu(h + b1_ref[...])

    # Layer 2: (TB, 400) @ (400, 300)
    h = jnp.dot(h.astype(jnp.bfloat16), w2_ref[...],
                preferred_element_type=jnp.float32)
    h = _leaky_relu(h + b2_ref[...])

    # Layer 3 (out_features = 1): VPU multiply + lane reduce instead of an
    # N=1 MXU matmul (avoids MXU drain + lane-sparse result path).
    y = jnp.sum(h * w3_ref[...], axis=-1, keepdims=True) + b3_ref[...]
    o_ref[...] = jnp.tanh(y)


@jax.jit
def actor_forward(x, params):
    w1, b1, w2, b2, w3, b3 = params
    B = x.shape[0]

    TB, B_pad = _batch_tiling(B)
    if B_pad != B:
        x = jnp.pad(x, ((0, B_pad - B), (0, 0)))
    num_tiles = B_pad // TB

    flops = 2 * B_pad * (IN_DIM * H1 + H1 * H2 + H2 * OUT_DIM)
    bytes_accessed = (x.size * x.dtype.itemsize
                      + sum(int(p.size) * p.dtype.itemsize for p in params)
                      + B_pad * OUT_DIM * 4)

    out = pl.pallas_call(
        actor_kernel,
        out_shape=jax.ShapeDtypeStruct((B_pad, OUT_DIM), jnp.float32),
        grid=(num_tiles,),
        in_specs=[
            pl.BlockSpec((TB, IN_DIM), lambda i: (i, 0)),   # x: tiled over batch
            pl.BlockSpec((IN_DIM, H1), lambda i: (0, 0)),   # w1: DMA'd once, VMEM-resident
            pl.BlockSpec((1, H1), lambda i: (0, 0)),
            pl.BlockSpec((H1, H2), lambda i: (0, 0)),
            pl.BlockSpec((1, H2), lambda i: (0, 0)),
            pl.BlockSpec((1, H2), lambda i: (0, 0)),        # w3 stored as (1, 300) row
            pl.BlockSpec((1, 1), lambda i: (0, 0)),
        ],
        out_specs=pl.BlockSpec((TB, OUT_DIM), lambda i: (i, 0)),
        compiler_params=pltpu.CompilerParams(
            dimension_semantics=("parallel",),              # megacore batch split (v7x)
            vmem_limit_bytes=32 * 1024 * 1024,
        ),
        cost_estimate=pl.CostEstimate(
            flops=flops, transcendentals=B_pad, bytes_accessed=bytes_accessed),
    )(x, w1, b1, w2, b2, w3, b3)
    return out[:B]


def init_params(key):
    """Deterministic init mirroring PyTorch defaults:
    nn.Linear -> U(-1/sqrt(fan_in), 1/sqrt(fan_in)) for weight & bias;
    Dense3.weight overridden with U(-0.003, 0.003).
    w1/w2 stored bf16 in (in, out) layout; w3 as its natural (1, 300) row; biases f32."""
    ks = jax.random.split(key, 6)

    def uniform(k, shape, bound):
        return jax.random.uniform(k, shape, jnp.float32, -bound, bound)

    bound1 = 1.0 / float(IN_DIM) ** 0.5
    bound2 = 1.0 / float(H1) ** 0.5
    bound3 = 1.0 / float(H2) ** 0.5

    w1 = uniform(ks[0], (IN_DIM, H1), bound1).astype(jnp.bfloat16)
    b1 = uniform(ks[1], (1, H1), bound1)
    w2 = uniform(ks[2], (H1, H2), bound2).astype(jnp.bfloat16)
    b2 = uniform(ks[3], (1, H2), bound2)
    w3 = uniform(ks[4], (1, H2), 0.003)          # Dense3 weight override, f32 (tiny)
    b3 = uniform(ks[5], (1, 1), bound3)
    return (w1, b1, w2, b2, w3, b3)


def reference_forward(x, params):
    """Pure-JAX reference matching the kernel's mixed precision exactly."""
    w1, b1, w2, b2, w3, b3 = params
    h = _leaky_relu(jnp.dot(x.astype(jnp.bfloat16), w1,
                            preferred_element_type=jnp.float32) + b1)
    h = _leaky_relu(jnp.dot(h.astype(jnp.bfloat16), w2,
                            preferred_element_type=jnp.float32) + b2)
    y = jnp.sum(h * w3, axis=-1, keepdims=True) + b3
    return jnp.tanh(y)


def reference_forward_f32(x, params):
    """Full-f32 reference (fidelity sanity check for the bf16 weight storage)."""
    w1, b1, w2, b2, w3, b3 = params
    h = _leaky_relu(x @ w1.astype(jnp.float32) + b1)
    h = _leaky_relu(h @ w2.astype(jnp.float32) + b2)
    y = jnp.sum(h * w3, axis=-1, keepdims=True) + b3
    return jnp.tanh(y)


if __name__ == "__main__":
    key = jax.random.PRNGKey(0)
    k_param, k_x = jax.random.split(key)

    params = init_params(k_param)
    B = 4
    x = jax.random.normal(k_x, (B, IN_DIM), jnp.float32)

    out = jax.block_until_ready(actor_forward(x, params))
    assert out.shape == (B, OUT_DIM)

    ref = reference_forward(x, params)
    assert jnp.allclose(out, ref, atol=1e-4, rtol=1e-4), "mismatch vs mixed-precision reference"

    ref32 = reference_forward_f32(x, params)
    assert jnp.allclose(out, ref32, atol=5e-3, rtol=5e-3), "bf16 weight fidelity drift too large"

    # Exercise the batch-padding path with a batch that is not a multiple of 8.
    B2 = 3
    x2 = jax.random.normal(jax.random.PRNGKey(1), (B2, IN_DIM), jnp.float32)
    out2 = jax.block_until_ready(actor_forward(x2, params))
    assert out2.shape == (B2, OUT_DIM)
    assert jnp.allclose(out2, reference_forward(x2, params), atol=1e-4, rtol=1e-4)

    print("KERNEL_OK")
</pallas_src>

<mosaic_0001>
module attributes {stable_mosaic.version = 11 : i64} {
  func.func @actor_kernel(%arg0: i32, %arg1: memref<8x3264xf32, #tpu.memory_space<vmem>>, %arg2: memref<3264x400xbf16, #tpu.memory_space<vmem>>, %arg3: memref<1x400xf32, #tpu.memory_space<vmem>>, %arg4: memref<400x300xbf16, #tpu.memory_space<vmem>>, %arg5: memref<1x300xf32, #tpu.memory_space<vmem>>, %arg6: memref<1x300xf32, #tpu.memory_space<vmem>>, %arg7: memref<1x1xf32, #tpu.memory_space<vmem>>, %arg8: memref<8x1xf32, #tpu.memory_space<vmem>>) attributes {dimension_semantics = [#tpu.dimension_semantics<parallel>], iteration_bounds = array<i64: 1>, scalar_prefetch = 0 : i64, scratch_operands = 0 : i64, tpu.core_type = #tpu.core_type<tc>, window_params = [{transform_indices = @transform_0, window_bounds = array<i64: 8, 3264>}, {pipeline_mode = #tpu.pipeline_mode<synchronous>, transform_indices = @transform_1, window_bounds = array<i64: 3264, 400>}, {pipeline_mode = #tpu.pipeline_mode<synchronous>, transform_indices = @transform_2, window_bounds = array<i64: 1, 400>}, {pipeline_mode = #tpu.pipeline_mode<synchronous>, transform_indices = @transform_3, window_bounds = array<i64: 400, 300>}, {pipeline_mode = #tpu.pipeline_mode<synchronous>, transform_indices = @transform_4, window_bounds = array<i64: 1, 300>}, {pipeline_mode = #tpu.pipeline_mode<synchronous>, transform_indices = @transform_5, window_bounds = array<i64: 1, 300>}, {pipeline_mode = #tpu.pipeline_mode<synchronous>, transform_indices = @transform_6, window_bounds = array<i64: 1, 1>}, {transform_indices = @transform_7, window_bounds = array<i64: 8, 1>}]} {
    %c0 = arith.constant 0 : index
    %c0_0 = arith.constant 0 : index
    %0 = vector.load %arg1[%c0, %c0_0] : memref<8x3264xf32, #tpu.memory_space<vmem>>, vector<8x3264xf32>
    %1 = arith.truncf %0 : vector<8x3264xf32> to vector<8x3264xbf16>
    %c0_1 = arith.constant 0 : index
    %c0_2 = arith.constant 0 : index
    %2 = vector.load %arg2[%c0_1, %c0_2] : memref<3264x400xbf16, #tpu.memory_space<vmem>>, vector<3264x400xbf16>
    %cst = arith.constant dense<0.000000e+00> : vector<8x400xf32>
    %3 = tpu.matmul %1, %2, %cst {dimension_numbers = #tpu.dot_dimension_numbers<[1], [0], [0], [1], [0, 0, 1, 1], [], []>} : vector<8x3264xbf16>, vector<3264x400xbf16>, vector<8x400xf32> -> vector<8x400xf32>
    %c0_3 = arith.constant 0 : index
    %c0_4 = arith.constant 0 : index
    %4 = vector.load %arg3[%c0_3, %c0_4] : memref<1x400xf32, #tpu.memory_space<vmem>>, vector<1x400xf32>
    %5 = vector.broadcast %4 : vector<1x400xf32> to vector<8x400xf32>
    %6 = arith.addf %3, %5 : vector<8x400xf32>
    %cst_5 = arith.constant 0.000000e+00 : f32
    %7 = vector.broadcast %cst_5 : f32 to vector<8x400xf32>
    %8 = arith.cmpf ogt, %6, %7 : vector<8x400xf32>
    %cst_6 = arith.constant 0.00999999977 : f32
    %9 = vector.broadcast %cst_6 : f32 to vector<8x400xf32>
    %10 = arith.mulf %9, %6 : vector<8x400xf32>
    %11 = arith.select %8, %6, %10 : vector<8x400xi1>, vector<8x400xf32>
    %12 = arith.truncf %11 : vector<8x400xf32> to vector<8x400xbf16>
    %c0_7 = arith.constant 0 : index
    %c0_8 = arith.constant 0 : index
    %13 = vector.load %arg4[%c0_7, %c0_8] : memref<400x300xbf16, #tpu.memory_space<vmem>>, vector<400x300xbf16>
    %cst_9 = arith.constant dense<0.000000e+00> : vector<8x300xf32>
    %14 = tpu.matmul %12, %13, %cst_9 {dimension_numbers = #tpu.dot_dimension_numbers<[1], [0], [0], [1], [0, 0, 1, 1], [], []>} : vector<8x400xbf16>, vector<400x300xbf16>, vector<8x300xf32> -> vector<8x300xf32>
    %c0_10 = arith.constant 0 : index
    %c0_11 = arith.constant 0 : index
    %15 = vector.load %arg5[%c0_10, %c0_11] : memref<1x300xf32, #tpu.memory_space<vmem>>, vector<1x300xf32>
    %16 = vector.broadcast %15 : vector<1x300xf32> to vector<8x300xf32>
    %17 = arith.addf %14, %16 : vector<8x300xf32>
    %cst_12 = arith.constant 0.000000e+00 : f32
    %18 = vector.broadcast %cst_12 : f32 to vector<8x300xf32>
    %19 = arith.cmpf ogt, %17, %18 : vector<8x300xf32>
    %cst_13 = arith.constant 0.00999999977 : f32
    %20 = vector.broadcast %cst_13 : f32 to vector<8x300xf32>
    %21 = arith.mulf %20, %17 : vector<8x300xf32>
    %22 = arith.select %19, %17, %21 : vector<8x300xi1>, vector<8x300xf32>
    %c0_14 = arith.constant 0 : index
    %c0_15 = arith.constant 0 : index
    %23 = vector.load %arg6[%c0_14, %c0_15] : memref<1x300xf32, #tpu.memory_space<vmem>>, vector<1x300xf32>
    %24 = vector.broadcast %23 : vector<1x300xf32> to vector<8x300xf32>
    %25 = arith.mulf %22, %24 : vector<8x300xf32>
    %cst_16 = arith.constant dense<0.000000e+00> : vector<8xf32>
    %26 = vector.multi_reduction <add>, %25, %cst_16 [1] : vector<8x300xf32> to vector<8xf32>
    %27 = vector.shape_cast %26 : vector<8xf32> to vector<8x1xf32>
    %c0_17 = arith.constant 0 : index
    %c0_18 = arith.constant 0 : index
    %28 = vector.load %arg7[%c0_17, %c0_18] : memref<1x1xf32, #tpu.memory_space<vmem>>, vector<1x1xf32>
    %29 = vector.broadcast %28 : vector<1x1xf32> to vector<8x1xf32>
    %30 = arith.addf %27, %29 : vector<8x1xf32>
    %31 = math.tanh %30 : vector<8x1xf32>
    %c0_19 = arith.constant 0 : index
    %c0_20 = arith.constant 0 : index
    %32 = vector.load %arg8[%c0_19, %c0_20] : memref<8x1xf32, #tpu.memory_space<vmem>>, vector<8x1xf32>
    tpu.vector_store %arg8[%c0_19, %c0_20], %31 {strides = array<i32>} : memref<8x1xf32, #tpu.memory_space<vmem>>, vector<8x1xf32>,
    return
  }
  func.func @transform_0(%arg0: i32) -> (i32, i32) {
    %c0_i32 = arith.constant 0 : i32
    %c0_i32_0 = arith.constant 0 : i32
    return %arg0, %c0_i32 : i32, i32
  }
  func.func @transform_1(%arg0: i32) -> (i32, i32) {
    %c0_i32 = arith.constant 0 : i32
    %c0_i32_0 = arith.constant 0 : i32
    %c0_i32_1 = arith.constant 0 : i32
    return %c0_i32, %c0_i32_0 : i32, i32
  }
  func.func @transform_2(%arg0: i32) -> (i32, i32) {
    %c0_i32 = arith.constant 0 : i32
    %c0_i32_0 = arith.constant 0 : i32
    %c0_i32_1 = arith.constant 0 : i32
    return %c0_i32, %c0_i32_0 : i32, i32
  }
  func.func @transform_3(%arg0: i32) -> (i32, i32) {
    %c0_i32 = arith.constant 0 : i32
    %c0_i32_0 = arith.constant 0 : i32
    %c0_i32_1 = arith.constant 0 : i32
    return %c0_i32, %c0_i32_0 : i32, i32
  }
  func.func @transform_4(%arg0: i32) -> (i32, i32) {
    %c0_i32 = arith.constant 0 : i32
    %c0_i32_0 = arith.constant 0 : i32
    %c0_i32_1 = arith.constant 0 : i32
    return %c0_i32, %c0_i32_0 : i32, i32
  }
  func.func @transform_5(%arg0: i32) -> (i32, i32) {
    %c0_i32 = arith.constant 0 : i32
    %c0_i32_0 = arith.constant 0 : i32
    %c0_i32_1 = arith.constant 0 : i32
    return %c0_i32, %c0_i32_0 : i32, i32
  }
  func.func @transform_6(%arg0: i32) -> (i32, i32) {
    %c0_i32 = arith.constant 0 : i32
    %c0_i32_0 = arith.constant 0 : i32
    %c0_i32_1 = arith.constant 0 : i32
    return %c0_i32, %c0_i32_0 : i32, i32
  }
  func.func @transform_7(%arg0: i32) -> (i32, i32) {
    %c0_i32 = arith.constant 0 : i32
    %c0_i32_0 = arith.constant 0 : i32
    return %arg0, %c0_i32 : i32, i32
  }
}

</mosaic_0001>

<bundles_post_ra>
// kernel: actor_forward.1
= control target key start
LH: loop header
LB: loop body
LE: loop exit
PB: predicated region body
PF: predicated region fallthrough
CT: control target
= control target key end

     0   :  { %vm4999_vm0 = vcmask 523264   ;;  %vm6602_vm4 = vcmask 130048   ;;  %vm6798_vm9 = vcmask 359424   ;;  %vm6812_vm10 = vcmask 7168   ;;  %s12015_s1 = inlined_call_operand.vmem [shape: bf16[3264,400], index: 1, kind: input, shape index: {}]   ;;  %s12016_s0 = inlined_call_operand.vmem [shape: f32[8,3264], index: 0, kind: input, shape index: {}]   ;;  %s12017_s3 = inlined_call_operand.vmem [shape: bf16[400,300], index: 3, kind: input, shape index: {}]   ;;  %s12018_s2 = inlined_call_operand.vmem [shape: f32[1,400], index: 2, kind: input, shape index: {}]   ;;  %s12019_s6 = inlined_call_operand.<no memory space> [shape: f32[1,1], index: 6, kind: input, shape index: {}]   ;;  %s12020_s4 = inlined_call_operand.vmem [shape: f32[1,300], index: 4, kind: input, shape index: {}]   ;;  %s12021_s5 = inlined_call_operand.vmem [shape: f32[1,300], index: 5, kind: input, shape index: {}]   ;;  %s12022_s7 = inlined_call_operand.vmem [shape: f32[8,1], index: 7, kind: output, shape index: {}]  }
   0x1   :  { %v7843_v0 = vld [vmem:[%s12015_s1 + $0x4] ss:$16 sps:$4 sm:$0xff]   ;;  %v7845_v1 = vld [vmem:[%s12015_s1 + $0xc] ss:$16 sps:$4 sm:$0xff]   ;;  %v7847_v2 = vld [vmem:[%s12015_s1] ss:$16 sps:$4 sm:$0xff]  }
   0x2   :  { %5003 = vmatprep.subr.bf16.mxu0 %v7843_v0  ;;  %v7848_v3 = vld [vmem:[%s12015_s1 + $0x8] ss:$16 sps:$4 sm:$0xff]   ;;  %5536 = vmatprep.subr.bf16.mxu1 %v7845_v1  ;;  %v7849_v4 = vld [vmem:[%s12015_s1 + $0x24] ss:$16 sps:$4 sm:$0xff]   ;;  %v7851_v5 = vld [vmem:[%s12015_s1 + $0x2c] ss:$16 sps:$4 sm:$0xff]  }
   0x3   :  { %5004 = vmatpush1.bf16.msra.mxu0 %v7847_v2  ;;  %5537 = vmatpush1.bf16.msra.mxu1 %v7848_v3  ;;  %v7853_v6 = vld [vmem:[%s12015_s1 + $0x20] ss:$16 sps:$4 sm:$0xff]   ;;  %v7854_v7 = vld [vmem:[%s12015_s1 + $0x28] ss:$16 sps:$4 sm:$0xff]   ;;  %v7855_v8 = vld [vmem:[%s12015_s1 + $0x44] ss:$16 sps:$4 sm:$0xff]  }
   0x4   :  { %5005 = vmatprep.subr.bf16.mxu0 %v7849_v4  ;;  %5538 = vmatprep.subr.bf16.mxu1 %v7851_v5  ;;  %v7857_v9 = vld [vmem:[%s12015_s1 + $0x4c] ss:$16 sps:$4 sm:$0xff]   ;;  %v7859_v10 = vld [vmem:[%s12015_s1 + $0x40] ss:$16 sps:$4 sm:$0xff]   ;;  %v7860_v11 = vld [vmem:[%s12015_s1 + $0x48] ss:$16 sps:$4 sm:$0xff]  }
   0x5   :  { %v7861_v12 = vld [vmem:[%s12015_s1 + $0x64] ss:$16 sps:$4 sm:$0xff]   ;;  %v7863_v13 = vld [vmem:[%s12015_s1 + $0x6c] ss:$16 sps:$4 sm:$0xff]   ;;  %v7865_v14 = vld [vmem:[%s12015_s1 + $0x60] ss:$16 sps:$4 sm:$0xff]  }
   0x6   :  { %v7866_v15 = vld [vmem:[%s12015_s1 + $0x68] ss:$16 sps:$4 sm:$0xff]   ;;  %v7867_v16 = vld [vmem:[%s12015_s1 + $0x84] ss:$16 sps:$4 sm:$0xff]   ;;  %v7869_v17 = vld [vmem:[%s12015_s1 + $0x8c] ss:$16 sps:$4 sm:$0xff]  }
   0x7   :  { %5006 = vmatpush1.bf16.msra.mxu0 %v7853_v6  ;;  %5539 = vmatpush1.bf16.msra.mxu1 %v7854_v7  ;;  %v7871_v18 = vld [vmem:[%s12015_s1 + $0x80] ss:$16 sps:$4 sm:$0xff]   ;;  %v7872_v19 = vld [vmem:[%s12015_s1 + $0x88] ss:$16 sps:$4 sm:$0xff]   ;;  %v7873_v20 = vld [vmem:[%s12015_s1 + $0xa4] ss:$16 sps:$4 sm:$0xff]  }
   0x8   :  { %5007 = vmatprep.subr.bf16.mxu0 %v7855_v8  ;;  %5540 = vmatprep.subr.bf16.mxu1 %v7857_v9  ;;  %v7875_v21 = vld [vmem:[%s12015_s1 + $0xac] ss:$16 sps:$4 sm:$0xff]   ;;  %v7877_v22 = vld [vmem:[%s12015_s1 + $0xa0] ss:$16 sps:$4 sm:$0xff]   ;;  %v7878_v23 = vld [vmem:[%s12015_s1 + $0xa8] ss:$16 sps:$4 sm:$0xff]  }
   0x9   :  { %v7879_v24 = vld [vmem:[%s12015_s1 + $0xc4] ss:$16 sps:$4 sm:$0xff]   ;;  %v7881_v25 = vld [vmem:[%s12015_s1 + $0xcc] ss:$16 sps:$4 sm:$0xff]   ;;  %v7883_v26 = vld [vmem:[%s12015_s1 + $0xc0] ss:$16 sps:$4 sm:$0xff]  }
   0xa   :  { %v7884_v27 = vld [vmem:[%s12015_s1 + $0xc8] ss:$16 sps:$4 sm:$0xff]   ;;  %v7885_v28 = vld [vmem:[%s12015_s1 + $0xe4] ss:$16 sps:$4 sm:$0xff]   ;;  %v7887_v29 = vld [vmem:[%s12015_s1 + $0xec] ss:$16 sps:$4 sm:$0xff]  }
   0xb   :  { %5008 = vmatpush1.bf16.msra.mxu0 %v7859_v10  ;;  %5541 = vmatpush1.bf16.msra.mxu1 %v7860_v11  ;;  %v7889_v30 = vld [vmem:[%s12015_s1 + $0xe0] ss:$16 sps:$4 sm:$0xff]   ;;  %v7890_v31 = vld [vmem:[%s12015_s1 + $0xe8] ss:$16 sps:$4 sm:$0xff]   ;;  %v7891_v32 = vld [vmem:[%s12015_s1 + $0x104] ss:$16 sps:$4 sm:$0xff]  }
   0xc   :  { %5009 = vmatprep.subr.bf16.mxu0 %v7861_v12  ;;  %5542 = vmatprep.subr.bf16.mxu1 %v7863_v13  ;;  %v7893_v33 = vld [vmem:[%s12015_s1 + $0x10c] ss:$16 sps:$4 sm:$0xff]   ;;  %v7895_v34 = vld [vmem:[%s12015_s1 + $0x100] ss:$16 sps:$4 sm:$0xff]   ;;  %v7896_v35 = vld [vmem:[%s12015_s1 + $0x108] ss:$16 sps:$4 sm:$0xff]  }
   0xd   :  { %v7897_v36 = vld [vmem:[%s12015_s1 + $0x124] ss:$16 sps:$4 sm:$0xff]   ;;  %v7899_v37 = vld [vmem:[%s12015_s1 + $0x12c] ss:$16 sps:$4 sm:$0xff]   ;;  %v7901_v38 = vld [vmem:[%s12015_s1 + $0x120] ss:$16 sps:$4 sm:$0xff]  }
   0xe   :  { %v7902_v39 = vld [vmem:[%s12015_s1 + $0x128] ss:$16 sps:$4 sm:$0xff]   ;;  %v7903_v40 = vld [vmem:[%s12015_s1 + $0x144] ss:$16 sps:$4 sm:$0xff]   ;;  %v7905_v41 = vld [vmem:[%s12015_s1 + $0x14c] ss:$16 sps:$4 sm:$0xff]  }
   0xf   :  { %5010 = vmatpush1.bf16.msra.mxu0 %v7865_v14  ;;  %5543 = vmatpush1.bf16.msra.mxu1 %v7866_v15  ;;  %v7907_v42 = vld [vmem:[%s12015_s1 + $0x140] ss:$16 sps:$4 sm:$0xff]   ;;  %v7908_v43 = vld [vmem:[%s12015_s1 + $0x148] ss:$16 sps:$4 sm:$0xff]   ;;  %v7909_v44 = vld [vmem:[%s12015_s1 + $0x164] ss:$16 sps:$4 sm:$0xff]  }
  0x10   :  { %5011 = vmatprep.subr.bf16.mxu0 %v7867_v16  ;;  %5544 = vmatprep.subr.bf16.mxu1 %v7869_v17  ;;  %v7911_v45 = vld [vmem:[%s12015_s1 + $0x16c] ss:$16 sps:$4 sm:$0xff]   ;;  %v7913_v47 = vld [vmem:[%s12015_s1 + $0x160] ss:$16 sps:$4 sm:$0xff]   ;;  %v7914_v49 = vld [vmem:[%s12015_s1 + $0x168] ss:$16 sps:$4 sm:$0xff]  }
  0x11   :  { %v30_v46 = vld [vmem:[%s12016_s0 + $0x8] sm:$0xff]  ;;  %v7915_v50 = vld [vmem:[%s12015_s1 + $0x184] ss:$16 sps:$4 sm:$0xff]   ;;  %v7919_v52 = vld [vmem:[%s12015_s1 + $0x180] ss:$16 sps:$4 sm:$0xff]  }
  0x12   :  { %v56_v48 = vpack.c.bf16 %v30_v46, %v30_v46  ;;  %v7917_v51 = vld [vmem:[%s12015_s1 + $0x18c] ss:$16 sps:$4 sm:$0xff]   ;;  %v7920_v53 = vld [vmem:[%s12015_s1 + $0x188] ss:$16 sps:$4 sm:$0xff]   ;;  %v7921_v54 = vld [vmem:[%s12015_s1 + $0x1a4] ss:$16 sps:$4 sm:$0xff]  }
  0x13   :  { %5012 = vmatpush1.bf16.msra.mxu0 %v7871_v18  ;;  %5545 = vmatpush1.bf16.msra.mxu1 %v7872_v19  ;;  %v7923_v55 = vld [vmem:[%s12015_s1 + $0x1ac] ss:$16 sps:$4 sm:$0xff]   ;;  %v7925_v56 = vld [vmem:[%s12015_s1 + $0x1a0] ss:$16 sps:$4 sm:$0xff]   ;;  %v7926_v57 = vld [vmem:[%s12015_s1 + $0x1a8] ss:$16 sps:$4 sm:$0xff]  }
  0x14   :  { %5013 = vmatprep.subr.bf16.mxu0 %v7873_v20  ;;  %5546 = vmatprep.subr.bf16.mxu1 %v7875_v21  ;;  %v7927_v58 = vld [vmem:[%s12015_s1 + $0x1c4] ss:$16 sps:$4 sm:$0xff]   ;;  %v7929_v59 = vld [vmem:[%s12015_s1 + $0x1cc] ss:$16 sps:$4 sm:$0xff]   ;;  %v7931_v60 = vld [vmem:[%s12015_s1 + $0x1c0] ss:$16 sps:$4 sm:$0xff]  }
  0x15   :  { %5035 = vmatprep.mubr.bf16.mxu0 %v56_v48  ;;  %5568 = vmatprep.mubr.bf16.mxu1 %v56_v48  ;;  %v7932_v61 = vld [vmem:[%s12015_s1 + $0x1c8] ss:$16 sps:$4 sm:$0xff]   ;;  %v7933_v62 = vld [vmem:[%s12015_s1 + $0x1e4] ss:$16 sps:$4 sm:$0xff]   ;;  %v7935_v63 = vld [vmem:[%s12015_s1 + $0x1ec] ss:$16 sps:$4 sm:$0xff]  }
  0x16   :  { %v7937_v0 = vld [vmem:[%s12015_s1 + $0x1e0] ss:$16 sps:$4 sm:$0xff]   ;;  %v7938_v1 = vld [vmem:[%s12015_s1 + $0x1e8] ss:$16 sps:$4 sm:$0xff]   ;;  %v7941_v3 = vld [vmem:[%s12015_s1 + $0x204] ss:$16 sps:$4 sm:$0xff]  }
  0x17   :  { %5014 = vmatpush1.bf16.msra.mxu0 %v7877_v22  ;;  %5547 = vmatpush1.bf16.msra.mxu1 %v7878_v23  ;;  %v29_v2 = vld [vmem:[%s12016_s0] sm:$0xff]  ;;  %v7944_v4 = vld [vmem:[%s12015_s1 + $0x20c] ss:$16 sps:$4 sm:$0xff]   ;;  %v7942_v7 = vld [vmem:[%s12015_s1 + $0x208] ss:$16 sps:$4 sm:$0xff]  }
  0x18   :  { %5015 = vmatprep.subr.bf16.mxu0 %v7879_v24  ;;  %5548 = vmatprep.subr.bf16.mxu1 %v7881_v25  ;;  %v55_v5 = vpack.c.bf16 %v29_v2, %v29_v2  ;;  %v7939_v6 = vld [vmem:[%s12015_s1 + $0x200] ss:$16 sps:$4 sm:$0xff]   ;;  %v7947_v8 = vld [vmem:[%s12015_s1 + $0x224] ss:$16 sps:$4 sm:$0xff]   ;;  %v7950_v9 = vld [vmem:[%s12015_s1 + $0x22c] ss:$16 sps:$4 sm:$0xff]  }
  0x19   :  { %v7945_v10 = vld [vmem:[%s12015_s1 + $0x220] ss:$16 sps:$4 sm:$0xff]   ;;  %v7948_v11 = vld [vmem:[%s12015_s1 + $0x228] ss:$16 sps:$4 sm:$0xff]   ;;  %v7953_v12 = vld [vmem:[%s12015_s1 + $0x244] ss:$16 sps:$4 sm:$0xff]  }
  0x1a   :  { %v7956_v13 = vld [vmem:[%s12015_s1 + $0x24c] ss:$16 sps:$4 sm:$0xff]   ;;  %v7951_v14 = vld [vmem:[%s12015_s1 + $0x240] ss:$16 sps:$4 sm:$0xff]   ;;  %v7954_v15 = vld [vmem:[%s12015_s1 + $0x248] ss:$16 sps:$4 sm:$0xff]  }
  0x1b   :  { %5016 = vmatpush1.bf16.msra.mxu0 %v7883_v26  ;;  %5549 = vmatpush1.bf16.msra.mxu1 %v7884_v27  ;;  %v7959_v16 = vld [vmem:[%s12015_s1 + $0x264] ss:$16 sps:$4 sm:$0xff]   ;;  %v7962_v17 = vld [vmem:[%s12015_s1 + $0x26c] ss:$16 sps:$4 sm:$0xff]   ;;  %v7957_v18 = vld [vmem:[%s12015_s1 + $0x260] ss:$16 sps:$4 sm:$0xff]  }
  0x1c   :  { %5017 = vmatprep.subr.bf16.mxu0 %v7885_v28  ;;  %5550 = vmatprep.subr.bf16.mxu1 %v7887_v29  ;;  %v7960_v19 = vld [vmem:[%s12015_s1 + $0x268] ss:$16 sps:$4 sm:$0xff]   ;;  %v7965_v20 = vld [vmem:[%s12015_s1 + $0x284] ss:$16 sps:$4 sm:$0xff]   ;;  %v7968_v21 = vld [vmem:[%s12015_s1 + $0x28c] ss:$16 sps:$4 sm:$0xff]  }
  0x1d   :  { %v7963_v22 = vld [vmem:[%s12015_s1 + $0x280] ss:$16 sps:$4 sm:$0xff]   ;;  %v7966_v23 = vld [vmem:[%s12015_s1 + $0x288] ss:$16 sps:$4 sm:$0xff]   ;;  %v7971_v24 = vld [vmem:[%s12015_s1 + $0x2a4] ss:$16 sps:$4 sm:$0xff]  }
  0x1e   :  { %v7974_v25 = vld [vmem:[%s12015_s1 + $0x2ac] ss:$16 sps:$4 sm:$0xff]   ;;  %v7969_v26 = vld [vmem:[%s12015_s1 + $0x2a0] ss:$16 sps:$4 sm:$0xff]   ;;  %v7972_v27 = vld [vmem:[%s12015_s1 + $0x2a8] ss:$16 sps:$4 sm:$0xff]  }
  0x1f   :  { %5018 = vmatpush1.bf16.msra.mxu0 %v7889_v30  ;;  %5551 = vmatpush1.bf16.msra.mxu1 %v7890_v31  ;;  %v7977_v28 = vld [vmem:[%s12015_s1 + $0x2c4] ss:$16 sps:$4 sm:$0xff]   ;;  %v7980_v29 = vld [vmem:[%s12015_s1 + $0x2cc] ss:$16 sps:$4 sm:$0xff]   ;;  %v7975_v31 = vld [vmem:[%s12015_s1 + $0x2c0] ss:$16 sps:$4 sm:$0xff]  }
  0x20   :  { %5019 = vmatprep.subr.bf16.mxu0 %v7891_v32  ;;  %5552 = vmatprep.subr.bf16.mxu1 %v7893_v33  ;;  %v32_v30 = vld [vmem:[%s12016_s0 + $0x18] sm:$0xff]  ;;  %v8001_v46 = vld [vmem:[%s12015_s1 + $0x344] ss:$16 sps:$4 sm:$0xff]   ;;  %v7999_v48 = vld [vmem:[%s12015_s1 + $0x340] ss:$16 sps:$4 sm:$0xff]  }
  0x21   :  { %v58_v32 = vpack.c.bf16 %v32_v30, %v32_v30  ;;  %v7978_v33 = vld [vmem:[%s12015_s1 + $0x2c8] ss:$16 sps:$4 sm:$0xff]   ;;  %v8031_v2 = vld [vmem:[%s12015_s1 + $0x3e4] ss:$16 sps:$4 sm:$0xff]  }
  0x22   :  { %v8067_v30 = vld [vmem:[%s12015_s1 + $0x4a4] ss:$16 sps:$4 sm:$0xff]  }
  0x23   :  { %5020 = vmatpush1.bf16.msra.mxu0 %v7895_v34  ;;  %5553 = vmatpush1.bf16.msra.mxu1 %v7896_v35  ;;  %v7983_v34 = vld [vmem:[%s12015_s1 + $0x2e4] ss:$16 sps:$4 sm:$0xff]   ;;  %v7986_v35 = vld [vmem:[%s12015_s1 + $0x2ec] ss:$16 sps:$4 sm:$0xff]  }
  0x24   :  { %5021 = vmatprep.subr.bf16.mxu0 %v7897_v36  ;;  %5554 = vmatprep.subr.bf16.mxu1 %v7899_v37  ;;  %v7981_v36 = vld [vmem:[%s12015_s1 + $0x2e0] ss:$16 sps:$4 sm:$0xff]   ;;  %v7984_v37 = vld [vmem:[%s12015_s1 + $0x2e8] ss:$16 sps:$4 sm:$0xff]  }
  0x27   :  { %5022 = vmatpush1.bf16.msra.mxu0 %v7901_v38  ;;  %5555 = vmatpush1.bf16.msra.mxu1 %v7902_v39  ;;  %v7989_v38 = vld [vmem:[%s12015_s1 + $0x304] ss:$16 sps:$4 sm:$0xff]   ;;  %v7992_v39 = vld [vmem:[%s12015_s1 + $0x30c] ss:$16 sps:$4 sm:$0xff]  }
  0x28   :  { %5023 = vmatprep.subr.bf16.mxu0 %v7903_v40  ;;  %5556 = vmatprep.subr.bf16.mxu1 %v7905_v41  ;;  %v7987_v40 = vld [vmem:[%s12015_s1 + $0x300] ss:$16 sps:$4 sm:$0xff]   ;;  %v7990_v41 = vld [vmem:[%s12015_s1 + $0x308] ss:$16 sps:$4 sm:$0xff]  }
  0x2b   :  { %5024 = vmatpush1.bf16.msra.mxu0 %v7907_v42  ;;  %5557 = vmatpush1.bf16.msra.mxu1 %v7908_v43  ;;  %v7995_v42 = vld [vmem:[%s12015_s1 + $0x324] ss:$16 sps:$4 sm:$0xff]   ;;  %v7998_v43 = vld [vmem:[%s12015_s1 + $0x32c] ss:$16 sps:$4 sm:$0xff]  }
  0x2c   :  { %5025 = vmatprep.subr.bf16.mxu0 %v7909_v44  ;;  %5558 = vmatprep.subr.bf16.mxu1 %v7911_v45  ;;  %v7993_v44 = vld [vmem:[%s12015_s1 + $0x320] ss:$16 sps:$4 sm:$0xff]   ;;  %v7996_v45 = vld [vmem:[%s12015_s1 + $0x328] ss:$16 sps:$4 sm:$0xff]  }
  0x2f   :  { %5026 = vmatpush1.bf16.msra.mxu0 %v7913_v47  ;;  %5559 = vmatpush1.bf16.msra.mxu1 %v7914_v49  ;;  %v8004_v47 = vld [vmem:[%s12015_s1 + $0x34c] ss:$16 sps:$4 sm:$0xff]   ;;  %v8002_v49 = vld [vmem:[%s12015_s1 + $0x348] ss:$16 sps:$4 sm:$0xff]  }
  0x30   :  { %5027 = vmatprep.subr.bf16.mxu0 %v7915_v50  ;;  %5560 = vmatprep.subr.bf16.mxu1 %v7917_v51  ;;  %v8007_v50 = vld [vmem:[%s12015_s1 + $0x364] ss:$16 sps:$4 sm:$0xff]   ;;  %v8010_v51 = vld [vmem:[%s12015_s1 + $0x36c] ss:$16 sps:$4 sm:$0xff]  }
  0x33   :  { %5028 = vmatpush1.bf16.msra.mxu0 %v7919_v52  ;;  %5561 = vmatpush1.bf16.msra.mxu1 %v7920_v53  ;;  %v8005_v52 = vld [vmem:[%s12015_s1 + $0x360] ss:$16 sps:$4 sm:$0xff]   ;;  %v8008_v53 = vld [vmem:[%s12015_s1 + $0x368] ss:$16 sps:$4 sm:$0xff]  }
  0x34   :  { %5029 = vmatprep.subr.bf16.mxu0 %v7921_v54  ;;  %5562 = vmatprep.subr.bf16.mxu1 %v7923_v55  ;;  %v8013_v54 = vld [vmem:[%s12015_s1 + $0x384] ss:$16 sps:$4 sm:$0xff]   ;;  %v8016_v55 = vld [vmem:[%s12015_s1 + $0x38c] ss:$16 sps:$4 sm:$0xff]  }
  0x37   :  { %5030 = vmatpush1.bf16.msra.mxu0 %v7925_v56  ;;  %5563 = vmatpush1.bf16.msra.mxu1 %v7926_v57  ;;  %v8011_v56 = vld [vmem:[%s12015_s1 + $0x380] ss:$16 sps:$4 sm:$0xff]   ;;  %v8014_v57 = vld [vmem:[%s12015_s1 + $0x388] ss:$16 sps:$4 sm:$0xff]  }
  0x38   :  { %5031 = vmatprep.subr.bf16.mxu0 %v7927_v58  ;;  %5564 = vmatprep.subr.bf16.mxu1 %v7929_v59  ;;  %v8019_v58 = vld [vmem:[%s12015_s1 + $0x3a4] ss:$16 sps:$4 sm:$0xff]   ;;  %v8022_v59 = vld [vmem:[%s12015_s1 + $0x3ac] ss:$16 sps:$4 sm:$0xff]  }
  0x3b   :  { %5032 = vmatpush1.bf16.msra.mxu0 %v7931_v60  ;;  %5565 = vmatpush1.bf16.msra.mxu1 %v7932_v61  ;;  %v8017_v60 = vld [vmem:[%s12015_s1 + $0x3a0] ss:$16 sps:$4 sm:$0xff]   ;;  %v8020_v61 = vld [vmem:[%s12015_s1 + $0x3a8] ss:$16 sps:$4 sm:$0xff]  }
  0x3c   :  { %5033 = vmatprep.subr.bf16.mxu0 %v7933_v62  ;;  %5566 = vmatprep.subr.bf16.mxu1 %v7935_v63  ;;  %v8025_v62 = vld [vmem:[%s12015_s1 + $0x3c4] ss:$16 sps:$4 sm:$0xff]   ;;  %v8028_v63 = vld [vmem:[%s12015_s1 + $0x3cc] ss:$16 sps:$4 sm:$0xff]  }
  0x3f   :  { %5034 = vmatpush1.bf16.msra.mxu0 %v7937_v0  ;;  %5567 = vmatpush1.bf16.msra.mxu1 %v7938_v1  ;;  %v8023_v0 = vld [vmem:[%s12015_s1 + $0x3c0] ss:$16 sps:$4 sm:$0xff]   ;;  %v8026_v1 = vld [vmem:[%s12015_s1 + $0x3c8] ss:$16 sps:$4 sm:$0xff]  }
  0x40   :  { %5044 = vmatprep.subr.bf16.mxu0 %v7941_v3  ;;  %5577 = vmatprep.subr.bf16.mxu1 %v7944_v4  ;;  %v8034_v3 = vld [vmem:[%s12015_s1 + $0x3ec] ss:$16 sps:$4 sm:$0xff]   ;;  %v8029_v4 = vld [vmem:[%s12015_s1 + $0x3e0] ss:$16 sps:$4 sm:$0xff]  }
  0x42   :  { %5036 = vmatmul.mubr.bf16.vlgmr.msra.gmra.mrb[0].mxu0 %v55_v5  ;;  %5569 = vmatmul.mubr.bf16.vlgmr.msra.gmra.mrb[0].mxu1 %v55_v5  ;;  %v8032_v5 = vld [vmem:[%s12015_s1 + $0x3e8] ss:$16 sps:$4 sm:$0xff]  }
  0x43   :  { %5045 = vmatpush1.bf16.msra.mxu0 %v7939_v6  ;;  %5578 = vmatpush1.bf16.msra.mxu1 %v7942_v7  ;;  %v8037_v6 = vld [vmem:[%s12015_s1 + $0x404] ss:$16 sps:$4 sm:$0xff]  }
  0x44   :  { %5046 = vmatprep.subr.bf16.mxu0 %v7947_v8  ;;  %5579 = vmatprep.subr.bf16.mxu1 %v7950_v9  ;;  %v31_v7 = vld [vmem:[%s12016_s0 + $0x10] sm:$0xff]  ;;  %v8040_v8 = vld [vmem:[%s12015_s1 + $0x40c] ss:$16 sps:$4 sm:$0xff]  }
  0x45   :  { %5076 = vmatprep.mubr.bf16.mxu0 %v58_v32  ;;  %5609 = vmatprep.mubr.bf16.mxu1 %v58_v32  ;;  %v8035_v9 = vld [vmem:[%s12015_s1 + $0x400] ss:$16 sps:$4 sm:$0xff]  }
  0x46   :  { %v8065_v32 = vld [vmem:[%s12015_s1 + $0x4a0] ss:$16 sps:$4 sm:$0xff]  }
  0x47   :  { %5047 = vmatpush1.bf16.msra.mxu0 %v7945_v10  ;;  %5580 = vmatpush1.bf16.msra.mxu1 %v7948_v11  ;;  %v8038_v10 = vld [vmem:[%s12015_s1 + $0x408] ss:$16 sps:$4 sm:$0xff]   ;;  %v57_v11 = vpack.c.bf16 %v31_v7, %v31_v7  ;;  %v8130_v7 = vld [vmem:[%s12015_s1 + $0x5ec] ss:$16 sps:$4 sm:$0xff]  }
  0x48   :  { %5048 = vmatprep.subr.bf16.mxu0 %v7953_v12  ;;  %5581 = vmatprep.subr.bf16.mxu1 %v7956_v13  ;;  %v8043_v12 = vld [vmem:[%s12015_s1 + $0x424] ss:$16 sps:$4 sm:$0xff]   ;;  %v8046_v13 = vld [vmem:[%s12015_s1 + $0x42c] ss:$16 sps:$4 sm:$0xff]  }
  0x4b   :  { %5049 = vmatpush1.bf16.msra.mxu0 %v7951_v14  ;;  %5582 = vmatpush1.bf16.msra.mxu1 %v7954_v15  ;;  %v34_v14 = vld [vmem:[%s12016_s0 + $0x28] sm:$0xff] }
  0x4c   :  { %5050 = vmatprep.subr.bf16.mxu0 %v7959_v16  ;;  %5583 = vmatprep.subr.bf16.mxu1 %v7962_v17  ;;  %v60_v15 = vpack.c.bf16 %v34_v14, %v34_v14  ;;  %v8041_v16 = vld [vmem:[%s12015_s1 + $0x420] ss:$16 sps:$4 sm:$0xff]   ;;  %v8044_v17 = vld [vmem:[%s12015_s1 + $0x428] ss:$16 sps:$4 sm:$0xff]  }
  0x4d   :  { %v8134_v14 = vld [vmem:[%s12015_s1 + $0x608] ss:$16 sps:$4 sm:$0xff]  }
  0x4f   :  { %5051 = vmatpush1.bf16.msra.mxu0 %v7957_v18  ;;  %5584 = vmatpush1.bf16.msra.mxu1 %v7960_v19  ;;  %v8049_v18 = vld [vmem:[%s12015_s1 + $0x444] ss:$16 sps:$4 sm:$0xff]   ;;  %v8052_v19 = vld [vmem:[%s12015_s1 + $0x44c] ss:$16 sps:$4 sm:$0xff]  }
  0x50   :  { %5052 = vmatprep.subr.bf16.mxu0 %v7965_v20  ;;  %5585 = vmatprep.subr.bf16.mxu1 %v7968_v21  ;;  %v8047_v20 = vld [vmem:[%s12015_s1 + $0x440] ss:$16 sps:$4 sm:$0xff]   ;;  %v8050_v21 = vld [vmem:[%s12015_s1 + $0x448] ss:$16 sps:$4 sm:$0xff]  }
  0x53   :  { %5053 = vmatpush1.bf16.msra.mxu0 %v7963_v22  ;;  %5586 = vmatpush1.bf16.msra.mxu1 %v7966_v23  ;;  %v8055_v22 = vld [vmem:[%s12015_s1 + $0x464] ss:$16 sps:$4 sm:$0xff]   ;;  %v8058_v23 = vld [vmem:[%s12015_s1 + $0x46c] ss:$16 sps:$4 sm:$0xff]  }
  0x54   :  { %5054 = vmatprep.subr.bf16.mxu0 %v7971_v24  ;;  %5587 = vmatprep.subr.bf16.mxu1 %v7974_v25  ;;  %v8053_v24 = vld [vmem:[%s12015_s1 + $0x460] ss:$16 sps:$4 sm:$0xff]   ;;  %v8056_v25 = vld [vmem:[%s12015_s1 + $0x468] ss:$16 sps:$4 sm:$0xff]  }
  0x57   :  { %5055 = vmatpush1.bf16.msra.mxu0 %v7969_v26  ;;  %5588 = vmatpush1.bf16.msra.mxu1 %v7972_v27  ;;  %v8061_v26 = vld [vmem:[%s12015_s1 + $0x484] ss:$16 sps:$4 sm:$0xff]   ;;  %v8064_v27 = vld [vmem:[%s12015_s1 + $0x48c] ss:$16 sps:$4 sm:$0xff]  }
  0x58   :  { %5056 = vmatprep.subr.bf16.mxu0 %v7977_v28  ;;  %5589 = vmatprep.subr.bf16.mxu1 %v7980_v29  ;;  %v8059_v28 = vld [vmem:[%s12015_s1 + $0x480] ss:$16 sps:$4 sm:$0xff]   ;;  %v8062_v29 = vld [vmem:[%s12015_s1 + $0x488] ss:$16 sps:$4 sm:$0xff]  }
  0x5b   :  { %5057 = vmatpush1.bf16.msra.mxu0 %v7975_v31  ;;  %5590 = vmatpush1.bf16.msra.mxu1 %v7978_v33  ;;  %v8070_v31 = vld [vmem:[%s12015_s1 + $0x4ac] ss:$16 sps:$4 sm:$0xff]   ;;  %v8068_v33 = vld [vmem:[%s12015_s1 + $0x4a8] ss:$16 sps:$4 sm:$0xff]  }
  0x5c   :  { %5058 = vmatprep.subr.bf16.mxu0 %v7983_v34  ;;  %5591 = vmatprep.subr.bf16.mxu1 %v7986_v35  ;;  %v8073_v34 = vld [vmem:[%s12015_s1 + $0x4c4] ss:$16 sps:$4 sm:$0xff]   ;;  %v8076_v35 = vld [vmem:[%s12015_s1 + $0x4cc] ss:$16 sps:$4 sm:$0xff]  }
  0x5f   :  { %5059 = vmatpush1.bf16.msra.mxu0 %v7981_v36  ;;  %5592 = vmatpush1.bf16.msra.mxu1 %v7984_v37  ;;  %v8071_v36 = vld [vmem:[%s12015_s1 + $0x4c0] ss:$16 sps:$4 sm:$0xff]   ;;  %v8074_v37 = vld [vmem:[%s12015_s1 + $0x4c8] ss:$16 sps:$4 sm:$0xff]  }
  0x60   :  { %5060 = vmatprep.subr.bf16.mxu0 %v7989_v38  ;;  %5593 = vmatprep.subr.bf16.mxu1 %v7992_v39  ;;  %v8079_v38 = vld [vmem:[%s12015_s1 + $0x4e4] ss:$16 sps:$4 sm:$0xff]   ;;  %v8082_v39 = vld [vmem:[%s12015_s1 + $0x4ec] ss:$16 sps:$4 sm:$0xff]  }
  0x63   :  { %5061 = vmatpush1.bf16.msra.mxu0 %v7987_v40  ;;  %5594 = vmatpush1.bf16.msra.mxu1 %v7990_v41  ;;  %v8077_v40 = vld [vmem:[%s12015_s1 + $0x4e0] ss:$16 sps:$4 sm:$0xff]   ;;  %v8080_v41 = vld [vmem:[%s12015_s1 + $0x4e8] ss:$16 sps:$4 sm:$0xff]  }
  0x64   :  { %5062 = vmatprep.subr.bf16.mxu0 %v7995_v42  ;;  %5595 = vmatprep.subr.bf16.mxu1 %v7998_v43  ;;  %v8085_v42 = vld [vmem:[%s12015_s1 + $0x504] ss:$16 sps:$4 sm:$0xff]   ;;  %v8088_v43 = vld [vmem:[%s12015_s1 + $0x50c] ss:$16 sps:$4 sm:$0xff]  }
  0x67   :  { %5063 = vmatpush1.bf16.msra.mxu0 %v7993_v44  ;;  %5596 = vmatpush1.bf16.msra.mxu1 %v7996_v45  ;;  %v8083_v44 = vld [vmem:[%s12015_s1 + $0x500] ss:$16 sps:$4 sm:$0xff]   ;;  %v8086_v45 = vld [vmem:[%s12015_s1 + $0x508] ss:$16 sps:$4 sm:$0xff]  }
  0x68   :  { %5064 = vmatprep.subr.bf16.mxu0 %v8001_v46  ;;  %5597 = vmatprep.subr.bf16.mxu1 %v8004_v47  ;;  %v8091_v46 = vld [vmem:[%s12015_s1 + $0x524] ss:$16 sps:$4 sm:$0xff]   ;;  %v8094_v47 = vld [vmem:[%s12015_s1 + $0x52c] ss:$16 sps:$4 sm:$0xff]  }
  0x6b   :  { %5065 = vmatpush1.bf16.msra.mxu0 %v7999_v48  ;;  %5598 = vmatpush1.bf16.msra.mxu1 %v8002_v49  ;;  %v8089_v48 = vld [vmem:[%s12015_s1 + $0x520] ss:$16 sps:$4 sm:$0xff]   ;;  %v8092_v49 = vld [vmem:[%s12015_s1 + $0x528] ss:$16 sps:$4 sm:$0xff]  }
  0x6c   :  { %5066 = vmatprep.subr.bf16.mxu0 %v8007_v50  ;;  %5599 = vmatprep.subr.bf16.mxu1 %v8010_v51  ;;  %v8097_v50 = vld [vmem:[%s12015_s1 + $0x544] ss:$16 sps:$4 sm:$0xff]   ;;  %v8100_v51 = vld [vmem:[%s12015_s1 + $0x54c] ss:$16 sps:$4 sm:$0xff]  }
  0x6f   :  { %5067 = vmatpush1.bf16.msra.mxu0 %v8005_v52  ;;  %5600 = vmatpush1.bf16.msra.mxu1 %v8008_v53  ;;  %v8095_v52 = vld [vmem:[%s12015_s1 + $0x540] ss:$16 sps:$4 sm:$0xff]   ;;  %v8098_v53 = vld [vmem:[%s12015_s1 + $0x548] ss:$16 sps:$4 sm:$0xff]  }
  0x70   :  { %5068 = vmatprep.subr.bf16.mxu0 %v8013_v54  ;;  %5601 = vmatprep.subr.bf16.mxu1 %v8016_v55  ;;  %v8103_v54 = vld [vmem:[%s12015_s1 + $0x564] ss:$16 sps:$4 sm:$0xff]   ;;  %v8106_v55 = vld [vmem:[%s12015_s1 + $0x56c] ss:$16 sps:$4 sm:$0xff]  }
  0x73   :  { %5069 = vmatpush1.bf16.msra.mxu0 %v8011_v56  ;;  %5602 = vmatpush1.bf16.msra.mxu1 %v8014_v57  ;;  %v8101_v56 = vld [vmem:[%s12015_s1 + $0x560] ss:$16 sps:$4 sm:$0xff]   ;;  %v8104_v57 = vld [vmem:[%s12015_s1 + $0x568] ss:$16 sps:$4 sm:$0xff]  }
  0x74   :  { %5070 = vmatprep.subr.bf16.mxu0 %v8019_v58  ;;  %5603 = vmatprep.subr.bf16.mxu1 %v8022_v59  ;;  %v8109_v58 = vld [vmem:[%s12015_s1 + $0x584] ss:$16 sps:$4 sm:$0xff]   ;;  %v8112_v59 = vld [vmem:[%s12015_s1 + $0x58c] ss:$16 sps:$4 sm:$0xff]  }
  0x77   :  { %5071 = vmatpush1.bf16.msra.mxu0 %v8017_v60  ;;  %5604 = vmatpush1.bf16.msra.mxu1 %v8020_v61  ;;  %v8107_v60 = vld [vmem:[%s12015_s1 + $0x580] ss:$16 sps:$4 sm:$0xff]   ;;  %v8110_v61 = vld [vmem:[%s12015_s1 + $0x588] ss:$16 sps:$4 sm:$0xff]  }
  0x78   :  { %5072 = vmatprep.subr.bf16.mxu0 %v8025_v62  ;;  %5605 = vmatprep.subr.bf16.mxu1 %v8028_v63  ;;  %v8115_v62 = vld [vmem:[%s12015_s1 + $0x5a4] ss:$16 sps:$4 sm:$0xff]   ;;  %v8118_v63 = vld [vmem:[%s12015_s1 + $0x5ac] ss:$16 sps:$4 sm:$0xff]  }
  0x7b   :  { %5073 = vmatpush1.bf16.msra.mxu0 %v8023_v0  ;;  %5606 = vmatpush1.bf16.msra.mxu1 %v8026_v1  ;;  %v8113_v0 = vld [vmem:[%s12015_s1 + $0x5a0] ss:$16 sps:$4 sm:$0xff]   ;;  %v8116_v1 = vld [vmem:[%s12015_s1 + $0x5a8] ss:$16 sps:$4 sm:$0xff]  }
  0x7c   :  { %5074 = vmatprep.subr.bf16.mxu0 %v8031_v2  ;;  %5607 = vmatprep.subr.bf16.mxu1 %v8034_v3  ;;  %v8121_v2 = vld [vmem:[%s12015_s1 + $0x5c4] ss:$16 sps:$4 sm:$0xff]   ;;  %v8124_v3 = vld [vmem:[%s12015_s1 + $0x5cc] ss:$16 sps:$4 sm:$0xff]  }
  0x7f   :  { %5075 = vmatpush1.bf16.msra.mxu0 %v8029_v4  ;;  %5608 = vmatpush1.bf16.msra.mxu1 %v8032_v5  ;;  %v8119_v4 = vld [vmem:[%s12015_s1 + $0x5c0] ss:$16 sps:$4 sm:$0xff]   ;;  %v8122_v5 = vld [vmem:[%s12015_s1 + $0x5c8] ss:$16 sps:$4 sm:$0xff]  }
  0x80   :  { %5085 = vmatprep.subr.bf16.mxu0 %v8037_v6  ;;  %5618 = vmatprep.subr.bf16.mxu1 %v8040_v8  ;;  %v8127_v6 = vld [vmem:[%s12015_s1 + $0x5e4] ss:$16 sps:$4 sm:$0xff]   ;;  %v8125_v8 = vld [vmem:[%s12015_s1 + $0x5e0] ss:$16 sps:$4 sm:$0xff]  }
  0x82   :  { %5077 = vmatmul.mubr.bf16.vlgmr.msra.gmra.mrb[0].mxu0 %v57_v11  ;;  %5610 = vmatmul.mubr.bf16.vlgmr.msra.gmra.mrb[0].mxu1 %v57_v11  ;;  %v33_v11 = vld [vmem:[%s12016_s0 + $0x20] sm:$0xff] }
  0x83   :  { %5086 = vmatpush1.bf16.msra.mxu0 %v8035_v9  ;;  %5619 = vmatpush1.bf16.msra.mxu1 %v8038_v10  ;;  %v8128_v9 = vld [vmem:[%s12015_s1 + $0x5e8] ss:$16 sps:$4 sm:$0xff]   ;;  %v8133_v10 = vld [vmem:[%s12015_s1 + $0x604] ss:$16 sps:$4 sm:$0xff]  }
  0x84   :  { %5087 = vmatprep.subr.bf16.mxu0 %v8043_v12  ;;  %5620 = vmatprep.subr.bf16.mxu1 %v8046_v13  ;;  %v8136_v12 = vld [vmem:[%s12015_s1 + $0x60c] ss:$16 sps:$4 sm:$0xff]   ;;  %v8131_v13 = vld [vmem:[%s12015_s1 + $0x600] ss:$16 sps:$4 sm:$0xff]  }
  0x85   :  { %5117 = vmatprep.mubr.bf16.mxu0 %v60_v15  ;;  %5650 = vmatprep.mubr.bf16.mxu1 %v60_v15  ;;  %v59_v15 = vpack.c.bf16 %v33_v11, %v33_v11  ;;  %v8226_v11 = vld [vmem:[%s12015_s1 + $0x7ec] ss:$16 sps:$4 sm:$0xff]  }
  0x87   :  { %5088 = vmatpush1.bf16.msra.mxu0 %v8041_v16  ;;  %5621 = vmatpush1.bf16.msra.mxu1 %v8044_v17  ;;  %v36_v16 = vld [vmem:[%s12016_s0 + $0x38] sm:$0xff]  ;;  %v8139_v17 = vld [vmem:[%s12015_s1 + $0x624] ss:$16 sps:$4 sm:$0xff]  }
  0x88   :  { %5089 = vmatprep.subr.bf16.mxu0 %v8049_v18  ;;  %5622 = vmatprep.subr.bf16.mxu1 %v8052_v19  ;;  %v8142_v18 = vld [vmem:[%s12015_s1 + $0x62c] ss:$16 sps:$4 sm:$0xff]   ;;  %v62_v19 = vpack.c.bf16 %v36_v16, %v36_v16 }
  0x89   :  { %v8232_v16 = vld [vmem:[%s12015_s1 + $0x80c] ss:$16 sps:$4 sm:$0xff]  }
  0x8b   :  { %5090 = vmatpush1.bf16.msra.mxu0 %v8047_v20  ;;  %5623 = vmatpush1.bf16.msra.mxu1 %v8050_v21  ;;  %v8137_v20 = vld [vmem:[%s12015_s1 + $0x620] ss:$16 sps:$4 sm:$0xff]   ;;  %v8140_v21 = vld [vmem:[%s12015_s1 + $0x628] ss:$16 sps:$4 sm:$0xff]  }
  0x8c   :  { %5091 = vmatprep.subr.bf16.mxu0 %v8055_v22  ;;  %5624 = vmatprep.subr.bf16.mxu1 %v8058_v23  ;;  %v8145_v22 = vld [vmem:[%s12015_s1 + $0x644] ss:$16 sps:$4 sm:$0xff]   ;;  %v8148_v23 = vld [vmem:[%s12015_s1 + $0x64c] ss:$16 sps:$4 sm:$0xff]  }
  0x8f   :  { %5092 = vmatpush1.bf16.msra.mxu0 %v8053_v24  ;;  %5625 = vmatpush1.bf16.msra.mxu1 %v8056_v25  ;;  %v8143_v24 = vld [vmem:[%s12015_s1 + $0x640] ss:$16 sps:$4 sm:$0xff]   ;;  %v8146_v25 = vld [vmem:[%s12015_s1 + $0x648] ss:$16 sps:$4 sm:$0xff]  }
  0x90   :  { %5093 = vmatprep.subr.bf16.mxu0 %v8061_v26  ;;  %5626 = vmatprep.subr.bf16.mxu1 %v8064_v27  ;;  %v8151_v26 = vld [vmem:[%s12015_s1 + $0x664] ss:$16 sps:$4 sm:$0xff]   ;;  %v8154_v27 = vld [vmem:[%s12015_s1 + $0x66c] ss:$16 sps:$4 sm:$0xff]  }
  0x93   :  { %5094 = vmatpush1.bf16.msra.mxu0 %v8059_v28  ;;  %5627 = vmatpush1.bf16.msra.mxu1 %v8062_v29  ;;  %v8149_v28 = vld [vmem:[%s12015_s1 + $0x660] ss:$16 sps:$4 sm:$0xff]   ;;  %v8152_v29 = vld [vmem:[%s12015_s1 + $0x668] ss:$16 sps:$4 sm:$0xff]  }
  0x94   :  { %5095 = vmatprep.subr.bf16.mxu0 %v8067_v30  ;;  %5628 = vmatprep.subr.bf16.mxu1 %v8070_v31  ;;  %v8157_v30 = vld [vmem:[%s12015_s1 + $0x684] ss:$16 sps:$4 sm:$0xff]   ;;  %v8160_v31 = vld [vmem:[%s12015_s1 + $0x68c] ss:$16 sps:$4 sm:$0xff]  }
  0x97   :  { %5096 = vmatpush1.bf16.msra.mxu0 %v8065_v32  ;;  %5629 = vmatpush1.bf16.msra.mxu1 %v8068_v33  ;;  %v8155_v32 = vld [vmem:[%s12015_s1 + $0x680] ss:$16 sps:$4 sm:$0xff]   ;;  %v8158_v33 = vld [vmem:[%s12015_s1 + $0x688] ss:$16 sps:$4 sm:$0xff]  }
  0x98   :  { %5097 = vmatprep.subr.bf16.mxu0 %v8073_v34  ;;  %5630 = vmatprep.subr.bf16.mxu1 %v8076_v35  ;;  %v8163_v34 = vld [vmem:[%s12015_s1 + $0x6a4] ss:$16 sps:$4 sm:$0xff]   ;;  %v8166_v35 = vld [vmem:[%s12015_s1 + $0x6ac] ss:$16 sps:$4 sm:$0xff]  }
  0x9b   :  { %5098 = vmatpush1.bf16.msra.mxu0 %v8071_v36  ;;  %5631 = vmatpush1.bf16.msra.mxu1 %v8074_v37  ;;  %v8161_v36 = vld [vmem:[%s12015_s1 + $0x6a0] ss:$16 sps:$4 sm:$0xff]   ;;  %v8164_v37 = vld [vmem:[%s12015_s1 + $0x6a8] ss:$16 sps:$4 sm:$0xff]  }
  0x9c   :  { %5099 = vmatprep.subr.bf16.mxu0 %v8079_v38  ;;  %5632 = vmatprep.subr.bf16.mxu1 %v8082_v39  ;;  %v8169_v38 = vld [vmem:[%s12015_s1 + $0x6c4] ss:$16 sps:$4 sm:$0xff]   ;;  %v8172_v39 = vld [vmem:[%s12015_s1 + $0x6cc] ss:$16 sps:$4 sm:$0xff]  }
  0x9f   :  { %5100 = vmatpush1.bf16.msra.mxu0 %v8077_v40  ;;  %5633 = vmatpush1.bf16.msra.mxu1 %v8080_v41  ;;  %v8167_v40 = vld [vmem:[%s12015_s1 + $0x6c0] ss:$16 sps:$4 sm:$0xff]   ;;  %v8170_v41 = vld [vmem:[%s12015_s1 + $0x6c8] ss:$16 sps:$4 sm:$0xff]  }
  0xa0   :  { %5101 = vmatprep.subr.bf16.mxu0 %v8085_v42  ;;  %5634 = vmatprep.subr.bf16.mxu1 %v8088_v43  ;;  %v8175_v42 = vld [vmem:[%s12015_s1 + $0x6e4] ss:$16 sps:$4 sm:$0xff]   ;;  %v8178_v43 = vld [vmem:[%s12015_s1 + $0x6ec] ss:$16 sps:$4 sm:$0xff]  }
  0xa3   :  { %5102 = vmatpush1.bf16.msra.mxu0 %v8083_v44  ;;  %5635 = vmatpush1.bf16.msra.mxu1 %v8086_v45  ;;  %v8173_v44 = vld [vmem:[%s12015_s1 + $0x6e0] ss:$16 sps:$4 sm:$0xff]   ;;  %v8176_v45 = vld [vmem:[%s12015_s1 + $0x6e8] ss:$16 sps:$4 sm:$0xff]  }
  0xa4   :  { %5103 = vmatprep.subr.bf16.mxu0 %v8091_v46  ;;  %5636 = vmatprep.subr.bf16.mxu1 %v8094_v47  ;;  %v8181_v46 = vld [vmem:[%s12015_s1 + $0x704] ss:$16 sps:$4 sm:$0xff]   ;;  %v8184_v47 = vld [vmem:[%s12015_s1 + $0x70c] ss:$16 sps:$4 sm:$0xff]  }
  0xa7   :  { %5104 = vmatpush1.bf16.msra.mxu0 %v8089_v48  ;;  %5637 = vmatpush1.bf16.msra.mxu1 %v8092_v49  ;;  %v8179_v48 = vld [vmem:[%s12015_s1 + $0x700] ss:$16 sps:$4 sm:$0xff]   ;;  %v8182_v49 = vld [vmem:[%s12015_s1 + $0x708] ss:$16 sps:$4 sm:$0xff]  }
  0xa8   :  { %5105 = vmatprep.subr.bf16.mxu0 %v8097_v50  ;;  %5638 = vmatprep.subr.bf16.mxu1 %v8100_v51  ;;  %v8187_v50 = vld [vmem:[%s12015_s1 + $0x724] ss:$16 sps:$4 sm:$0xff]   ;;  %v8190_v51 = vld [vmem:[%s12015_s1 + $0x72c] ss:$16 sps:$4 sm:$0xff]  }
  0xab   :  { %5106 = vmatpush1.bf16.msra.mxu0 %v8095_v52  ;;  %5639 = vmatpush1.bf16.msra.mxu1 %v8098_v53  ;;  %v8185_v52 = vld [vmem:[%s12015_s1 + $0x720] ss:$16 sps:$4 sm:$0xff]   ;;  %v8188_v53 = vld [vmem:[%s12015_s1 + $0x728] ss:$16 sps:$4 sm:$0xff]  }
  0xac   :  { %5107 = vmatprep.subr.bf16.mxu0 %v8103_v54  ;;  %5640 = vmatprep.subr.bf16.mxu1 %v8106_v55  ;;  %v8193_v54 = vld [vmem:[%s12015_s1 + $0x744] ss:$16 sps:$4 sm:$0xff]   ;;  %v8196_v55 = vld [vmem:[%s12015_s1 + $0x74c] ss:$16 sps:$4 sm:$0xff]  }
  0xaf   :  { %5108 = vmatpush1.bf16.msra.mxu0 %v8101_v56  ;;  %5641 = vmatpush1.bf16.msra.mxu1 %v8104_v57  ;;  %v8191_v56 = vld [vmem:[%s12015_s1 + $0x740] ss:$16 sps:$4 sm:$0xff]   ;;  %v8194_v57 = vld [vmem:[%s12015_s1 + $0x748] ss:$16 sps:$4 sm:$0xff]  }
  0xb0   :  { %5109 = vmatprep.subr.bf16.mxu0 %v8109_v58  ;;  %5642 = vmatprep.subr.bf16.mxu1 %v8112_v59  ;;  %v8199_v58 = vld [vmem:[%s12015_s1 + $0x764] ss:$16 sps:$4 sm:$0xff]   ;;  %v8202_v59 = vld [vmem:[%s12015_s1 + $0x76c] ss:$16 sps:$4 sm:$0xff]  }
  0xb3   :  { %5110 = vmatpush1.bf16.msra.mxu0 %v8107_v60  ;;  %5643 = vmatpush1.bf16.msra.mxu1 %v8110_v61  ;;  %v8197_v60 = vld [vmem:[%s12015_s1 + $0x760] ss:$16 sps:$4 sm:$0xff]   ;;  %v8200_v61 = vld [vmem:[%s12015_s1 + $0x768] ss:$16 sps:$4 sm:$0xff]  }
  0xb4   :  { %5111 = vmatprep.subr.bf16.mxu0 %v8115_v62  ;;  %5644 = vmatprep.subr.bf16.mxu1 %v8118_v63  ;;  %v8205_v62 = vld [vmem:[%s12015_s1 + $0x784] ss:$16 sps:$4 sm:$0xff]   ;;  %v8208_v63 = vld [vmem:[%s12015_s1 + $0x78c] ss:$16 sps:$4 sm:$0xff]  }
  0xb7   :  { %5112 = vmatpush1.bf16.msra.mxu0 %v8113_v0  ;;  %5645 = vmatpush1.bf16.msra.mxu1 %v8116_v1  ;;  %v8203_v0 = vld [vmem:[%s12015_s1 + $0x780] ss:$16 sps:$4 sm:$0xff]   ;;  %v8206_v1 = vld [vmem:[%s12015_s1 + $0x788] ss:$16 sps:$4 sm:$0xff]  }
  0xb8   :  { %5113 = vmatprep.subr.bf16.mxu0 %v8121_v2  ;;  %5646 = vmatprep.subr.bf16.mxu1 %v8124_v3  ;;  %v8211_v2 = vld [vmem:[%s12015_s1 + $0x7a4] ss:$16 sps:$4 sm:$0xff]   ;;  %v8214_v3 = vld [vmem:[%s12015_s1 + $0x7ac] ss:$16 sps:$4 sm:$0xff]  }
  0xbb   :  { %5114 = vmatpush1.bf16.msra.mxu0 %v8119_v4  ;;  %5647 = vmatpush1.bf16.msra.mxu1 %v8122_v5  ;;  %v8209_v4 = vld [vmem:[%s12015_s1 + $0x7a0] ss:$16 sps:$4 sm:$0xff]   ;;  %v8212_v5 = vld [vmem:[%s12015_s1 + $0x7a8] ss:$16 sps:$4 sm:$0xff]  }
  0xbc   :  { %5115 = vmatprep.subr.bf16.mxu0 %v8127_v6  ;;  %5648 = vmatprep.subr.bf16.mxu1 %v8130_v7  ;;  %v8217_v6 = vld [vmem:[%s12015_s1 + $0x7c4] ss:$16 sps:$4 sm:$0xff]   ;;  %v8220_v7 = vld [vmem:[%s12015_s1 + $0x7cc] ss:$16 sps:$4 sm:$0xff]  }
  0xbf   :  { %5116 = vmatpush1.bf16.msra.mxu0 %v8125_v8  ;;  %5649 = vmatpush1.bf16.msra.mxu1 %v8128_v9  ;;  %v8215_v8 = vld [vmem:[%s12015_s1 + $0x7c0] ss:$16 sps:$4 sm:$0xff]   ;;  %v8218_v9 = vld [vmem:[%s12015_s1 + $0x7c8] ss:$16 sps:$4 sm:$0xff]  }
  0xc0   :  { %5126 = vmatprep.subr.bf16.mxu0 %v8133_v10  ;;  %5659 = vmatprep.subr.bf16.mxu1 %v8136_v12  ;;  %v8223_v10 = vld [vmem:[%s12015_s1 + $0x7e4] ss:$16 sps:$4 sm:$0xff]   ;;  %v8221_v12 = vld [vmem:[%s12015_s1 + $0x7e0] ss:$16 sps:$4 sm:$0xff]  }
  0xc2   :  { %5118 = vmatmul.mubr.bf16.vlgmr.msra.gmra.mrb[0].mxu0 %v59_v15  ;;  %5651 = vmatmul.mubr.bf16.vlgmr.msra.gmra.mrb[0].mxu1 %v59_v15  ;;  %v8229_v15 = vld [vmem:[%s12015_s1 + $0x804] ss:$16 sps:$4 sm:$0xff]  }
  0xc3   :  { %5127 = vmatpush1.bf16.msra.mxu0 %v8131_v13  ;;  %5660 = vmatpush1.bf16.msra.mxu1 %v8134_v14  ;;  %v8224_v13 = vld [vmem:[%s12015_s1 + $0x7e8] ss:$16 sps:$4 sm:$0xff]   ;;  %v35_v14 = vld [vmem:[%s12016_s0 + $0x30] sm:$0xff] }
  0xc4   :  { %5128 = vmatprep.subr.bf16.mxu0 %v8139_v17  ;;  %5661 = vmatprep.subr.bf16.mxu1 %v8142_v18  ;;  %v61_v17 = vpack.c.bf16 %v35_v14, %v35_v14  ;;  %v38_v18 = vld [vmem:[%s12016_s0 + $0x48] sm:$0xff]  ;;  %v8319_v14 = vld [vmem:[%s12015_s1 + $0x9e4] ss:$16 sps:$4 sm:$0xff]  }
  0xc5   :  { %5158 = vmatprep.mubr.bf16.mxu0 %v62_v19  ;;  %5691 = vmatprep.mubr.bf16.mxu1 %v62_v19  ;;  %v8227_v19 = vld [vmem:[%s12015_s1 + $0x800] ss:$16 sps:$4 sm:$0xff]  }
  0xc7   :  { %5129 = vmatpush1.bf16.msra.mxu0 %v8137_v20  ;;  %5662 = vmatpush1.bf16.msra.mxu1 %v8140_v21  ;;  %v8230_v20 = vld [vmem:[%s12015_s1 + $0x808] ss:$16 sps:$4 sm:$0xff]   ;;  %v8235_v21 = vld [vmem:[%s12015_s1 + $0x824] ss:$16 sps:$4 sm:$0xff]  }
  0xc8   :  { %5130 = vmatprep.subr.bf16.mxu0 %v8145_v22  ;;  %5663 = vmatprep.subr.bf16.mxu1 %v8148_v23  ;;  %v8238_v22 = vld [vmem:[%s12015_s1 + $0x82c] ss:$16 sps:$4 sm:$0xff]   ;;  %v64_v23 = vpack.c.bf16 %v38_v18, %v38_v18  ;;  %v8325_v18 = vld [vmem:[%s12015_s1 + $0xa04] ss:$16 sps:$4 sm:$0xff]  }
  0xcb   :  { %5131 = vmatpush1.bf16.msra.mxu0 %v8143_v24  ;;  %5664 = vmatpush1.bf16.msra.mxu1 %v8146_v25  ;;  %v8233_v24 = vld [vmem:[%s12015_s1 + $0x820] ss:$16 sps:$4 sm:$0xff]   ;;  %v8236_v25 = vld [vmem:[%s12015_s1 + $0x828] ss:$16 sps:$4 sm:$0xff]  }
  0xcc   :  { %5132 = vmatprep.subr.bf16.mxu0 %v8151_v26  ;;  %5665 = vmatprep.subr.bf16.mxu1 %v8154_v27  ;;  %v8241_v26 = vld [vmem:[%s12015_s1 + $0x844] ss:$16 sps:$4 sm:$0xff]   ;;  %v8244_v27 = vld [vmem:[%s12015_s1 + $0x84c] ss:$16 sps:$4 sm:$0xff]  }
  0xcf   :  { %5133 = vmatpush1.bf16.msra.mxu0 %v8149_v28  ;;  %5666 = vmatpush1.bf16.msra.mxu1 %v8152_v29  ;;  %v8239_v28 = vld [vmem:[%s12015_s1 + $0x840] ss:$16 sps:$4 sm:$0xff]   ;;  %v8242_v29 = vld [vmem:[%s12015_s1 + $0x848] ss:$16 sps:$4 sm:$0xff]  }
  0xd0   :  { %5134 = vmatprep.subr.bf16.mxu0 %v8157_v30  ;;  %5667 = vmatprep.subr.bf16.mxu1 %v8160_v31  ;;  %v8247_v30 = vld [vmem:[%s12015_s1 + $0x864] ss:$16 sps:$4 sm:$0xff]   ;;  %v8250_v31 = vld [vmem:[%s12015_s1 + $0x86c] ss:$16 sps:$4 sm:$0xff]  }
  0xd3   :  { %5135 = vmatpush1.bf16.msra.mxu0 %v8155_v32  ;;  %5668 = vmatpush1.bf16.msra.mxu1 %v8158_v33  ;;  %v8245_v32 = vld [vmem:[%s12015_s1 + $0x860] ss:$16 sps:$4 sm:$0xff]   ;;  %v8248_v33 = vld [vmem:[%s12015_s1 + $0x868] ss:$16 sps:$4 sm:$0xff]  }
  0xd4   :  { %5136 = vmatprep.subr.bf16.mxu0 %v8163_v34  ;;  %5669 = vmatprep.subr.bf16.mxu1 %v8166_v35  ;;  %v8253_v34 = vld [vmem:[%s12015_s1 + $0x884] ss:$16 sps:$4 sm:$0xff]   ;;  %v8256_v35 = vld [vmem:[%s12015_s1 + $0x88c] ss:$16 sps:$4 sm:$0xff]  }
  0xd7   :  { %5137 = vmatpush1.bf16.msra.mxu0 %v8161_v36  ;;  %5670 = vmatpush1.bf16.msra.mxu1 %v8164_v37  ;;  %v8251_v36 = vld [vmem:[%s12015_s1 + $0x880] ss:$16 sps:$4 sm:$0xff]   ;;  %v8254_v37 = vld [vmem:[%s12015_s1 + $0x888] ss:$16 sps:$4 sm:$0xff]  }
  0xd8   :  { %5138 = vmatprep.subr.bf16.mxu0 %v8169_v38  ;;  %5671 = vmatprep.subr.bf16.mxu1 %v8172_v39  ;;  %v8259_v38 = vld [vmem:[%s12015_s1 + $0x8a4] ss:$16 sps:$4 sm:$0xff]   ;;  %v8262_v39 = vld [vmem:[%s12015_s1 + $0x8ac] ss:$16 sps:$4 sm:$0xff]  }
  0xdb   :  { %5139 = vmatpush1.bf16.msra.mxu0 %v8167_v40  ;;  %5672 = vmatpush1.bf16.msra.mxu1 %v8170_v41  ;;  %v8257_v40 = vld [vmem:[%s12015_s1 + $0x8a0] ss:$16 sps:$4 sm:$0xff]   ;;  %v8260_v41 = vld [vmem:[%s12015_s1 + $0x8a8] ss:$16 sps:$4 sm:$0xff]  }
  0xdc   :  { %5140 = vmatprep.subr.bf16.mxu0 %v8175_v42  ;;  %5673 = vmatprep.subr.bf16.mxu1 %v8178_v43  ;;  %v8265_v42 = vld [vmem:[%s12015_s1 + $0x8c4] ss:$16 sps:$4 sm:$0xff]   ;;  %v8268_v43 = vld [vmem:[%s12015_s1 + $0x8cc] ss:$16 sps:$4 sm:$0xff]  }
  0xdf   :  { %5141 = vmatpush1.bf16.msra.mxu0 %v8173_v44  ;;  %5674 = vmatpush1.bf16.msra.mxu1 %v8176_v45  ;;  %v8263_v44 = vld [vmem:[%s12015_s1 + $0x8c0] ss:$16 sps:$4 sm:$0xff]   ;;  %v8266_v45 = vld [vmem:[%s12015_s1 + $0x8c8] ss:$16 sps:$4 sm:$0xff]  }
  0xe0   :  { %5142 = vmatprep.subr.bf16.mxu0 %v8181_v46  ;;  %5675 = vmatprep.subr.bf16.mxu1 %v8184_v47  ;;  %v8271_v46 = vld [vmem:[%s12015_s1 + $0x8e4] ss:$16 sps:$4 sm:$0xff]   ;;  %v8274_v47 = vld [vmem:[%s12015_s1 + $0x8ec] ss:$16 sps:$4 sm:$0xff]  }
  0xe3   :  { %5143 = vmatpush1.bf16.msra.mxu0 %v8179_v48  ;;  %5676 = vmatpush1.bf16.msra.mxu1 %v8182_v49  ;;  %v8269_v48 = vld [vmem:[%s12015_s1 + $0x8e0] ss:$16 sps:$4 sm:$0xff]   ;;  %v8272_v49 = vld [vmem:[%s12015_s1 + $0x8e8] ss:$16 sps:$4 sm:$0xff]  }
  0xe4   :  { %5144 = vmatprep.subr.bf16.mxu0 %v8187_v50  ;;  %5677 = vmatprep.subr.bf16.mxu1 %v8190_v51  ;;  %v8277_v50 = vld [vmem:[%s12015_s1 + $0x904] ss:$16 sps:$4 sm:$0xff]   ;;  %v8280_v51 = vld [vmem:[%s12015_s1 + $0x90c] ss:$16 sps:$4 sm:$0xff]  }
  0xe7   :  { %5145 = vmatpush1.bf16.msra.mxu0 %v8185_v52  ;;  %5678 = vmatpush1.bf16.msra.mxu1 %v8188_v53  ;;  %v8275_v52 = vld [vmem:[%s12015_s1 + $0x900] ss:$16 sps:$4 sm:$0xff]   ;;  %v8278_v53 = vld [vmem:[%s12015_s1 + $0x908] ss:$16 sps:$4 sm:$0xff]  }
  0xe8   :  { %5146 = vmatprep.subr.bf16.mxu0 %v8193_v54  ;;  %5679 = vmatprep.subr.bf16.mxu1 %v8196_v55  ;;  %v8283_v54 = vld [vmem:[%s12015_s1 + $0x924] ss:$16 sps:$4 sm:$0xff]   ;;  %v8286_v55 = vld [vmem:[%s12015_s1 + $0x92c] ss:$16 sps:$4 sm:$0xff]  }
  0xeb   :  { %5147 = vmatpush1.bf16.msra.mxu0 %v8191_v56  ;;  %5680 = vmatpush1.bf16.msra.mxu1 %v8194_v57  ;;  %v8281_v56 = vld [vmem:[%s12015_s1 + $0x920] ss:$16 sps:$4 sm:$0xff]   ;;  %v8284_v57 = vld [vmem:[%s12015_s1 + $0x928] ss:$16 sps:$4 sm:$0xff]  }
  0xec   :  { %5148 = vmatprep.subr.bf16.mxu0 %v8199_v58  ;;  %5681 = vmatprep.subr.bf16.mxu1 %v8202_v59  ;;  %v8289_v58 = vld [vmem:[%s12015_s1 + $0x944] ss:$16 sps:$4 sm:$0xff]   ;;  %v8292_v59 = vld [vmem:[%s12015_s1 + $0x94c] ss:$16 sps:$4 sm:$0xff]  }
  0xef   :  { %5149 = vmatpush1.bf16.msra.mxu0 %v8197_v60  ;;  %5682 = vmatpush1.bf16.msra.mxu1 %v8200_v61  ;;  %v8287_v60 = vld [vmem:[%s12015_s1 + $0x940] ss:$16 sps:$4 sm:$0xff]   ;;  %v8290_v61 = vld [vmem:[%s12015_s1 + $0x948] ss:$16 sps:$4 sm:$0xff]  }
  0xf0   :  { %5150 = vmatprep.subr.bf16.mxu0 %v8205_v62  ;;  %5683 = vmatprep.subr.bf16.mxu1 %v8208_v63  ;;  %v8295_v62 = vld [vmem:[%s12015_s1 + $0x964] ss:$16 sps:$4 sm:$0xff]   ;;  %v8298_v63 = vld [vmem:[%s12015_s1 + $0x96c] ss:$16 sps:$4 sm:$0xff]  }
  0xf3   :  { %5151 = vmatpush1.bf16.msra.mxu0 %v8203_v0  ;;  %5684 = vmatpush1.bf16.msra.mxu1 %v8206_v1  ;;  %v8293_v0 = vld [vmem:[%s12015_s1 + $0x960] ss:$16 sps:$4 sm:$0xff]   ;;  %v8296_v1 = vld [vmem:[%s12015_s1 + $0x968] ss:$16 sps:$4 sm:$0xff]  }
  0xf4   :  { %5152 = vmatprep.subr.bf16.mxu0 %v8211_v2  ;;  %5685 = vmatprep.subr.bf16.mxu1 %v8214_v3  ;;  %v8301_v2 = vld [vmem:[%s12015_s1 + $0x984] ss:$16 sps:$4 sm:$0xff]   ;;  %v8304_v3 = vld [vmem:[%s12015_s1 + $0x98c] ss:$16 sps:$4 sm:$0xff]  }
  0xf7   :  { %5153 = vmatpush1.bf16.msra.mxu0 %v8209_v4  ;;  %5686 = vmatpush1.bf16.msra.mxu1 %v8212_v5  ;;  %v8299_v4 = vld [vmem:[%s12015_s1 + $0x980] ss:$16 sps:$4 sm:$0xff]   ;;  %v8302_v5 = vld [vmem:[%s12015_s1 + $0x988] ss:$16 sps:$4 sm:$0xff]  }
  0xf8   :  { %5154 = vmatprep.subr.bf16.mxu0 %v8217_v6  ;;  %5687 = vmatprep.subr.bf16.mxu1 %v8220_v7  ;;  %v8307_v6 = vld [vmem:[%s12015_s1 + $0x9a4] ss:$16 sps:$4 sm:$0xff]   ;;  %v8310_v7 = vld [vmem:[%s12015_s1 + $0x9ac] ss:$16 sps:$4 sm:$0xff]  }
  0xfb   :  { %5155 = vmatpush1.bf16.msra.mxu0 %v8215_v8  ;;  %5688 = vmatpush1.bf16.msra.mxu1 %v8218_v9  ;;  %v8305_v8 = vld [vmem:[%s12015_s1 + $0x9a0] ss:$16 sps:$4 sm:$0xff]   ;;  %v8308_v9 = vld [vmem:[%s12015_s1 + $0x9a8] ss:$16 sps:$4 sm:$0xff]  }
  0xfc   :  { %5156 = vmatprep.subr.bf16.mxu0 %v8223_v10  ;;  %5689 = vmatprep.subr.bf16.mxu1 %v8226_v11  ;;  %v8313_v10 = vld [vmem:[%s12015_s1 + $0x9c4] ss:$16 sps:$4 sm:$0xff]   ;;  %v8316_v11 = vld [vmem:[%s12015_s1 + $0x9cc] ss:$16 sps:$4 sm:$0xff]  }
  0xff   :  { %5157 = vmatpush1.bf16.msra.mxu0 %v8221_v12  ;;  %5690 = vmatpush1.bf16.msra.mxu1 %v8224_v13  ;;  %v8311_v12 = vld [vmem:[%s12015_s1 + $0x9c0] ss:$16 sps:$4 sm:$0xff]   ;;  %v8314_v13 = vld [vmem:[%s12015_s1 + $0x9c8] ss:$16 sps:$4 sm:$0xff]  }
 0x100   :  { %5167 = vmatprep.subr.bf16.mxu0 %v8229_v15  ;;  %5700 = vmatprep.subr.bf16.mxu1 %v8232_v16  ;;  %v8322_v15 = vld [vmem:[%s12015_s1 + $0x9ec] ss:$16 sps:$4 sm:$0xff]   ;;  %v8317_v16 = vld [vmem:[%s12015_s1 + $0x9e0] ss:$16 sps:$4 sm:$0xff]  }
 0x102   :  { %5159 = vmatmul.mubr.bf16.vlgmr.msra.gmra.mrb[0].mxu0 %v61_v17  ;;  %5692 = vmatmul.mubr.bf16.vlgmr.msra.gmra.mrb[0].mxu1 %v61_v17  ;;  %v8320_v17 = vld [vmem:[%s12015_s1 + $0x9e8] ss:$16 sps:$4 sm:$0xff]  }
 0x103   :  { %5168 = vmatpush1.bf16.msra.mxu0 %v8227_v19  ;;  %5701 = vmatpush1.bf16.msra.mxu1 %v8230_v20  ;;  %v37_v19 = vld [vmem:[%s12016_s0 + $0x40] sm:$0xff]  ;;  %v8328_v20 = vld [vmem:[%s12015_s1 + $0xa0c] ss:$16 sps:$4 sm:$0xff]  }
 0x104   :  { %5169 = vmatprep.subr.bf16.mxu0 %v8235_v21  ;;  %5702 = vmatprep.subr.bf16.mxu1 %v8238_v22  ;;  %v40_v21 = vld [vmem:[%s12016_s0 + $0x58] sm:$0xff]  ;;  %v63_v22 = vpack.c.bf16 %v37_v19, %v37_v19 }
 0x105   :  { %5199 = vmatprep.mubr.bf16.mxu0 %v64_v23  ;;  %5732 = vmatprep.mubr.bf16.mxu1 %v64_v23  ;;  %v8323_v23 = vld [vmem:[%s12015_s1 + $0xa00] ss:$16 sps:$4 sm:$0xff]   ;;  %v8418_v19 = vld [vmem:[%s12015_s1 + $0xbec] ss:$16 sps:$4 sm:$0xff]  }
 0x107   :  { %5170 = vmatpush1.bf16.msra.mxu0 %v8233_v24  ;;  %5703 = vmatpush1.bf16.msra.mxu1 %v8236_v25  ;;  %v8326_v24 = vld [vmem:[%s12015_s1 + $0xa08] ss:$16 sps:$4 sm:$0xff]   ;;  %v8331_v25 = vld [vmem:[%s12015_s1 + $0xa24] ss:$16 sps:$4 sm:$0xff]  }
 0x108   :  { %5171 = vmatprep.subr.bf16.mxu0 %v8241_v26  ;;  %5704 = vmatprep.subr.bf16.mxu1 %v8244_v27  ;;  %v8334_v26 = vld [vmem:[%s12015_s1 + $0xa2c] ss:$16 sps:$4 sm:$0xff]   ;;  %v66_v27 = vpack.c.bf16 %v40_v21, %v40_v21  ;;  %v8416_v21 = vld [vmem:[%s12015_s1 + $0xbe8] ss:$16 sps:$4 sm:$0xff]  }
 0x10b   :  { %5172 = vmatpush1.bf16.msra.mxu0 %v8239_v28  ;;  %5705 = vmatpush1.bf16.msra.mxu1 %v8242_v29  ;;  %v8329_v28 = vld [vmem:[%s12015_s1 + $0xa20] ss:$16 sps:$4 sm:$0xff]   ;;  %v8332_v29 = vld [vmem:[%s12015_s1 + $0xa28] ss:$16 sps:$4 sm:$0xff]  }
 0x10c   :  { %5173 = vmatprep.subr.bf16.mxu0 %v8247_v30  ;;  %5706 = vmatprep.subr.bf16.mxu1 %v8250_v31  ;;  %v8337_v30 = vld [vmem:[%s12015_s1 + $0xa44] ss:$16 sps:$4 sm:$0xff]   ;;  %v8340_v31 = vld [vmem:[%s12015_s1 + $0xa4c] ss:$16 sps:$4 sm:$0xff]  }
 0x10f   :  { %5174 = vmatpush1.bf16.msra.mxu0 %v8245_v32  ;;  %5707 = vmatpush1.bf16.msra.mxu1 %v8248_v33  ;;  %v8335_v32 = vld [vmem:[%s12015_s1 + $0xa40] ss:$16 sps:$4 sm:$0xff]   ;;  %v8338_v33 = vld [vmem:[%s12015_s1 + $0xa48] ss:$16 sps:$4 sm:$0xff]  }
 0x110   :  { %5175 = vmatprep.subr.bf16.mxu0 %v8253_v34  ;;  %5708 = vmatprep.subr.bf16.mxu1 %v8256_v35  ;;  %v8343_v34 = vld [vmem:[%s12015_s1 + $0xa64] ss:$16 sps:$4 sm:$0xff]   ;;  %v8346_v35 = vld [vmem:[%s12015_s1 + $0xa6c] ss:$16 sps:$4 sm:$0xff]  }
 0x113   :  { %5176 = vmatpush1.bf16.msra.mxu0 %v8251_v36  ;;  %5709 = vmatpush1.bf16.msra.mxu1 %v8254_v37  ;;  %v8341_v36 = vld [vmem:[%s12015_s1 + $0xa60] ss:$16 sps:$4 sm:$0xff]   ;;  %v8344_v37 = vld [vmem:[%s12015_s1 + $0xa68] ss:$16 sps:$4 sm:$0xff]  }
 0x114   :  { %5177 = vmatprep.subr.bf16.mxu0 %v8259_v38  ;;  %5710 = vmatprep.subr.bf16.mxu1 %v8262_v39  ;;  %v8349_v38 = vld [vmem:[%s12015_s1 + $0xa84] ss:$16 sps:$4 sm:$0xff]   ;;  %v8352_v39 = vld [vmem:[%s12015_s1 + $0xa8c] ss:$16 sps:$4 sm:$0xff]  }
 0x117   :  { %5178 = vmatpush1.bf16.msra.mxu0 %v8257_v40  ;;  %5711 = vmatpush1.bf16.msra.mxu1 %v8260_v41  ;;  %v8347_v40 = vld [vmem:[%s12015_s1 + $0xa80] ss:$16 sps:$4 sm:$0xff]   ;;  %v8350_v41 = vld [vmem:[%s12015_s1 + $0xa88] ss:$16 sps:$4 sm:$0xff]  }
 0x118   :  { %5179 = vmatprep.subr.bf16.mxu0 %v8265_v42  ;;  %5712 = vmatprep.subr.bf16.mxu1 %v8268_v43  ;;  %v8355_v42 = vld [vmem:[%s12015_s1 + $0xaa4] ss:$16 sps:$4 sm:$0xff]   ;;  %v8358_v43 = vld [vmem:[%s12015_s1 + $0xaac] ss:$16 sps:$4 sm:$0xff]  }
 0x11b   :  { %5180 = vmatpush1.bf16.msra.mxu0 %v8263_v44  ;;  %5713 = vmatpush1.bf16.msra.mxu1 %v8266_v45  ;;  %v8353_v44 = vld [vmem:[%s12015_s1 + $0xaa0] ss:$16 sps:$4 sm:$0xff]   ;;  %v8356_v45 = vld [vmem:[%s12015_s1 + $0xaa8] ss:$16 sps:$4 sm:$0xff]  }
 0x11c   :  { %5181 = vmatprep.subr.bf16.mxu0 %v8271_v46  ;;  %5714 = vmatprep.subr.bf16.mxu1 %v8274_v47  ;;  %v8361_v46 = vld [vmem:[%s12015_s1 + $0xac4] ss:$16 sps:$4 sm:$0xff]   ;;  %v8364_v47 = vld [vmem:[%s12015_s1 + $0xacc] ss:$16 sps:$4 sm:$0xff]  }
 0x11f   :  { %5182 = vmatpush1.bf16.msra.mxu0 %v8269_v48  ;;  %5715 = vmatpush1.bf16.msra.mxu1 %v8272_v49  ;;  %v8359_v48 = vld [vmem:[%s12015_s1 + $0xac0] ss:$16 sps:$4 sm:$0xff]   ;;  %v8362_v49 = vld [vmem:[%s12015_s1 + $0xac8] ss:$16 sps:$4 sm:$0xff]  }
 0x120   :  { %5183 = vmatprep.subr.bf16.mxu0 %v8277_v50  ;;  %5716 = vmatprep.subr.bf16.mxu1 %v8280_v51  ;;  %v8367_v50 = vld [vmem:[%s12015_s1 + $0xae4] ss:$16 sps:$4 sm:$0xff]   ;;  %v8370_v51 = vld [vmem:[%s12015_s1 + $0xaec] ss:$16 sps:$4 sm:$0xff]  }
 0x123   :  { %5184 = vmatpush1.bf16.msra.mxu0 %v8275_v52  ;;  %5717 = vmatpush1.bf16.msra.mxu1 %v8278_v53  ;;  %v8365_v52 = vld [vmem:[%s12015_s1 + $0xae0] ss:$16 sps:$4 sm:$0xff]   ;;  %v8368_v53 = vld [vmem:[%s12015_s1 + $0xae8] ss:$16 sps:$4 sm:$0xff]  }
 0x124   :  { %5185 = vmatprep.subr.bf16.mxu0 %v8283_v54  ;;  %5718 = vmatprep.subr.bf16.mxu1 %v8286_v55  ;;  %v8373_v54 = vld [vmem:[%s12015_s1 + $0xb04] ss:$16 sps:$4 sm:$0xff]   ;;  %v8376_v55 = vld [vmem:[%s12015_s1 + $0xb0c] ss:$16 sps:$4 sm:$0xff]  }
 0x127   :  { %5186 = vmatpush1.bf16.msra.mxu0 %v8281_v56  ;;  %5719 = vmatpush1.bf16.msra.mxu1 %v8284_v57  ;;  %v8371_v56 = vld [vmem:[%s12015_s1 + $0xb00] ss:$16 sps:$4 sm:$0xff]   ;;  %v8374_v57 = vld [vmem:[%s12015_s1 + $0xb08] ss:$16 sps:$4 sm:$0xff]  }
 0x128   :  { %5187 = vmatprep.subr.bf16.mxu0 %v8289_v58  ;;  %5720 = vmatprep.subr.bf16.mxu1 %v8292_v59  ;;  %v8379_v58 = vld [vmem:[%s12015_s1 + $0xb24] ss:$16 sps:$4 sm:$0xff]   ;;  %v8382_v59 = vld [vmem:[%s12015_s1 + $0xb2c] ss:$16 sps:$4 sm:$0xff]  }
 0x12b   :  { %5188 = vmatpush1.bf16.msra.mxu0 %v8287_v60  ;;  %5721 = vmatpush1.bf16.msra.mxu1 %v8290_v61  ;;  %v8377_v60 = vld [vmem:[%s12015_s1 + $0xb20] ss:$16 sps:$4 sm:$0xff]   ;;  %v8380_v61 = vld [vmem:[%s12015_s1 + $0xb28] ss:$16 sps:$4 sm:$0xff]  }
 0x12c   :  { %5189 = vmatprep.subr.bf16.mxu0 %v8295_v62  ;;  %5722 = vmatprep.subr.bf16.mxu1 %v8298_v63  ;;  %v8385_v62 = vld [vmem:[%s12015_s1 + $0xb44] ss:$16 sps:$4 sm:$0xff]   ;;  %v8388_v63 = vld [vmem:[%s12015_s1 + $0xb4c] ss:$16 sps:$4 sm:$0xff]  }
 0x12f   :  { %5190 = vmatpush1.bf16.msra.mxu0 %v8293_v0  ;;  %5723 = vmatpush1.bf16.msra.mxu1 %v8296_v1  ;;  %v8383_v0 = vld [vmem:[%s12015_s1 + $0xb40] ss:$16 sps:$4 sm:$0xff]   ;;  %v8386_v1 = vld [vmem:[%s12015_s1 + $0xb48] ss:$16 sps:$4 sm:$0xff]  }
 0x130   :  { %5191 = vmatprep.subr.bf16.mxu0 %v8301_v2  ;;  %5724 = vmatprep.subr.bf16.mxu1 %v8304_v3  ;;  %v8391_v2 = vld [vmem:[%s12015_s1 + $0xb64] ss:$16 sps:$4 sm:$0xff]   ;;  %v8394_v3 = vld [vmem:[%s12015_s1 + $0xb6c] ss:$16 sps:$4 sm:$0xff]  }
 0x133   :  { %5192 = vmatpush1.bf16.msra.mxu0 %v8299_v4  ;;  %5725 = vmatpush1.bf16.msra.mxu1 %v8302_v5  ;;  %v8389_v4 = vld [vmem:[%s12015_s1 + $0xb60] ss:$16 sps:$4 sm:$0xff]   ;;  %v8392_v5 = vld [vmem:[%s12015_s1 + $0xb68] ss:$16 sps:$4 sm:$0xff]  }
 0x134   :  { %5193 = vmatprep.subr.bf16.mxu0 %v8307_v6  ;;  %5726 = vmatprep.subr.bf16.mxu1 %v8310_v7  ;;  %v8397_v6 = vld [vmem:[%s12015_s1 + $0xb84] ss:$16 sps:$4 sm:$0xff]   ;;  %v8400_v7 = vld [vmem:[%s12015_s1 + $0xb8c] ss:$16 sps:$4 sm:$0xff]  }
 0x137   :  { %5194 = vmatpush1.bf16.msra.mxu0 %v8305_v8  ;;  %5727 = vmatpush1.bf16.msra.mxu1 %v8308_v9  ;;  %v8395_v8 = vld [vmem:[%s12015_s1 + $0xb80] ss:$16 sps:$4 sm:$0xff]   ;;  %v8398_v9 = vld [vmem:[%s12015_s1 + $0xb88] ss:$16 sps:$4 sm:$0xff]  }
 0x138   :  { %5195 = vmatprep.subr.bf16.mxu0 %v8313_v10  ;;  %5728 = vmatprep.subr.bf16.mxu1 %v8316_v11  ;;  %v8403_v10 = vld [vmem:[%s12015_s1 + $0xba4] ss:$16 sps:$4 sm:$0xff]   ;;  %v8406_v11 = vld [vmem:[%s12015_s1 + $0xbac] ss:$16 sps:$4 sm:$0xff]  }
 0x13b   :  { %5196 = vmatpush1.bf16.msra.mxu0 %v8311_v12  ;;  %5729 = vmatpush1.bf16.msra.mxu1 %v8314_v13  ;;  %v8401_v12 = vld [vmem:[%s12015_s1 + $0xba0] ss:$16 sps:$4 sm:$0xff]   ;;  %v8404_v13 = vld [vmem:[%s12015_s1 + $0xba8] ss:$16 sps:$4 sm:$0xff]  }
 0x13c   :  { %5197 = vmatprep.subr.bf16.mxu0 %v8319_v14  ;;  %5730 = vmatprep.subr.bf16.mxu1 %v8322_v15  ;;  %v8409_v14 = vld [vmem:[%s12015_s1 + $0xbc4] ss:$16 sps:$4 sm:$0xff]   ;;  %v8412_v15 = vld [vmem:[%s12015_s1 + $0xbcc] ss:$16 sps:$4 sm:$0xff]  }
 0x13f   :  { %5198 = vmatpush1.bf16.msra.mxu0 %v8317_v16  ;;  %5731 = vmatpush1.bf16.msra.mxu1 %v8320_v17  ;;  %v8407_v16 = vld [vmem:[%s12015_s1 + $0xbc0] ss:$16 sps:$4 sm:$0xff]   ;;  %v8410_v17 = vld [vmem:[%s12015_s1 + $0xbc8] ss:$16 sps:$4 sm:$0xff]  }
 0x140   :  { %5208 = vmatprep.subr.bf16.mxu0 %v8325_v18  ;;  %5741 = vmatprep.subr.bf16.mxu1 %v8328_v20  ;;  %v8415_v18 = vld [vmem:[%s12015_s1 + $0xbe4] ss:$16 sps:$4 sm:$0xff]   ;;  %v8413_v20 = vld [vmem:[%s12015_s1 + $0xbe0] ss:$16 sps:$4 sm:$0xff]  }
 0x142   :  { %5200 = vmatmul.mubr.bf16.vlgmr.msra.gmra.mrb[0].mxu0 %v63_v22  ;;  %5733 = vmatmul.mubr.bf16.vlgmr.msra.gmra.mrb[0].mxu1 %v63_v22  ;;  %v8421_v22 = vld [vmem:[%s12015_s1 + $0xc04] ss:$16 sps:$4 sm:$0xff]  }
 0x143   :  { %5209 = vmatpush1.bf16.msra.mxu0 %v8323_v23  ;;  %5742 = vmatpush1.bf16.msra.mxu1 %v8326_v24  ;;  %v39_v23 = vld [vmem:[%s12016_s0 + $0x50] sm:$0xff]  ;;  %v8424_v24 = vld [vmem:[%s12015_s1 + $0xc0c] ss:$16 sps:$4 sm:$0xff]  }
 0x144   :  { %5210 = vmatprep.subr.bf16.mxu0 %v8331_v25  ;;  %5743 = vmatprep.subr.bf16.mxu1 %v8334_v26  ;;  %v42_v25 = vld [vmem:[%s12016_s0 + $0x68] sm:$0xff]  ;;  %v65_v26 = vpack.c.bf16 %v39_v23, %v39_v23 }
 0x145   :  { %5240 = vmatprep.mubr.bf16.mxu0 %v66_v27  ;;  %5773 = vmatprep.mubr.bf16.mxu1 %v66_v27  ;;  %v8419_v27 = vld [vmem:[%s12015_s1 + $0xc00] ss:$16 sps:$4 sm:$0xff]   ;;  %v8514_v23 = vld [vmem:[%s12015_s1 + $0xdec] ss:$16 sps:$4 sm:$0xff]  }
 0x147   :  { %5211 = vmatpush1.bf16.msra.mxu0 %v8329_v28  ;;  %5744 = vmatpush1.bf16.msra.mxu1 %v8332_v29  ;;  %v8422_v28 = vld [vmem:[%s12015_s1 + $0xc08] ss:$16 sps:$4 sm:$0xff]   ;;  %v8427_v29 = vld [vmem:[%s12015_s1 + $0xc24] ss:$16 sps:$4 sm:$0xff]  }
 0x148   :  { %5212 = vmatprep.subr.bf16.mxu0 %v8337_v30  ;;  %5745 = vmatprep.subr.bf16.mxu1 %v8340_v31  ;;  %v8430_v30 = vld [vmem:[%s12015_s1 + $0xc2c] ss:$16 sps:$4 sm:$0xff]   ;;  %v68_v31 = vpack.c.bf16 %v42_v25, %v42_v25  ;;  %v8512_v25 = vld [vmem:[%s12015_s1 + $0xde8] ss:$16 sps:$4 sm:$0xff]  }
 0x14b   :  { %5213 = vmatpush1.bf16.msra.mxu0 %v8335_v32  ;;  %5746 = vmatpush1.bf16.msra.mxu1 %v8338_v33  ;;  %v8425_v32 = vld [vmem:[%s12015_s1 + $0xc20] ss:$16 sps:$4 sm:$0xff]   ;;  %v8428_v33 = vld [vmem:[%s12015_s1 + $0xc28] ss:$16 sps:$4 sm:$0xff]  }
 0x14c   :  { %5214 = vmatprep.subr.bf16.mxu0 %v8343_v34  ;;  %5747 = vmatprep.subr.bf16.mxu1 %v8346_v35  ;;  %v8433_v34 = vld [vmem:[%s12015_s1 + $0xc44] ss:$16 sps:$4 sm:$0xff]   ;;  %v8436_v35 = vld [vmem:[%s12015_s1 + $0xc4c] ss:$16 sps:$4 sm:$0xff]  }
 0x14f   :  { %5215 = vmatpush1.bf16.msra.mxu0 %v8341_v36  ;;  %5748 = vmatpush1.bf16.msra.mxu1 %v8344_v37  ;;  %v8431_v36 = vld [vmem:[%s12015_s1 + $0xc40] ss:$16 sps:$4 sm:$0xff]   ;;  %v8434_v37 = vld [vmem:[%s12015_s1 + $0xc48] ss:$16 sps:$4 sm:$0xff]  }
 0x150   :  { %5216 = vmatprep.subr.bf16.mxu0 %v8349_v38  ;;  %5749 = vmatprep.subr.bf16.mxu1 %v8352_v39  ;;  %v8439_v38 = vld [vmem:[%s12015_s1 + $0xc64] ss:$16 sps:$4 sm:$0xff]   ;;  %v8442_v39 = vld [vmem:[%s12015_s1 + $0xc6c] ss:$16 sps:$4 sm:$0xff]  }
 0x153   :  { %5217 = vmatpush1.bf16.msra.mxu0 %v8347_v40  ;;  %5750 = vmatpush1.bf16.msra.mxu1 %v8350_v41  ;;  %v8437_v40 = vld [vmem:[%s12015_s1 + $0xc60] ss:$16 sps:$4 sm:$0xff]   ;;  %v8440_v41 = vld [vmem:[%s12015_s1 + $0xc68] ss:$16 sps:$4 sm:$0xff]  }
 0x154   :  { %5218 = vmatprep.subr.bf16.mxu0 %v8355_v42  ;;  %5751 = vmatprep.subr.bf16.mxu1 %v8358_v43  ;;  %v8445_v42 = vld [vmem:[%s12015_s1 + $0xc84] ss:$16 sps:$4 sm:$0xff]   ;;  %v8448_v43 = vld [vmem:[%s12015_s1 + $0xc8c] ss:$16 sps:$4 sm:$0xff]  }
 0x157   :  { %5219 = vmatpush1.bf16.msra.mxu0 %v8353_v44  ;;  %5752 = vmatpush1.bf16.msra.mxu1 %v8356_v45  ;;  %v8443_v44 = vld [vmem:[%s12015_s1 + $0xc80] ss:$16 sps:$4 sm:$0xff]   ;;  %v8446_v45 = vld [vmem:[%s12015_s1 + $0xc88] ss:$16 sps:$4 sm:$0xff]  }
 0x158   :  { %5220 = vmatprep.subr.bf16.mxu0 %v8361_v46  ;;  %5753 = vmatprep.subr.bf16.mxu1 %v8364_v47  ;;  %v8451_v46 = vld [vmem:[%s12015_s1 + $0xca4] ss:$16 sps:$4 sm:$0xff]   ;;  %v8454_v47 = vld [vmem:[%s12015_s1 + $0xcac] ss:$16 sps:$4 sm:$0xff]  }
 0x15b   :  { %5221 = vmatpush1.bf16.msra.mxu0 %v8359_v48  ;;  %5754 = vmatpush1.bf16.msra.mxu1 %v8362_v49  ;;  %v8449_v48 = vld [vmem:[%s12015_s1 + $0xca0] ss:$16 sps:$4 sm:$0xff]   ;;  %v8452_v49 = vld [vmem:[%s12015_s1 + $0xca8] ss:$16 sps:$4 sm:$0xff]  }
 0x15c   :  { %5222 = vmatprep.subr.bf16.mxu0 %v8367_v50  ;;  %5755 = vmatprep.subr.bf16.mxu1 %v8370_v51  ;;  %v8457_v50 = vld [vmem:[%s12015_s1 + $0xcc4] ss:$16 sps:$4 sm:$0xff]   ;;  %v8460_v51 = vld [vmem:[%s12015_s1 + $0xccc] ss:$16 sps:$4 sm:$0xff]  }
 0x15f   :  { %5223 = vmatpush1.bf16.msra.mxu0 %v8365_v52  ;;  %5756 = vmatpush1.bf16.msra.mxu1 %v8368_v53  ;;  %v8455_v52 = vld [vmem:[%s12015_s1 + $0xcc0] ss:$16 sps:$4 sm:$0xff]   ;;  %v8458_v53 = vld [vmem:[%s12015_s1 + $0xcc8] ss:$16 sps:$4 sm:$0xff]  }
 0x160   :  { %5224 = vmatprep.subr.bf16.mxu0 %v8373_v54  ;;  %5757 = vmatprep.subr.bf16.mxu1 %v8376_v55  ;;  %v8463_v54 = vld [vmem:[%s12015_s1 + $0xce4] ss:$16 sps:$4 sm:$0xff]   ;;  %v8466_v55 = vld [vmem:[%s12015_s1 + $0xcec] ss:$16 sps:$4 sm:$0xff]  }
 0x163   :  { %5225 = vmatpush1.bf16.msra.mxu0 %v8371_v56  ;;  %5758 = vmatpush1.bf16.msra.mxu1 %v8374_v57  ;;  %v8461_v56 = vld [vmem:[%s12015_s1 + $0xce0] ss:$16 sps:$4 sm:$0xff]   ;;  %v8464_v57 = vld [vmem:[%s12015_s1 + $0xce8] ss:$16 sps:$4 sm:$0xff]  }
 0x164   :  { %5226 = vmatprep.subr.bf16.mxu0 %v8379_v58  ;;  %5759 = vmatprep.subr.bf16.mxu1 %v8382_v59  ;;  %v8469_v58 = vld [vmem:[%s12015_s1 + $0xd04] ss:$16 sps:$4 sm:$0xff]   ;;  %v8472_v59 = vld [vmem:[%s12015_s1 + $0xd0c] ss:$16 sps:$4 sm:$0xff]  }
 0x167   :  { %5227 = vmatpush1.bf16.msra.mxu0 %v8377_v60  ;;  %5760 = vmatpush1.bf16.msra.mxu1 %v8380_v61  ;;  %v8467_v60 = vld [vmem:[%s12015_s1 + $0xd00] ss:$16 sps:$4 sm:$0xff]   ;;  %v8470_v61 = vld [vmem:[%s12015_s1 + $0xd08] ss:$16 sps:$4 sm:$0xff]  }
 0x168   :  { %5228 = vmatprep.subr.bf16.mxu0 %v8385_v62  ;;  %5761 = vmatprep.subr.bf16.mxu1 %v8388_v63  ;;  %v8475_v62 = vld [vmem:[%s12015_s1 + $0xd24] ss:$16 sps:$4 sm:$0xff]   ;;  %v8478_v63 = vld [vmem:[%s12015_s1 + $0xd2c] ss:$16 sps:$4 sm:$0xff]  }
 0x16b   :  { %5229 = vmatpush1.bf16.msra.mxu0 %v8383_v0  ;;  %5762 = vmatpush1.bf16.msra.mxu1 %v8386_v1  ;;  %v8473_v0 = vld [vmem:[%s12015_s1 + $0xd20] ss:$16 sps:$4 sm:$0xff]   ;;  %v8476_v1 = vld [vmem:[%s12015_s1 + $0xd28] ss:$16 sps:$4 sm:$0xff]  }
 0x16c   :  { %5230 = vmatprep.subr.bf16.mxu0 %v8391_v2  ;;  %5763 = vmatprep.subr.bf16.mxu1 %v8394_v3  ;;  %v8481_v2 = vld [vmem:[%s12015_s1 + $0xd44] ss:$16 sps:$4 sm:$0xff]   ;;  %v8484_v3 = vld [vmem:[%s12015_s1 + $0xd4c] ss:$16 sps:$4 sm:$0xff]  }
 0x16f   :  { %5231 = vmatpush1.bf16.msra.mxu0 %v8389_v4  ;;  %5764 = vmatpush1.bf16.msra.mxu1 %v8392_v5  ;;  %v8479_v4 = vld [vmem:[%s12015_s1 + $0xd40] ss:$16 sps:$4 sm:$0xff]   ;;  %v8482_v5 = vld [vmem:[%s12015_s1 + $0xd48] ss:$16 sps:$4 sm:$0xff]  }
 0x170   :  { %5232 = vmatprep.subr.bf16.mxu0 %v8397_v6  ;;  %5765 = vmatprep.subr.bf16.mxu1 %v8400_v7  ;;  %v8487_v6 = vld [vmem:[%s12015_s1 + $0xd64] ss:$16 sps:$4 sm:$0xff]   ;;  %v8490_v7 = vld [vmem:[%s12015_s1 + $0xd6c] ss:$16 sps:$4 sm:$0xff]  }
 0x173   :  { %5233 = vmatpush1.bf16.msra.mxu0 %v8395_v8  ;;  %5766 = vmatpush1.bf16.msra.mxu1 %v8398_v9  ;;  %v8485_v8 = vld [vmem:[%s12015_s1 + $0xd60] ss:$16 sps:$4 sm:$0xff]   ;;  %v8488_v9 = vld [vmem:[%s12015_s1 + $0xd68] ss:$16 sps:$4 sm:$0xff]  }
 0x174   :  { %5234 = vmatprep.subr.bf16.mxu0 %v8403_v10  ;;  %5767 = vmatprep.subr.bf16.mxu1 %v8406_v11  ;;  %v8493_v10 = vld [vmem:[%s12015_s1 + $0xd84] ss:$16 sps:$4 sm:$0xff]   ;;  %v8496_v11 = vld [vmem:[%s12015_s1 + $0xd8c] ss:$16 sps:$4 sm:$0xff]  }
 0x177   :  { %5235 = vmatpush1.bf16.msra.mxu0 %v8401_v12  ;;  %5768 = vmatpush1.bf16.msra.mxu1 %v8404_v13  ;;  %v8491_v12 = vld [vmem:[%s12015_s1 + $0xd80] ss:$16 sps:$4 sm:$0xff]   ;;  %v8494_v13 = vld [vmem:[%s12015_s1 + $0xd88] ss:$16 sps:$4 sm:$0xff]  }
 0x178   :  { %5236 = vmatprep.subr.bf16.mxu0 %v8409_v14  ;;  %5769 = vmatprep.subr.bf16.mxu1 %v8412_v15  ;;  %v8499_v14 = vld [vmem:[%s12015_s1 + $0xda4] ss:$16 sps:$4 sm:$0xff]   ;;  %v8502_v15 = vld [vmem:[%s12015_s1 + $0xdac] ss:$16 sps:$4 sm:$0xff]  }
 0x17b   :  { %5237 = vmatpush1.bf16.msra.mxu0 %v8407_v16  ;;  %5770 = vmatpush1.bf16.msra.mxu1 %v8410_v17  ;;  %v8497_v16 = vld [vmem:[%s12015_s1 + $0xda0] ss:$16 sps:$4 sm:$0xff]   ;;  %v8500_v17 = vld [vmem:[%s12015_s1 + $0xda8] ss:$16 sps:$4 sm:$0xff]  }
 0x17c   :  { %5238 = vmatprep.subr.bf16.mxu0 %v8415_v18  ;;  %5771 = vmatprep.subr.bf16.mxu1 %v8418_v19  ;;  %v8505_v18 = vld [vmem:[%s12015_s1 + $0xdc4] ss:$16 sps:$4 sm:$0xff]   ;;  %v8508_v19 = vld [vmem:[%s12015_s1 + $0xdcc] ss:$16 sps:$4 sm:$0xff]  }
 0x17f   :  { %5239 = vmatpush1.bf16.msra.mxu0 %v8413_v20  ;;  %5772 = vmatpush1.bf16.msra.mxu1 %v8416_v21  ;;  %v8503_v20 = vld [vmem:[%s12015_s1 + $0xdc0] ss:$16 sps:$4 sm:$0xff]   ;;  %v8506_v21 = vld [vmem:[%s12015_s1 + $0xdc8] ss:$16 sps:$4 sm:$0xff]  }
 0x180   :  { %5249 = vmatprep.subr.bf16.mxu0 %v8421_v22  ;;  %5782 = vmatprep.subr.bf16.mxu1 %v8424_v24  ;;  %v8511_v22 = vld [vmem:[%s12015_s1 + $0xde4] ss:$16 sps:$4 sm:$0xff]   ;;  %v8509_v24 = vld [vmem:[%s12015_s1 + $0xde0] ss:$16 sps:$4 sm:$0xff]  }
 0x182   :  { %5241 = vmatmul.mubr.bf16.vlgmr.msra.gmra.mrb[0].mxu0 %v65_v26  ;;  %5774 = vmatmul.mubr.bf16.vlgmr.msra.gmra.mrb[0].mxu1 %v65_v26  ;;  %v8517_v26 = vld [vmem:[%s12015_s1 + $0xe04] ss:$16 sps:$4 sm:$0xff]  }
 0x183   :  { %5250 = vmatpush1.bf16.msra.mxu0 %v8419_v27  ;;  %5783 = vmatpush1.bf16.msra.mxu1 %v8422_v28  ;;  %v41_v27 = vld [vmem:[%s12016_s0 + $0x60] sm:$0xff]  ;;  %v8520_v28 = vld [vmem:[%s12015_s1 + $0xe0c] ss:$16 sps:$4 sm:$0xff]  }
 0x184   :  { %5251 = vmatprep.subr.bf16.mxu0 %v8427_v29  ;;  %5784 = vmatprep.subr.bf16.mxu1 %v8430_v30  ;;  %v44_v29 = vld [vmem:[%s12016_s0 + $0x78] sm:$0xff]  ;;  %v67_v30 = vpack.c.bf16 %v41_v27, %v41_v27 }
 0x185   :  { %5281 = vmatprep.mubr.bf16.mxu0 %v68_v31  ;;  %5814 = vmatprep.mubr.bf16.mxu1 %v68_v31  ;;  %v8515_v31 = vld [vmem:[%s12015_s1 + $0xe00] ss:$16 sps:$4 sm:$0xff]   ;;  %v8610_v27 = vld [vmem:[%s12015_s1 + $0xfec] ss:$16 sps:$4 sm:$0xff]  }
 0x187   :  { %5252 = vmatpush1.bf16.msra.mxu0 %v8425_v32  ;;  %5785 = vmatpush1.bf16.msra.mxu1 %v8428_v33  ;;  %v8518_v32 = vld [vmem:[%s12015_s1 + $0xe08] ss:$16 sps:$4 sm:$0xff]   ;;  %v8523_v33 = vld [vmem:[%s12015_s1 + $0xe24] ss:$16 sps:$4 sm:$0xff]  }
 0x188   :  { %5253 = vmatprep.subr.bf16.mxu0 %v8433_v34  ;;  %5786 = vmatprep.subr.bf16.mxu1 %v8436_v35  ;;  %v8526_v34 = vld [vmem:[%s12015_s1 + $0xe2c] ss:$16 sps:$4 sm:$0xff]   ;;  %v70_v35 = vpack.c.bf16 %v44_v29, %v44_v29  ;;  %v8608_v29 = vld [vmem:[%s12015_s1 + $0xfe8] ss:$16 sps:$4 sm:$0xff]  }
 0x18b   :  { %5254 = vmatpush1.bf16.msra.mxu0 %v8431_v36  ;;  %5787 = vmatpush1.bf16.msra.mxu1 %v8434_v37  ;;  %v8521_v36 = vld [vmem:[%s12015_s1 + $0xe20] ss:$16 sps:$4 sm:$0xff]   ;;  %v8524_v37 = vld [vmem:[%s12015_s1 + $0xe28] ss:$16 sps:$4 sm:$0xff]  }
 0x18c   :  { %5255 = vmatprep.subr.bf16.mxu0 %v8439_v38  ;;  %5788 = vmatprep.subr.bf16.mxu1 %v8442_v39  ;;  %v8529_v38 = vld [vmem:[%s12015_s1 + $0xe44] ss:$16 sps:$4 sm:$0xff]   ;;  %v8532_v39 = vld [vmem:[%s12015_s1 + $0xe4c] ss:$16 sps:$4 sm:$0xff]  }
 0x18f   :  { %5256 = vmatpush1.bf16.msra.mxu0 %v8437_v40  ;;  %5789 = vmatpush1.bf16.msra.mxu1 %v8440_v41  ;;  %v8527_v40 = vld [vmem:[%s12015_s1 + $0xe40] ss:$16 sps:$4 sm:$0xff]   ;;  %v8530_v41 = vld [vmem:[%s12015_s1 + $0xe48] ss:$16 sps:$4 sm:$0xff]  }
 0x190   :  { %5257 = vmatprep.subr.bf16.mxu0 %v8445_v42  ;;  %5790 = vmatprep.subr.bf16.mxu1 %v8448_v43  ;;  %v8535_v42 = vld [vmem:[%s12015_s1 + $0xe64] ss:$16 sps:$4 sm:$0xff]   ;;  %v8538_v43 = vld [vmem:[%s12015_s1 + $0xe6c] ss:$16 sps:$4 sm:$0xff]  }
 0x193   :  { %5258 = vmatpush1.bf16.msra.mxu0 %v8443_v44  ;;  %5791 = vmatpush1.bf16.msra.mxu1 %v8446_v45  ;;  %v8533_v44 = vld [vmem:[%s12015_s1 + $0xe60] ss:$16 sps:$4 sm:$0xff]   ;;  %v8536_v45 = vld [vmem:[%s12015_s1 + $0xe68] ss:$16 sps:$4 sm:$0xff]  }
 0x194   :  { %5259 = vmatprep.subr.bf16.mxu0 %v8451_v46  ;;  %5792 = vmatprep.subr.bf16.mxu1 %v8454_v47  ;;  %v8541_v46 = vld [vmem:[%s12015_s1 + $0xe84] ss:$16 sps:$4 sm:$0xff]   ;;  %v8544_v47 = vld [vmem:[%s12015_s1 + $0xe8c] ss:$16 sps:$4 sm:$0xff]  }
 0x197   :  { %5260 = vmatpush1.bf16.msra.mxu0 %v8449_v48  ;;  %5793 = vmatpush1.bf16.msra.mxu1 %v8452_v49  ;;  %v8539_v48 = vld [vmem:[%s12015_s1 + $0xe80] ss:$16 sps:$4 sm:$0xff]   ;;  %v8542_v49 = vld [vmem:[%s12015_s1 + $0xe88] ss:$16 sps:$4 sm:$0xff]  }
 0x198   :  { %5261 = vmatprep.subr.bf16.mxu0 %v8457_v50  ;;  %5794 = vmatprep.subr.bf16.mxu1 %v8460_v51  ;;  %v8547_v50 = vld [vmem:[%s12015_s1 + $0xea4] ss:$16 sps:$4 sm:$0xff]   ;;  %v8550_v51 = vld [vmem:[%s12015_s1 + $0xeac] ss:$16 sps:$4 sm:$0xff]  }
 0x19b   :  { %5262 = vmatpush1.bf16.msra.mxu0 %v8455_v52  ;;  %5795 = vmatpush1.bf16.msra.mxu1 %v8458_v53  ;;  %v8545_v52 = vld [vmem:[%s12015_s1 + $0xea0] ss:$16 sps:$4 sm:$0xff]   ;;  %v8548_v53 = vld [vmem:[%s12015_s1 + $0xea8] ss:$16 sps:$4 sm:$0xff]  }
 0x19c   :  { %5263 = vmatprep.subr.bf16.mxu0 %v8463_v54  ;;  %5796 = vmatprep.subr.bf16.mxu1 %v8466_v55  ;;  %v8553_v54 = vld [vmem:[%s12015_s1 + $0xec4] ss:$16 sps:$4 sm:$0xff]   ;;  %v8556_v55 = vld [vmem:[%s12015_s1 + $0xecc] ss:$16 sps:$4 sm:$0xff]  }
 0x19f   :  { %5264 = vmatpush1.bf16.msra.mxu0 %v8461_v56  ;;  %5797 = vmatpush1.bf16.msra.mxu1 %v8464_v57  ;;  %v8551_v56 = vld [vmem:[%s12015_s1 + $0xec0] ss:$16 sps:$4 sm:$0xff]   ;;  %v8554_v57 = vld [vmem:[%s12015_s1 + $0xec8] ss:$16 sps:$4 sm:$0xff]  }
 0x1a0   :  { %5265 = vmatprep.subr.bf16.mxu0 %v8469_v58  ;;  %5798 = vmatprep.subr.bf16.mxu1 %v8472_v59  ;;  %v8559_v58 = vld [vmem:[%s12015_s1 + $0xee4] ss:$16 sps:$4 sm:$0xff]   ;;  %v8562_v59 = vld [vmem:[%s12015_s1 + $0xeec] ss:$16 sps:$4 sm:$0xff]  }
 0x1a3   :  { %5266 = vmatpush1.bf16.msra.mxu0 %v8467_v60  ;;  %5799 = vmatpush1.bf16.msra.mxu1 %v8470_v61  ;;  %v8557_v60 = vld [vmem:[%s12015_s1 + $0xee0] ss:$16 sps:$4 sm:$0xff]   ;;  %v8560_v61 = vld [vmem:[%s12015_s1 + $0xee8] ss:$16 sps:$4 sm:$0xff]  }
 0x1a4   :  { %5267 = vmatprep.subr.bf16.mxu0 %v8475_v62  ;;  %5800 = vmatprep.subr.bf16.mxu1 %v8478_v63  ;;  %v8565_v62 = vld [vmem:[%s12015_s1 + $0xf04] ss:$16 sps:$4 sm:$0xff]   ;;  %v8568_v63 = vld [vmem:[%s12015_s1 + $0xf0c] ss:$16 sps:$4 sm:$0xff]  }
 0x1a7   :  { %5268 = vmatpush1.bf16.msra.mxu0 %v8473_v0  ;;  %5801 = vmatpush1.bf16.msra.mxu1 %v8476_v1  ;;  %v8563_v0 = vld [vmem:[%s12015_s1 + $0xf00] ss:$16 sps:$4 sm:$0xff]   ;;  %v8566_v1 = vld [vmem:[%s12015_s1 + $0xf08] ss:$16 sps:$4 sm:$0xff]  }
 0x1a8   :  { %5269 = vmatprep.subr.bf16.mxu0 %v8481_v2  ;;  %5802 = vmatprep.subr.bf16.mxu1 %v8484_v3  ;;  %v8571_v2 = vld [vmem:[%s12015_s1 + $0xf24] ss:$16 sps:$4 sm:$0xff]   ;;  %v8574_v3 = vld [vmem:[%s12015_s1 + $0xf2c] ss:$16 sps:$4 sm:$0xff]  }
 0x1ab   :  { %5270 = vmatpush1.bf16.msra.mxu0 %v8479_v4  ;;  %5803 = vmatpush1.bf16.msra.mxu1 %v8482_v5  ;;  %v8569_v4 = vld [vmem:[%s12015_s1 + $0xf20] ss:$16 sps:$4 sm:$0xff]   ;;  %v8572_v5 = vld [vmem:[%s12015_s1 + $0xf28] ss:$16 sps:$4 sm:$0xff]  }
 0x1ac   :  { %5271 = vmatprep.subr.bf16.mxu0 %v8487_v6  ;;  %5804 = vmatprep.subr.bf16.mxu1 %v8490_v7  ;;  %v8577_v6 = vld [vmem:[%s12015_s1 + $0xf44] ss:$16 sps:$4 sm:$0xff]   ;;  %v8580_v7 = vld [vmem:[%s12015_s1 + $0xf4c] ss:$16 sps:$4 sm:$0xff]  }
 0x1af   :  { %5272 = vmatpush1.bf16.msra.mxu0 %v8485_v8  ;;  %5805 = vmatpush1.bf16.msra.mxu1 %v8488_v9  ;;  %v8575_v8 = vld [vmem:[%s12015_s1 + $0xf40] ss:$16 sps:$4 sm:$0xff]   ;;  %v8578_v9 = vld [vmem:[%s12015_s1 + $0xf48] ss:$16 sps:$4 sm:$0xff]  }
 0x1b0   :  { %5273 = vmatprep.subr.bf16.mxu0 %v8493_v10  ;;  %5806 = vmatprep.subr.bf16.mxu1 %v8496_v11  ;;  %v8583_v10 = vld [vmem:[%s12015_s1 + $0xf64] ss:$16 sps:$4 sm:$0xff]   ;;  %v8586_v11 = vld [vmem:[%s12015_s1 + $0xf6c] ss:$16 sps:$4 sm:$0xff]  }
 0x1b3   :  { %5274 = vmatpush1.bf16.msra.mxu0 %v8491_v12  ;;  %5807 = vmatpush1.bf16.msra.mxu1 %v8494_v13  ;;  %v8581_v12 = vld [vmem:[%s12015_s1 + $0xf60] ss:$16 sps:$4 sm:$0xff]   ;;  %v8584_v13 = vld [vmem:[%s12015_s1 + $0xf68] ss:$16 sps:$4 sm:$0xff]  }
 0x1b4   :  { %5275 = vmatprep.subr.bf16.mxu0 %v8499_v14  ;;  %5808 = vmatprep.subr.bf16.mxu1 %v8502_v15  ;;  %v8589_v14 = vld [vmem:[%s12015_s1 + $0xf84] ss:$16 sps:$4 sm:$0xff]   ;;  %v8592_v15 = vld [vmem:[%s12015_s1 + $0xf8c] ss:$16 sps:$4 sm:$0xff]  }
 0x1b7   :  { %5276 = vmatpush1.bf16.msra.mxu0 %v8497_v16  ;;  %5809 = vmatpush1.bf16.msra.mxu1 %v8500_v17  ;;  %v8587_v16 = vld [vmem:[%s12015_s1 + $0xf80] ss:$16 sps:$4 sm:$0xff]   ;;  %v8590_v17 = vld [vmem:[%s12015_s1 + $0xf88] ss:$16 sps:$4 sm:$0xff]  }
 0x1b8   :  { %5277 = vmatprep.subr.bf16.mxu0 %v8505_v18  ;;  %5810 = vmatprep.subr.bf16.mxu1 %v8508_v19  ;;  %v8595_v18 = vld [vmem:[%s12015_s1 + $0xfa4] ss:$16 sps:$4 sm:$0xff]   ;;  %v8598_v19 = vld [vmem:[%s12015_s1 + $0xfac] ss:$16 sps:$4 sm:$0xff]  }
 0x1bb   :  { %5278 = vmatpush1.bf16.msra.mxu0 %v8503_v20  ;;  %5811 = vmatpush1.bf16.msra.mxu1 %v8506_v21  ;;  %v8593_v20 = vld [vmem:[%s12015_s1 + $0xfa0] ss:$16 sps:$4 sm:$0xff]   ;;  %v8596_v21 = vld [vmem:[%s12015_s1 + $0xfa8] ss:$16 sps:$4 sm:$0xff]  }
 0x1bc   :  { %5279 = vmatprep.subr.bf16.mxu0 %v8511_v22  ;;  %5812 = vmatprep.subr.bf16.mxu1 %v8514_v23  ;;  %v8601_v22 = vld [vmem:[%s12015_s1 + $0xfc4] ss:$16 sps:$4 sm:$0xff]   ;;  %v8604_v23 = vld [vmem:[%s12015_s1 + $0xfcc] ss:$16 sps:$4 sm:$0xff]  }
 0x1bf   :  { %5280 = vmatpush1.bf16.msra.mxu0 %v8509_v24  ;;  %5813 = vmatpush1.bf16.msra.mxu1 %v8512_v25  ;;  %v8599_v24 = vld [vmem:[%s12015_s1 + $0xfc0] ss:$16 sps:$4 sm:$0xff]   ;;  %v8602_v25 = vld [vmem:[%s12015_s1 + $0xfc8] ss:$16 sps:$4 sm:$0xff]  }
 0x1c0   :  { %5290 = vmatprep.subr.bf16.mxu0 %v8517_v26  ;;  %5823 = vmatprep.subr.bf16.mxu1 %v8520_v28  ;;  %v8607_v26 = vld [vmem:[%s12015_s1 + $0xfe4] ss:$16 sps:$4 sm:$0xff]   ;;  %v8605_v28 = vld [vmem:[%s12015_s1 + $0xfe0] ss:$16 sps:$4 sm:$0xff]  }
 0x1c2   :  { %5282 = vmatmul.mubr.bf16.vlgmr.msra.gmra.mrb[0].mxu0 %v67_v30  ;;  %5815 = vmatmul.mubr.bf16.vlgmr.msra.gmra.mrb[0].mxu1 %v67_v30  ;;  %v43_v30 = vld [vmem:[%s12016_s0 + $0x70] sm:$0xff] }
 0x1c3   :  { %5291 = vmatpush1.bf16.msra.mxu0 %v8515_v31  ;;  %5824 = vmatpush1.bf16.msra.mxu1 %v8518_v32  ;;  %v8613_v31 = vld [vmem:[%s12015_s1 + $0x1004] ss:$16 sps:$4 sm:$0xff]   ;;  %v8616_v32 = vld [vmem:[%s12015_s1 + $0x100c] ss:$16 sps:$4 sm:$0xff]  }
 0x1c4   :  { %5292 = vmatprep.subr.bf16.mxu0 %v8523_v33  ;;  %5825 = vmatprep.subr.bf16.mxu1 %v8526_v34  ;;  %v69_v33 = vpack.c.bf16 %v43_v30, %v43_v30  ;;  %v46_v34 = vld [vmem:[%s12016_s0 + $0x88] sm:$0xff]  ;;  %v8703_v30 = vld [vmem:[%s12015_s1 + $0x11e4] ss:$16 sps:$4 sm:$0xff]  }
 0x1c5   :  { %5322 = vmatprep.mubr.bf16.mxu0 %v70_v35  ;;  %5855 = vmatprep.mubr.bf16.mxu1 %v70_v35  ;;  %v8611_v35 = vld [vmem:[%s12015_s1 + $0x1000] ss:$16 sps:$4 sm:$0xff]  }
 0x1c7   :  { %5293 = vmatpush1.bf16.msra.mxu0 %v8521_v36  ;;  %5826 = vmatpush1.bf16.msra.mxu1 %v8524_v37  ;;  %v8614_v36 = vld [vmem:[%s12015_s1 + $0x1008] ss:$16 sps:$4 sm:$0xff]   ;;  %v8619_v37 = vld [vmem:[%s12015_s1 + $0x1024] ss:$16 sps:$4 sm:$0xff]  }
 0x1c8   :  { %5294 = vmatprep.subr.bf16.mxu0 %v8529_v38  ;;  %5827 = vmatprep.subr.bf16.mxu1 %v8532_v39  ;;  %v8622_v38 = vld [vmem:[%s12015_s1 + $0x102c] ss:$16 sps:$4 sm:$0xff]   ;;  %v72_v39 = vpack.c.bf16 %v46_v34, %v46_v34  ;;  %v45_v34 = vld [vmem:[%s12016_s0 + $0x80] sm:$0xff] }
 0x1cb   :  { %5295 = vmatpush1.bf16.msra.mxu0 %v8527_v40  ;;  %5828 = vmatpush1.bf16.msra.mxu1 %v8530_v41  ;;  %v8617_v40 = vld [vmem:[%s12015_s1 + $0x1020] ss:$16 sps:$4 sm:$0xff]   ;;  %v8620_v41 = vld [vmem:[%s12015_s1 + $0x1028] ss:$16 sps:$4 sm:$0xff]  }
 0x1cc   :  { %5296 = vmatprep.subr.bf16.mxu0 %v8535_v42  ;;  %5829 = vmatprep.subr.bf16.mxu1 %v8538_v43  ;;  %v8625_v42 = vld [vmem:[%s12015_s1 + $0x1044] ss:$16 sps:$4 sm:$0xff]   ;;  %v8628_v43 = vld [vmem:[%s12015_s1 + $0x104c] ss:$16 sps:$4 sm:$0xff]  }
 0x1cf   :  { %5297 = vmatpush1.bf16.msra.mxu0 %v8533_v44  ;;  %5830 = vmatpush1.bf16.msra.mxu1 %v8536_v45  ;;  %v8623_v44 = vld [vmem:[%s12015_s1 + $0x1040] ss:$16 sps:$4 sm:$0xff]   ;;  %v8626_v45 = vld [vmem:[%s12015_s1 + $0x1048] ss:$16 sps:$4 sm:$0xff]  }
 0x1d0   :  { %5298 = vmatprep.subr.bf16.mxu0 %v8541_v46  ;;  %5831 = vmatprep.subr.bf16.mxu1 %v8544_v47  ;;  %v8631_v46 = vld [vmem:[%s12015_s1 + $0x1064] ss:$16 sps:$4 sm:$0xff]   ;;  %v8634_v47 = vld [vmem:[%s12015_s1 + $0x106c] ss:$16 sps:$4 sm:$0xff]  }
 0x1d3   :  { %5299 = vmatpush1.bf16.msra.mxu0 %v8539_v48  ;;  %5832 = vmatpush1.bf16.msra.mxu1 %v8542_v49  ;;  %v8629_v48 = vld [vmem:[%s12015_s1 + $0x1060] ss:$16 sps:$4 sm:$0xff]   ;;  %v8632_v49 = vld [vmem:[%s12015_s1 + $0x1068] ss:$16 sps:$4 sm:$0xff]  }
 0x1d4   :  { %5300 = vmatprep.subr.bf16.mxu0 %v8547_v50  ;;  %5833 = vmatprep.subr.bf16.mxu1 %v8550_v51  ;;  %v8637_v50 = vld [vmem:[%s12015_s1 + $0x1084] ss:$16 sps:$4 sm:$0xff]   ;;  %v8640_v51 = vld [vmem:[%s12015_s1 + $0x108c] ss:$16 sps:$4 sm:$0xff]  }
 0x1d7   :  { %5301 = vmatpush1.bf16.msra.mxu0 %v8545_v52  ;;  %5834 = vmatpush1.bf16.msra.mxu1 %v8548_v53  ;;  %v8635_v52 = vld [vmem:[%s12015_s1 + $0x1080] ss:$16 sps:$4 sm:$0xff]   ;;  %v8638_v53 = vld [vmem:[%s12015_s1 + $0x1088] ss:$16 sps:$4 sm:$0xff]  }
 0x1d8   :  { %5302 = vmatprep.subr.bf16.mxu0 %v8553_v54  ;;  %5835 = vmatprep.subr.bf16.mxu1 %v8556_v55  ;;  %v8643_v54 = vld [vmem:[%s12015_s1 + $0x10a4] ss:$16 sps:$4 sm:$0xff]   ;;  %v8646_v55 = vld [vmem:[%s12015_s1 + $0x10ac] ss:$16 sps:$4 sm:$0xff]  }
 0x1db   :  { %5303 = vmatpush1.bf16.msra.mxu0 %v8551_v56  ;;  %5836 = vmatpush1.bf16.msra.mxu1 %v8554_v57  ;;  %v8641_v56 = vld [vmem:[%s12015_s1 + $0x10a0] ss:$16 sps:$4 sm:$0xff]   ;;  %v8644_v57 = vld [vmem:[%s12015_s1 + $0x10a8] ss:$16 sps:$4 sm:$0xff]  }
 0x1dc   :  { %5304 = vmatprep.subr.bf16.mxu0 %v8559_v58  ;;  %5837 = vmatprep.subr.bf16.mxu1 %v8562_v59  ;;  %v8649_v58 = vld [vmem:[%s12015_s1 + $0x10c4] ss:$16 sps:$4 sm:$0xff]   ;;  %v8652_v59 = vld [vmem:[%s12015_s1 + $0x10cc] ss:$16 sps:$4 sm:$0xff]  }
 0x1df   :  { %5305 = vmatpush1.bf16.msra.mxu0 %v8557_v60  ;;  %5838 = vmatpush1.bf16.msra.mxu1 %v8560_v61  ;;  %v8647_v60 = vld [vmem:[%s12015_s1 + $0x10c0] ss:$16 sps:$4 sm:$0xff]   ;;  %v8650_v61 = vld [vmem:[%s12015_s1 + $0x10c8] ss:$16 sps:$4 sm:$0xff]  }
 0x1e0   :  { %5306 = vmatprep.subr.bf16.mxu0 %v8565_v62  ;;  %5839 = vmatprep.subr.bf16.mxu1 %v8568_v63  ;;  %v8655_v62 = vld [vmem:[%s12015_s1 + $0x10e4] ss:$16 sps:$4 sm:$0xff]   ;;  %v8658_v63 = vld [vmem:[%s12015_s1 + $0x10ec] ss:$16 sps:$4 sm:$0xff]  }
 0x1e3   :  { %5307 = vmatpush1.bf16.msra.mxu0 %v8563_v0  ;;  %5840 = vmatpush1.bf16.msra.mxu1 %v8566_v1  ;;  %v8653_v0 = vld [vmem:[%s12015_s1 + $0x10e0] ss:$16 sps:$4 sm:$0xff]   ;;  %v8656_v1 = vld [vmem:[%s12015_s1 + $0x10e8] ss:$16 sps:$4 sm:$0xff]  }
 0x1e4   :  { %5308 = vmatprep.subr.bf16.mxu0 %v8571_v2  ;;  %5841 = vmatprep.subr.bf16.mxu1 %v8574_v3  ;;  %v8661_v2 = vld [vmem:[%s12015_s1 + $0x1104] ss:$16 sps:$4 sm:$0xff]   ;;  %v8664_v3 = vld [vmem:[%s12015_s1 + $0x110c] ss:$16 sps:$4 sm:$0xff]  }
 0x1e7   :  { %5309 = vmatpush1.bf16.msra.mxu0 %v8569_v4  ;;  %5842 = vmatpush1.bf16.msra.mxu1 %v8572_v5  ;;  %v8659_v4 = vld [vmem:[%s12015_s1 + $0x1100] ss:$16 sps:$4 sm:$0xff]   ;;  %v8662_v5 = vld [vmem:[%s12015_s1 + $0x1108] ss:$16 sps:$4 sm:$0xff]  }
 0x1e8   :  { %5310 = vmatprep.subr.bf16.mxu0 %v8577_v6  ;;  %5843 = vmatprep.subr.bf16.mxu1 %v8580_v7  ;;  %v8667_v6 = vld [vmem:[%s12015_s1 + $0x1124] ss:$16 sps:$4 sm:$0xff]   ;;  %v8670_v7 = vld [vmem:[%s12015_s1 + $0x112c] ss:$16 sps:$4 sm:$0xff]  }
 0x1eb   :  { %5311 = vmatpush1.bf16.msra.mxu0 %v8575_v8  ;;  %5844 = vmatpush1.bf16.msra.mxu1 %v8578_v9  ;;  %v8665_v8 = vld [vmem:[%s12015_s1 + $0x1120] ss:$16 sps:$4 sm:$0xff]   ;;  %v8668_v9 = vld [vmem:[%s12015_s1 + $0x1128] ss:$16 sps:$4 sm:$0xff]  }
 0x1ec   :  { %5312 = vmatprep.subr.bf16.mxu0 %v8583_v10  ;;  %5845 = vmatprep.subr.bf16.mxu1 %v8586_v11  ;;  %v8673_v10 = vld [vmem:[%s12015_s1 + $0x1144] ss:$16 sps:$4 sm:$0xff]   ;;  %v8676_v11 = vld [vmem:[%s12015_s1 + $0x114c] ss:$16 sps:$4 sm:$0xff]  }
 0x1ef   :  { %5313 = vmatpush1.bf16.msra.mxu0 %v8581_v12  ;;  %5846 = vmatpush1.bf16.msra.mxu1 %v8584_v13  ;;  %v8671_v12 = vld [vmem:[%s12015_s1 + $0x1140] ss:$16 sps:$4 sm:$0xff]   ;;  %v8674_v13 = vld [vmem:[%s12015_s1 + $0x1148] ss:$16 sps:$4 sm:$0xff]  }
 0x1f0   :  { %5314 = vmatprep.subr.bf16.mxu0 %v8589_v14  ;;  %5847 = vmatprep.subr.bf16.mxu1 %v8592_v15  ;;  %v8679_v14 = vld [vmem:[%s12015_s1 + $0x1164] ss:$16 sps:$4 sm:$0xff]   ;;  %v8682_v15 = vld [vmem:[%s12015_s1 + $0x116c] ss:$16 sps:$4 sm:$0xff]  }
 0x1f3   :  { %5315 = vmatpush1.bf16.msra.mxu0 %v8587_v16  ;;  %5848 = vmatpush1.bf16.msra.mxu1 %v8590_v17  ;;  %v8677_v16 = vld [vmem:[%s12015_s1 + $0x1160] ss:$16 sps:$4 sm:$0xff]   ;;  %v8680_v17 = vld [vmem:[%s12015_s1 + $0x1168] ss:$16 sps:$4 sm:$0xff]  }
 0x1f4   :  { %5316 = vmatprep.subr.bf16.mxu0 %v8595_v18  ;;  %5849 = vmatprep.subr.bf16.mxu1 %v8598_v19  ;;  %v8685_v18 = vld [vmem:[%s12015_s1 + $0x1184] ss:$16 sps:$4 sm:$0xff]   ;;  %v8688_v19 = vld [vmem:[%s12015_s1 + $0x118c] ss:$16 sps:$4 sm:$0xff]  }
 0x1f7   :  { %5317 = vmatpush1.bf16.msra.mxu0 %v8593_v20  ;;  %5850 = vmatpush1.bf16.msra.mxu1 %v8596_v21  ;;  %v8683_v20 = vld [vmem:[%s12015_s1 + $0x1180] ss:$16 sps:$4 sm:$0xff]   ;;  %v8686_v21 = vld [vmem:[%s12015_s1 + $0x1188] ss:$16 sps:$4 sm:$0xff]  }
 0x1f8   :  { %5318 = vmatprep.subr.bf16.mxu0 %v8601_v22  ;;  %5851 = vmatprep.subr.bf16.mxu1 %v8604_v23  ;;  %v8691_v22 = vld [vmem:[%s12015_s1 + $0x11a4] ss:$16 sps:$4 sm:$0xff]   ;;  %v8694_v23 = vld [vmem:[%s12015_s1 + $0x11ac] ss:$16 sps:$4 sm:$0xff]  }
 0x1fb   :  { %5319 = vmatpush1.bf16.msra.mxu0 %v8599_v24  ;;  %5852 = vmatpush1.bf16.msra.mxu1 %v8602_v25  ;;  %v8689_v24 = vld [vmem:[%s12015_s1 + $0x11a0] ss:$16 sps:$4 sm:$0xff]   ;;  %v8692_v25 = vld [vmem:[%s12015_s1 + $0x11a8] ss:$16 sps:$4 sm:$0xff]  }
 0x1fc   :  { %5320 = vmatprep.subr.bf16.mxu0 %v8607_v26  ;;  %5853 = vmatprep.subr.bf16.mxu1 %v8610_v27  ;;  %v8697_v26 = vld [vmem:[%s12015_s1 + $0x11c4] ss:$16 sps:$4 sm:$0xff]   ;;  %v8700_v27 = vld [vmem:[%s12015_s1 + $0x11cc] ss:$16 sps:$4 sm:$0xff]  }
 0x1ff   :  { %5321 = vmatpush1.bf16.msra.mxu0 %v8605_v28  ;;  %5854 = vmatpush1.bf16.msra.mxu1 %v8608_v29  ;;  %v8695_v28 = vld [vmem:[%s12015_s1 + $0x11c0] ss:$16 sps:$4 sm:$0xff]   ;;  %v8698_v29 = vld [vmem:[%s12015_s1 + $0x11c8] ss:$16 sps:$4 sm:$0xff]  }
 0x200   :  { %5331 = vmatprep.subr.bf16.mxu0 %v8613_v31  ;;  %5864 = vmatprep.subr.bf16.mxu1 %v8616_v32  ;;  %v8706_v31 = vld [vmem:[%s12015_s1 + $0x11ec] ss:$16 sps:$4 sm:$0xff]   ;;  %v8701_v32 = vld [vmem:[%s12015_s1 + $0x11e0] ss:$16 sps:$4 sm:$0xff]  }
 0x202   :  { %5323 = vmatmul.mubr.bf16.vlgmr.msra.gmra.mrb[0].mxu0 %v69_v33  ;;  %5856 = vmatmul.mubr.bf16.vlgmr.msra.gmra.mrb[0].mxu1 %v69_v33  ;;  %v8704_v33 = vld [vmem:[%s12015_s1 + $0x11e8] ss:$16 sps:$4 sm:$0xff]  }
 0x203   :  { %5332 = vmatpush1.bf16.msra.mxu0 %v8611_v35  ;;  %5865 = vmatpush1.bf16.msra.mxu1 %v8614_v36  ;;  %v8709_v35 = vld [vmem:[%s12015_s1 + $0x1204] ss:$16 sps:$4 sm:$0xff]   ;;  %v8712_v36 = vld [vmem:[%s12015_s1 + $0x120c] ss:$16 sps:$4 sm:$0xff]  }
 0x204   :  { %5333 = vmatprep.subr.bf16.mxu0 %v8619_v37  ;;  %5866 = vmatprep.subr.bf16.mxu1 %v8622_v38  ;;  %v71_v37 = vpack.c.bf16 %v45_v34, %v45_v34  ;;  %v48_v38 = vld [vmem:[%s12016_s0 + $0x98] sm:$0xff]  ;;  %v8799_v34 = vld [vmem:[%s12015_s1 + $0x13e4] ss:$16 sps:$4 sm:$0xff]  }
 0x205   :  { %5363 = vmatprep.mubr.bf16.mxu0 %v72_v39  ;;  %5896 = vmatprep.mubr.bf16.mxu1 %v72_v39  ;;  %v8707_v39 = vld [vmem:[%s12015_s1 + $0x1200] ss:$16 sps:$4 sm:$0xff]  }
 0x207   :  { %5334 = vmatpush1.bf16.msra.mxu0 %v8617_v40  ;;  %5867 = vmatpush1.bf16.msra.mxu1 %v8620_v41  ;;  %v8710_v40 = vld [vmem:[%s12015_s1 + $0x1208] ss:$16 sps:$4 sm:$0xff]   ;;  %v8715_v41 = vld [vmem:[%s12015_s1 + $0x1224] ss:$16 sps:$4 sm:$0xff]  }
 0x208   :  { %5335 = vmatprep.subr.bf16.mxu0 %v8625_v42  ;;  %5868 = vmatprep.subr.bf16.mxu1 %v8628_v43  ;;  %v8718_v42 = vld [vmem:[%s12015_s1 + $0x122c] ss:$16 sps:$4 sm:$0xff]   ;;  %v74_v43 = vpack.c.bf16 %v48_v38, %v48_v38  ;;  %v47_v38 = vld [vmem:[%s12016_s0 + $0x90] sm:$0xff] }
 0x20b   :  { %5336 = vmatpush1.bf16.msra.mxu0 %v8623_v44  ;;  %5869 = vmatpush1.bf16.msra.mxu1 %v8626_v45  ;;  %v8713_v44 = vld [vmem:[%s12015_s1 + $0x1220] ss:$16 sps:$4 sm:$0xff]   ;;  %v8716_v45 = vld [vmem:[%s12015_s1 + $0x1228] ss:$16 sps:$4 sm:$0xff]  }
 0x20c   :  { %5337 = vmatprep.subr.bf16.mxu0 %v8631_v46  ;;  %5870 = vmatprep.subr.bf16.mxu1 %v8634_v47  ;;  %v8721_v46 = vld [vmem:[%s12015_s1 + $0x1244] ss:$16 sps:$4 sm:$0xff]   ;;  %v8724_v47 = vld [vmem:[%s12015_s1 + $0x124c] ss:$16 sps:$4 sm:$0xff]  }
 0x20f   :  { %5338 = vmatpush1.bf16.msra.mxu0 %v8629_v48  ;;  %5871 = vmatpush1.bf16.msra.mxu1 %v8632_v49  ;;  %v8719_v48 = vld [vmem:[%s12015_s1 + $0x1240] ss:$16 sps:$4 sm:$0xff]   ;;  %v8722_v49 = vld [vmem:[%s12015_s1 + $0x1248] ss:$16 sps:$4 sm:$0xff]  }
 0x210   :  { %5339 = vmatprep.subr.bf16.mxu0 %v8637_v50  ;;  %5872 = vmatprep.subr.bf16.mxu1 %v8640_v51  ;;  %v8727_v50 = vld [vmem:[%s12015_s1 + $0x1264] ss:$16 sps:$4 sm:$0xff]   ;;  %v8730_v51 = vld [vmem:[%s12015_s1 + $0x126c] ss:$16 sps:$4 sm:$0xff]  }
 0x213   :  { %5340 = vmatpush1.bf16.msra.mxu0 %v8635_v52  ;;  %5873 = vmatpush1.bf16.msra.mxu1 %v8638_v53  ;;  %v8725_v52 = vld [vmem:[%s12015_s1 + $0x1260] ss:$16 sps:$4 sm:$0xff]   ;;  %v8728_v53 = vld [vmem:[%s12015_s1 + $0x1268] ss:$16 sps:$4 sm:$0xff]  }
 0x214   :  { %5341 = vmatprep.subr.bf16.mxu0 %v8643_v54  ;;  %5874 = vmatprep.subr.bf16.mxu1 %v8646_v55  ;;  %v8733_v54 = vld [vmem:[%s12015_s1 + $0x1284] ss:$16 sps:$4 sm:$0xff]   ;;  %v8736_v55 = vld [vmem:[%s12015_s1 + $0x128c] ss:$16 sps:$4 sm:$0xff]  }
 0x217   :  { %5342 = vmatpush1.bf16.msra.mxu0 %v8641_v56  ;;  %5875 = vmatpush1.bf16.msra.mxu1 %v8644_v57  ;;  %v8731_v56 = vld [vmem:[%s12015_s1 + $0x1280] ss:$16 sps:$4 sm:$0xff]   ;;  %v8734_v57 = vld [vmem:[%s12015_s1 + $0x1288] ss:$16 sps:$4 sm:$0xff]  }
 0x218   :  { %5343 = vmatprep.subr.bf16.mxu0 %v8649_v58  ;;  %5876 = vmatprep.subr.bf16.mxu1 %v8652_v59  ;;  %v8739_v58 = vld [vmem:[%s12015_s1 + $0x12a4] ss:$16 sps:$4 sm:$0xff]   ;;  %v8742_v59 = vld [vmem:[%s12015_s1 + $0x12ac] ss:$16 sps:$4 sm:$0xff]  }
 0x21b   :  { %5344 = vmatpush1.bf16.msra.mxu0 %v8647_v60  ;;  %5877 = vmatpush1.bf16.msra.mxu1 %v8650_v61  ;;  %v8737_v60 = vld [vmem:[%s12015_s1 + $0x12a0] ss:$16 sps:$4 sm:$0xff]   ;;  %v8740_v61 = vld [vmem:[%s12015_s1 + $0x12a8] ss:$16 sps:$4 sm:$0xff]  }
 0x21c   :  { %5345 = vmatprep.subr.bf16.mxu0 %v8655_v62  ;;  %5878 = vmatprep.subr.bf16.mxu1 %v8658_v63  ;;  %v8745_v62 = vld [vmem:[%s12015_s1 + $0x12c4] ss:$16 sps:$4 sm:$0xff]   ;;  %v8748_v63 = vld [vmem:[%s12015_s1 + $0x12cc] ss:$16 sps:$4 sm:$0xff]  }
 0x21f   :  { %5346 = vmatpush1.bf16.msra.mxu0 %v8653_v0  ;;  %5879 = vmatpush1.bf16.msra.mxu1 %v8656_v1  ;;  %v8743_v0 = vld [vmem:[%s12015_s1 + $0x12c0] ss:$16 sps:$4 sm:$0xff]   ;;  %v8746_v1 = vld [vmem:[%s12015_s1 + $0x12c8] ss:$16 sps:$4 sm:$0xff]  }
 0x220   :  { %5347 = vmatprep.subr.bf16.mxu0 %v8661_v2  ;;  %5880 = vmatprep.subr.bf16.mxu1 %v8664_v3  ;;  %v8751_v2 = vld [vmem:[%s12015_s1 + $0x12e4] ss:$16 sps:$4 sm:$0xff]   ;;  %v8754_v3 = vld [vmem:[%s12015_s1 + $0x12ec] ss:$16 sps:$4 sm:$0xff]  }
 0x223   :  { %5348 = vmatpush1.bf16.msra.mxu0 %v8659_v4  ;;  %5881 = vmatpush1.bf16.msra.mxu1 %v8662_v5  ;;  %v8749_v4 = vld [vmem:[%s12015_s1 + $0x12e0] ss:$16 sps:$4 sm:$0xff]   ;;  %v8752_v5 = vld [vmem:[%s12015_s1 + $0x12e8] ss:$16 sps:$4 sm:$0xff]  }
 0x224   :  { %5349 = vmatprep.subr.bf16.mxu0 %v8667_v6  ;;  %5882 = vmatprep.subr.bf16.mxu1 %v8670_v7  ;;  %v8757_v6 = vld [vmem:[%s12015_s1 + $0x1304] ss:$16 sps:$4 sm:$0xff]   ;;  %v8760_v7 = vld [vmem:[%s12015_s1 + $0x130c] ss:$16 sps:$4 sm:$0xff]  }
 0x227   :  { %5350 = vmatpush1.bf16.msra.mxu0 %v8665_v8  ;;  %5883 = vmatpush1.bf16.msra.mxu1 %v8668_v9  ;;  %v8755_v8 = vld [vmem:[%s12015_s1 + $0x1300] ss:$16 sps:$4 sm:$0xff]   ;;  %v8758_v9 = vld [vmem:[%s12015_s1 + $0x1308] ss:$16 sps:$4 sm:$0xff]  }
 0x228   :  { %5351 = vmatprep.subr.bf16.mxu0 %v8673_v10  ;;  %5884 = vmatprep.subr.bf16.mxu1 %v8676_v11  ;;  %v8763_v10 = vld [vmem:[%s12015_s1 + $0x1324] ss:$16 sps:$4 sm:$0xff]   ;;  %v8766_v11 = vld [vmem:[%s12015_s1 + $0x132c] ss:$16 sps:$4 sm:$0xff]  }
 0x22b   :  { %5352 = vmatpush1.bf16.msra.mxu0 %v8671_v12  ;;  %5885 = vmatpush1.bf16.msra.mxu1 %v8674_v13  ;;  %v8761_v12 = vld [vmem:[%s12015_s1 + $0x1320] ss:$16 sps:$4 sm:$0xff]   ;;  %v8764_v13 = vld [vmem:[%s12015_s1 + $0x1328] ss:$16 sps:$4 sm:$0xff]  }
 0x22c   :  { %5353 = vmatprep.subr.bf16.mxu0 %v8679_v14  ;;  %5886 = vmatprep.subr.bf16.mxu1 %v8682_v15  ;;  %v8769_v14 = vld [vmem:[%s12015_s1 + $0x1344] ss:$16 sps:$4 sm:$0xff]   ;;  %v8772_v15 = vld [vmem:[%s12015_s1 + $0x134c] ss:$16 sps:$4 sm:$0xff]  }
 0x22f   :  { %5354 = vmatpush1.bf16.msra.mxu0 %v8677_v16  ;;  %5887 = vmatpush1.bf16.msra.mxu1 %v8680_v17  ;;  %v8767_v16 = vld [vmem:[%s12015_s1 + $0x1340] ss:$16 sps:$4 sm:$0xff]   ;;  %v8770_v17 = vld [vmem:[%s12015_s1 + $0x1348] ss:$16 sps:$4 sm:$0xff]  }
 0x230   :  { %5355 = vmatprep.subr.bf16.mxu0 %v8685_v18  ;;  %5888 = vmatprep.subr.bf16.mxu1 %v8688_v19  ;;  %v8775_v18 = vld [vmem:[%s12015_s1 + $0x1364] ss:$16 sps:$4 sm:$0xff]   ;;  %v8778_v19 = vld [vmem:[%s12015_s1 + $0x136c] ss:$16 sps:$4 sm:$0xff]  }
 0x233   :  { %5356 = vmatpush1.bf16.msra.mxu0 %v8683_v20  ;;  %5889 = vmatpush1.bf16.msra.mxu1 %v8686_v21  ;;  %v8773_v20 = vld [vmem:[%s12015_s1 + $0x1360] ss:$16 sps:$4 sm:$0xff]   ;;  %v8776_v21 = vld [vmem:[%s12015_s1 + $0x1368] ss:$16 sps:$4 sm:$0xff]  }
 0x234   :  { %5357 = vmatprep.subr.bf16.mxu0 %v8691_v22  ;;  %5890 = vmatprep.subr.bf16.mxu1 %v8694_v23  ;;  %v8781_v22 = vld [vmem:[%s12015_s1 + $0x1384] ss:$16 sps:$4 sm:$0xff]   ;;  %v8784_v23 = vld [vmem:[%s12015_s1 + $0x138c] ss:$16 sps:$4 sm:$0xff]  }
 0x237   :  { %5358 = vmatpush1.bf16.msra.mxu0 %v8689_v24  ;;  %5891 = vmatpush1.bf16.msra.mxu1 %v8692_v25  ;;  %v8779_v24 = vld [vmem:[%s12015_s1 + $0x1380] ss:$16 sps:$4 sm:$0xff]   ;;  %v8782_v25 = vld [vmem:[%s12015_s1 + $0x1388] ss:$16 sps:$4 sm:$0xff]  }
 0x238   :  { %5359 = vmatprep.subr.bf16.mxu0 %v8697_v26  ;;  %5892 = vmatprep.subr.bf16.mxu1 %v8700_v27  ;;  %v8787_v26 = vld [vmem:[%s12015_s1 + $0x13a4] ss:$16 sps:$4 sm:$0xff]   ;;  %v8790_v27 = vld [vmem:[%s12015_s1 + $0x13ac] ss:$16 sps:$4 sm:$0xff]  }
 0x23b   :  { %5360 = vmatpush1.bf16.msra.mxu0 %v8695_v28  ;;  %5893 = vmatpush1.bf16.msra.mxu1 %v8698_v29  ;;  %v8785_v28 = vld [vmem:[%s12015_s1 + $0x13a0] ss:$16 sps:$4 sm:$0xff]   ;;  %v8788_v29 = vld [vmem:[%s12015_s1 + $0x13a8] ss:$16 sps:$4 sm:$0xff]  }
 0x23c   :  { %5361 = vmatprep.subr.bf16.mxu0 %v8703_v30  ;;  %5894 = vmatprep.subr.bf16.mxu1 %v8706_v31  ;;  %v8793_v30 = vld [vmem:[%s12015_s1 + $0x13c4] ss:$16 sps:$4 sm:$0xff]   ;;  %v8796_v31 = vld [vmem:[%s12015_s1 + $0x13cc] ss:$16 sps:$4 sm:$0xff]  }
 0x23f   :  { %5362 = vmatpush1.bf16.msra.mxu0 %v8701_v32  ;;  %5895 = vmatpush1.bf16.msra.mxu1 %v8704_v33  ;;  %v8791_v32 = vld [vmem:[%s12015_s1 + $0x13c0] ss:$16 sps:$4 sm:$0xff]   ;;  %v8794_v33 = vld [vmem:[%s12015_s1 + $0x13c8] ss:$16 sps:$4 sm:$0xff]  }
 0x240   :  { %5372 = vmatprep.subr.bf16.mxu0 %v8709_v35  ;;  %5905 = vmatprep.subr.bf16.mxu1 %v8712_v36  ;;  %v8802_v35 = vld [vmem:[%s12015_s1 + $0x13ec] ss:$16 sps:$4 sm:$0xff]   ;;  %v8797_v36 = vld [vmem:[%s12015_s1 + $0x13e0] ss:$16 sps:$4 sm:$0xff]  }
 0x242   :  { %5364 = vmatmul.mubr.bf16.vlgmr.msra.gmra.mrb[0].mxu0 %v71_v37  ;;  %5897 = vmatmul.mubr.bf16.vlgmr.msra.gmra.mrb[0].mxu1 %v71_v37  ;;  %v8800_v37 = vld [vmem:[%s12015_s1 + $0x13e8] ss:$16 sps:$4 sm:$0xff]  }
 0x243   :  { %5373 = vmatpush1.bf16.msra.mxu0 %v8707_v39  ;;  %5906 = vmatpush1.bf16.msra.mxu1 %v8710_v40  ;;  %v8805_v39 = vld [vmem:[%s12015_s1 + $0x1404] ss:$16 sps:$4 sm:$0xff]   ;;  %v8808_v40 = vld [vmem:[%s12015_s1 + $0x140c] ss:$16 sps:$4 sm:$0xff]  }
 0x244   :  { %5374 = vmatprep.subr.bf16.mxu0 %v8715_v41  ;;  %5907 = vmatprep.subr.bf16.mxu1 %v8718_v42  ;;  %v73_v41 = vpack.c.bf16 %v47_v38, %v47_v38  ;;  %v50_v42 = vld [vmem:[%s12016_s0 + $0xa8] sm:$0xff]  ;;  %v8895_v38 = vld [vmem:[%s12015_s1 + $0x15e4] ss:$16 sps:$4 sm:$0xff]  }
 0x245   :  { %5404 = vmatprep.mubr.bf16.mxu0 %v74_v43  ;;  %5937 = vmatprep.mubr.bf16.mxu1 %v74_v43  ;;  %v8803_v43 = vld [vmem:[%s12015_s1 + $0x1400] ss:$16 sps:$4 sm:$0xff]  }
 0x247   :  { %5375 = vmatpush1.bf16.msra.mxu0 %v8713_v44  ;;  %5908 = vmatpush1.bf16.msra.mxu1 %v8716_v45  ;;  %v8806_v44 = vld [vmem:[%s12015_s1 + $0x1408] ss:$16 sps:$4 sm:$0xff]   ;;  %v8811_v45 = vld [vmem:[%s12015_s1 + $0x1424] ss:$16 sps:$4 sm:$0xff]  }
 0x248   :  { %5376 = vmatprep.subr.bf16.mxu0 %v8721_v46  ;;  %5909 = vmatprep.subr.bf16.mxu1 %v8724_v47  ;;  %v8814_v46 = vld [vmem:[%s12015_s1 + $0x142c] ss:$16 sps:$4 sm:$0xff]   ;;  %v76_v47 = vpack.c.bf16 %v50_v42, %v50_v42  ;;  %v8901_v42 = vld [vmem:[%s12015_s1 + $0x1604] ss:$16 sps:$4 sm:$0xff]  }
 0x24b   :  { %5377 = vmatpush1.bf16.msra.mxu0 %v8719_v48  ;;  %5910 = vmatpush1.bf16.msra.mxu1 %v8722_v49  ;;  %v8809_v48 = vld [vmem:[%s12015_s1 + $0x1420] ss:$16 sps:$4 sm:$0xff]   ;;  %v8812_v49 = vld [vmem:[%s12015_s1 + $0x1428] ss:$16 sps:$4 sm:$0xff]  }
 0x24c   :  { %5378 = vmatprep.subr.bf16.mxu0 %v8727_v50  ;;  %5911 = vmatprep.subr.bf16.mxu1 %v8730_v51  ;;  %v8817_v50 = vld [vmem:[%s12015_s1 + $0x1444] ss:$16 sps:$4 sm:$0xff]   ;;  %v8820_v51 = vld [vmem:[%s12015_s1 + $0x144c] ss:$16 sps:$4 sm:$0xff]  }
 0x24f   :  { %5379 = vmatpush1.bf16.msra.mxu0 %v8725_v52  ;;  %5912 = vmatpush1.bf16.msra.mxu1 %v8728_v53  ;;  %v8815_v52 = vld [vmem:[%s12015_s1 + $0x1440] ss:$16 sps:$4 sm:$0xff]   ;;  %v8818_v53 = vld [vmem:[%s12015_s1 + $0x1448] ss:$16 sps:$4 sm:$0xff]  }
 0x250   :  { %5380 = vmatprep.subr.bf16.mxu0 %v8733_v54  ;;  %5913 = vmatprep.subr.bf16.mxu1 %v8736_v55  ;;  %v8823_v54 = vld [vmem:[%s12015_s1 + $0x1464] ss:$16 sps:$4 sm:$0xff]   ;;  %v8826_v55 = vld [vmem:[%s12015_s1 + $0x146c] ss:$16 sps:$4 sm:$0xff]  }
 0x253   :  { %5381 = vmatpush1.bf16.msra.mxu0 %v8731_v56  ;;  %5914 = vmatpush1.bf16.msra.mxu1 %v8734_v57  ;;  %v8821_v56 = vld [vmem:[%s12015_s1 + $0x1460] ss:$16 sps:$4 sm:$0xff]   ;;  %v8824_v57 = vld [vmem:[%s12015_s1 + $0x1468] ss:$16 sps:$4 sm:$0xff]  }
 0x254   :  { %5382 = vmatprep.subr.bf16.mxu0 %v8739_v58  ;;  %5915 = vmatprep.subr.bf16.mxu1 %v8742_v59  ;;  %v8829_v58 = vld [vmem:[%s12015_s1 + $0x1484] ss:$16 sps:$4 sm:$0xff]   ;;  %v8832_v59 = vld [vmem:[%s12015_s1 + $0x148c] ss:$16 sps:$4 sm:$0xff]  }
 0x257   :  { %5383 = vmatpush1.bf16.msra.mxu0 %v8737_v60  ;;  %5916 = vmatpush1.bf16.msra.mxu1 %v8740_v61  ;;  %v8827_v60 = vld [vmem:[%s12015_s1 + $0x1480] ss:$16 sps:$4 sm:$0xff]   ;;  %v8830_v61 = vld [vmem:[%s12015_s1 + $0x1488] ss:$16 sps:$4 sm:$0xff]  }
 0x258   :  { %5384 = vmatprep.subr.bf16.mxu0 %v8745_v62  ;;  %5917 = vmatprep.subr.bf16.mxu1 %v8748_v63  ;;  %v8835_v62 = vld [vmem:[%s12015_s1 + $0x14a4] ss:$16 sps:$4 sm:$0xff]   ;;  %v8838_v63 = vld [vmem:[%s12015_s1 + $0x14ac] ss:$16 sps:$4 sm:$0xff]  }
 0x25b   :  { %5385 = vmatpush1.bf16.msra.mxu0 %v8743_v0  ;;  %5918 = vmatpush1.bf16.msra.mxu1 %v8746_v1  ;;  %v8833_v0 = vld [vmem:[%s12015_s1 + $0x14a0] ss:$16 sps:$4 sm:$0xff]   ;;  %v8836_v1 = vld [vmem:[%s12015_s1 + $0x14a8] ss:$16 sps:$4 sm:$0xff]  }
 0x25c   :  { %5386 = vmatprep.subr.bf16.mxu0 %v8751_v2  ;;  %5919 = vmatprep.subr.bf16.mxu1 %v8754_v3  ;;  %v8841_v2 = vld [vmem:[%s12015_s1 + $0x14c4] ss:$16 sps:$4 sm:$0xff]   ;;  %v8844_v3 = vld [vmem:[%s12015_s1 + $0x14cc] ss:$16 sps:$4 sm:$0xff]  }
 0x25f   :  { %5387 = vmatpush1.bf16.msra.mxu0 %v8749_v4  ;;  %5920 = vmatpush1.bf16.msra.mxu1 %v8752_v5  ;;  %v8839_v4 = vld [vmem:[%s12015_s1 + $0x14c0] ss:$16 sps:$4 sm:$0xff]   ;;  %v8842_v5 = vld [vmem:[%s12015_s1 + $0x14c8] ss:$16 sps:$4 sm:$0xff]  }
 0x260   :  { %5388 = vmatprep.subr.bf16.mxu0 %v8757_v6  ;;  %5921 = vmatprep.subr.bf16.mxu1 %v8760_v7  ;;  %v8847_v6 = vld [vmem:[%s12015_s1 + $0x14e4] ss:$16 sps:$4 sm:$0xff]   ;;  %v8850_v7 = vld [vmem:[%s12015_s1 + $0x14ec] ss:$16 sps:$4 sm:$0xff]  }
 0x263   :  { %5389 = vmatpush1.bf16.msra.mxu0 %v8755_v8  ;;  %5922 = vmatpush1.bf16.msra.mxu1 %v8758_v9  ;;  %v8845_v8 = vld [vmem:[%s12015_s1 + $0x14e0] ss:$16 sps:$4 sm:$0xff]   ;;  %v8848_v9 = vld [vmem:[%s12015_s1 + $0x14e8] ss:$16 sps:$4 sm:$0xff]  }
 0x264   :  { %5390 = vmatprep.subr.bf16.mxu0 %v8763_v10  ;;  %5923 = vmatprep.subr.bf16.mxu1 %v8766_v11  ;;  %v8853_v10 = vld [vmem:[%s12015_s1 + $0x1504] ss:$16 sps:$4 sm:$0xff]   ;;  %v8856_v11 = vld [vmem:[%s12015_s1 + $0x150c] ss:$16 sps:$4 sm:$0xff]  }
 0x267   :  { %5391 = vmatpush1.bf16.msra.mxu0 %v8761_v12  ;;  %5924 = vmatpush1.bf16.msra.mxu1 %v8764_v13  ;;  %v8851_v12 = vld [vmem:[%s12015_s1 + $0x1500] ss:$16 sps:$4 sm:$0xff]   ;;  %v8854_v13 = vld [vmem:[%s12015_s1 + $0x1508] ss:$16 sps:$4 sm:$0xff]  }
 0x268   :  { %5392 = vmatprep.subr.bf16.mxu0 %v8769_v14  ;;  %5925 = vmatprep.subr.bf16.mxu1 %v8772_v15  ;;  %v8859_v14 = vld [vmem:[%s12015_s1 + $0x1524] ss:$16 sps:$4 sm:$0xff]   ;;  %v8862_v15 = vld [vmem:[%s12015_s1 + $0x152c] ss:$16 sps:$4 sm:$0xff]  }
 0x26b   :  { %5393 = vmatpush1.bf16.msra.mxu0 %v8767_v16  ;;  %5926 = vmatpush1.bf16.msra.mxu1 %v8770_v17  ;;  %v8857_v16 = vld [vmem:[%s12015_s1 + $0x1520] ss:$16 sps:$4 sm:$0xff]   ;;  %v8860_v17 = vld [vmem:[%s12015_s1 + $0x1528] ss:$16 sps:$4 sm:$0xff]  }
 0x26c   :  { %5394 = vmatprep.subr.bf16.mxu0 %v8775_v18  ;;  %5927 = vmatprep.subr.bf16.mxu1 %v8778_v19  ;;  %v8865_v18 = vld [vmem:[%s12015_s1 + $0x1544] ss:$16 sps:$4 sm:$0xff]   ;;  %v8868_v19 = vld [vmem:[%s12015_s1 + $0x154c] ss:$16 sps:$4 sm:$0xff]  }
 0x26f   :  { %5395 = vmatpush1.bf16.msra.mxu0 %v8773_v20  ;;  %5928 = vmatpush1.bf16.msra.mxu1 %v8776_v21  ;;  %v8863_v20 = vld [vmem:[%s12015_s1 + $0x1540] ss:$16 sps:$4 sm:$0xff]   ;;  %v8866_v21 = vld [vmem:[%s12015_s1 + $0x1548] ss:$16 sps:$4 sm:$0xff]  }
 0x270   :  { %5396 = vmatprep.subr.bf16.mxu0 %v8781_v22  ;;  %5929 = vmatprep.subr.bf16.mxu1 %v8784_v23  ;;  %v8871_v22 = vld [vmem:[%s12015_s1 + $0x1564] ss:$16 sps:$4 sm:$0xff]   ;;  %v8874_v23 = vld [vmem:[%s12015_s1 + $0x156c] ss:$16 sps:$4 sm:$0xff]  }
 0x273   :  { %5397 = vmatpush1.bf16.msra.mxu0 %v8779_v24  ;;  %5930 = vmatpush1.bf16.msra.mxu1 %v8782_v25  ;;  %v8869_v24 = vld [vmem:[%s12015_s1 + $0x1560] ss:$16 sps:$4 sm:$0xff]   ;;  %v8872_v25 = vld [vmem:[%s12015_s1 + $0x1568] ss:$16 sps:$4 sm:$0xff]  }
 0x274   :  { %5398 = vmatprep.subr.bf16.mxu0 %v8787_v26  ;;  %5931 = vmatprep.subr.bf16.mxu1 %v8790_v27  ;;  %v8877_v26 = vld [vmem:[%s12015_s1 + $0x1584] ss:$16 sps:$4 sm:$0xff]   ;;  %v8880_v27 = vld [vmem:[%s12015_s1 + $0x158c] ss:$16 sps:$4 sm:$0xff]  }
 0x277   :  { %5399 = vmatpush1.bf16.msra.mxu0 %v8785_v28  ;;  %5932 = vmatpush1.bf16.msra.mxu1 %v8788_v29  ;;  %v8875_v28 = vld [vmem:[%s12015_s1 + $0x1580] ss:$16 sps:$4 sm:$0xff]   ;;  %v8878_v29 = vld [vmem:[%s12015_s1 + $0x1588] ss:$16 sps:$4 sm:$0xff]  }
 0x278   :  { %5400 = vmatprep.subr.bf16.mxu0 %v8793_v30  ;;  %5933 = vmatprep.subr.bf16.mxu1 %v8796_v31  ;;  %v8883_v30 = vld [vmem:[%s12015_s1 + $0x15a4] ss:$16 sps:$4 sm:$0xff]   ;;  %v8886_v31 = vld [vmem:[%s12015_s1 + $0x15ac] ss:$16 sps:$4 sm:$0xff]  }
 0x27b   :  { %5401 = vmatpush1.bf16.msra.mxu0 %v8791_v32  ;;  %5934 = vmatpush1.bf16.msra.mxu1 %v8794_v33  ;;  %v8881_v32 = vld [vmem:[%s12015_s1 + $0x15a0] ss:$16 sps:$4 sm:$0xff]   ;;  %v8884_v33 = vld [vmem:[%s12015_s1 + $0x15a8] ss:$16 sps:$4 sm:$0xff]  }
 0x27c   :  { %5402 = vmatprep.subr.bf16.mxu0 %v8799_v34  ;;  %5935 = vmatprep.subr.bf16.mxu1 %v8802_v35  ;;  %v8889_v34 = vld [vmem:[%s12015_s1 + $0x15c4] ss:$16 sps:$4 sm:$0xff]   ;;  %v8892_v35 = vld [vmem:[%s12015_s1 + $0x15cc] ss:$16 sps:$4 sm:$0xff]  }
 0x27f   :  { %5403 = vmatpush1.bf16.msra.mxu0 %v8797_v36  ;;  %5936 = vmatpush1.bf16.msra.mxu1 %v8800_v37  ;;  %v8887_v36 = vld [vmem:[%s12015_s1 + $0x15c0] ss:$16 sps:$4 sm:$0xff]   ;;  %v8890_v37 = vld [vmem:[%s12015_s1 + $0x15c8] ss:$16 sps:$4 sm:$0xff]  }
 0x280   :  { %5413 = vmatprep.subr.bf16.mxu0 %v8805_v39  ;;  %5946 = vmatprep.subr.bf16.mxu1 %v8808_v40  ;;  %v8898_v39 = vld [vmem:[%s12015_s1 + $0x15ec] ss:$16 sps:$4 sm:$0xff]   ;;  %v8893_v40 = vld [vmem:[%s12015_s1 + $0x15e0] ss:$16 sps:$4 sm:$0xff]  }
 0x282   :  { %5405 = vmatmul.mubr.bf16.vlgmr.msra.gmra.mrb[0].mxu0 %v73_v41  ;;  %5938 = vmatmul.mubr.bf16.vlgmr.msra.gmra.mrb[0].mxu1 %v73_v41  ;;  %v8896_v41 = vld [vmem:[%s12015_s1 + $0x15e8] ss:$16 sps:$4 sm:$0xff]  }
 0x283   :  { %5414 = vmatpush1.bf16.msra.mxu0 %v8803_v43  ;;  %5947 = vmatpush1.bf16.msra.mxu1 %v8806_v44  ;;  %v8904_v43 = vld [vmem:[%s12015_s1 + $0x160c] ss:$16 sps:$4 sm:$0xff]   ;;  %v49_v44 = vld [vmem:[%s12016_s0 + $0xa0] sm:$0xff] }
 0x284   :  { %5415 = vmatprep.subr.bf16.mxu0 %v8811_v45  ;;  %5948 = vmatprep.subr.bf16.mxu1 %v8814_v46  ;;  %v52_v45 = vld [vmem:[%s12016_s0 + $0xb8] sm:$0xff]  ;;  %v8899_v46 = vld [vmem:[%s12015_s1 + $0x1600] ss:$16 sps:$4 sm:$0xff]  }
 0x285   :  { %5445 = vmatprep.mubr.bf16.mxu0 %v76_v47  ;;  %5978 = vmatprep.mubr.bf16.mxu1 %v76_v47  ;;  %v8902_v47 = vld [vmem:[%s12015_s1 + $0x1608] ss:$16 sps:$4 sm:$0xff]  }
 0x287   :  { %5416 = vmatpush1.bf16.msra.mxu0 %v8809_v48  ;;  %5949 = vmatpush1.bf16.msra.mxu1 %v8812_v49  ;;  %v75_v48 = vpack.c.bf16 %v49_v44, %v49_v44  ;;  %v8907_v49 = vld [vmem:[%s12015_s1 + $0x1624] ss:$16 sps:$4 sm:$0xff]   ;;  %v8989_v44 = vld [vmem:[%s12015_s1 + $0x17e0] ss:$16 sps:$4 sm:$0xff]  }
 0x288   :  { %5417 = vmatprep.subr.bf16.mxu0 %v8817_v50  ;;  %5950 = vmatprep.subr.bf16.mxu1 %v8820_v51  ;;  %v8910_v50 = vld [vmem:[%s12015_s1 + $0x162c] ss:$16 sps:$4 sm:$0xff]   ;;  %v8905_v51 = vld [vmem:[%s12015_s1 + $0x1620] ss:$16 sps:$4 sm:$0xff]  }
 0x28b   :  { %5418 = vmatpush1.bf16.msra.mxu0 %v8815_v52  ;;  %5951 = vmatpush1.bf16.msra.mxu1 %v8818_v53  ;;  %v8908_v52 = vld [vmem:[%s12015_s1 + $0x1628] ss:$16 sps:$4 sm:$0xff]   ;;  %v78_v53 = vpack.c.bf16 %v52_v45, %v52_v45 }
 0x28c   :  { %5419 = vmatprep.subr.bf16.mxu0 %v8823_v54  ;;  %5952 = vmatprep.subr.bf16.mxu1 %v8826_v55  ;;  %v8913_v54 = vld [vmem:[%s12015_s1 + $0x1644] ss:$16 sps:$4 sm:$0xff]   ;;  %v8916_v55 = vld [vmem:[%s12015_s1 + $0x164c] ss:$16 sps:$4 sm:$0xff]   ;;  %v8992_v45 = vld [vmem:[%s12015_s1 + $0x17e8] ss:$16 sps:$4 sm:$0xff]  }
 0x28f   :  { %5420 = vmatpush1.bf16.msra.mxu0 %v8821_v56  ;;  %5953 = vmatpush1.bf16.msra.mxu1 %v8824_v57  ;;  %v8911_v56 = vld [vmem:[%s12015_s1 + $0x1640] ss:$16 sps:$4 sm:$0xff]   ;;  %v8914_v57 = vld [vmem:[%s12015_s1 + $0x1648] ss:$16 sps:$4 sm:$0xff]  }
 0x290   :  { %5421 = vmatprep.subr.bf16.mxu0 %v8829_v58  ;;  %5954 = vmatprep.subr.bf16.mxu1 %v8832_v59  ;;  %v8919_v58 = vld [vmem:[%s12015_s1 + $0x1664] ss:$16 sps:$4 sm:$0xff]   ;;  %v8922_v59 = vld [vmem:[%s12015_s1 + $0x166c] ss:$16 sps:$4 sm:$0xff]  }
 0x293   :  { %5422 = vmatpush1.bf16.msra.mxu0 %v8827_v60  ;;  %5955 = vmatpush1.bf16.msra.mxu1 %v8830_v61  ;;  %v8917_v60 = vld [vmem:[%s12015_s1 + $0x1660] ss:$16 sps:$4 sm:$0xff]   ;;  %v8920_v61 = vld [vmem:[%s12015_s1 + $0x1668] ss:$16 sps:$4 sm:$0xff]  }
 0x294   :  { %5423 = vmatprep.subr.bf16.mxu0 %v8835_v62  ;;  %5956 = vmatprep.subr.bf16.mxu1 %v8838_v63  ;;  %v8925_v62 = vld [vmem:[%s12015_s1 + $0x1684] ss:$16 sps:$4 sm:$0xff]   ;;  %v8928_v63 = vld [vmem:[%s12015_s1 + $0x168c] ss:$16 sps:$4 sm:$0xff]  }
 0x297   :  { %5424 = vmatpush1.bf16.msra.mxu0 %v8833_v0  ;;  %5957 = vmatpush1.bf16.msra.mxu1 %v8836_v1  ;;  %v8923_v0 = vld [vmem:[%s12015_s1 + $0x1680] ss:$16 sps:$4 sm:$0xff]   ;;  %v8926_v1 = vld [vmem:[%s12015_s1 + $0x1688] ss:$16 sps:$4 sm:$0xff]  }
 0x298   :  { %5425 = vmatprep.subr.bf16.mxu0 %v8841_v2  ;;  %5958 = vmatprep.subr.bf16.mxu1 %v8844_v3  ;;  %v8931_v2 = vld [vmem:[%s12015_s1 + $0x16a4] ss:$16 sps:$4 sm:$0xff]   ;;  %v8934_v3 = vld [vmem:[%s12015_s1 + $0x16ac] ss:$16 sps:$4 sm:$0xff]  }
 0x29b   :  { %5426 = vmatpush1.bf16.msra.mxu0 %v8839_v4  ;;  %5959 = vmatpush1.bf16.msra.mxu1 %v8842_v5  ;;  %v8929_v4 = vld [vmem:[%s12015_s1 + $0x16a0] ss:$16 sps:$4 sm:$0xff]   ;;  %v8932_v5 = vld [vmem:[%s12015_s1 + $0x16a8] ss:$16 sps:$4 sm:$0xff]  }
 0x29c   :  { %5427 = vmatprep.subr.bf16.mxu0 %v8847_v6  ;;  %5960 = vmatprep.subr.bf16.mxu1 %v8850_v7  ;;  %v8937_v6 = vld [vmem:[%s12015_s1 + $0x16c4] ss:$16 sps:$4 sm:$0xff]   ;;  %v8940_v7 = vld [vmem:[%s12015_s1 + $0x16cc] ss:$16 sps:$4 sm:$0xff]  }
 0x29f   :  { %5428 = vmatpush1.bf16.msra.mxu0 %v8845_v8  ;;  %5961 = vmatpush1.bf16.msra.mxu1 %v8848_v9  ;;  %v8935_v8 = vld [vmem:[%s12015_s1 + $0x16c0] ss:$16 sps:$4 sm:$0xff]   ;;  %v8938_v9 = vld [vmem:[%s12015_s1 + $0x16c8] ss:$16 sps:$4 sm:$0xff]  }
 0x2a0   :  { %5429 = vmatprep.subr.bf16.mxu0 %v8853_v10  ;;  %5962 = vmatprep.subr.bf16.mxu1 %v8856_v11  ;;  %v8943_v10 = vld [vmem:[%s12015_s1 + $0x16e4] ss:$16 sps:$4 sm:$0xff]   ;;  %v8946_v11 = vld [vmem:[%s12015_s1 + $0x16ec] ss:$16 sps:$4 sm:$0xff]  }
 0x2a3   :  { %5430 = vmatpush1.bf16.msra.mxu0 %v8851_v12  ;;  %5963 = vmatpush1.bf16.msra.mxu1 %v8854_v13  ;;  %v8941_v12 = vld [vmem:[%s12015_s1 + $0x16e0] ss:$16 sps:$4 sm:$0xff]   ;;  %v8944_v13 = vld [vmem:[%s12015_s1 + $0x16e8] ss:$16 sps:$4 sm:$0xff]  }
 0x2a4   :  { %5431 = vmatprep.subr.bf16.mxu0 %v8859_v14  ;;  %5964 = vmatprep.subr.bf16.mxu1 %v8862_v15  ;;  %v8949_v14 = vld [vmem:[%s12015_s1 + $0x1704] ss:$16 sps:$4 sm:$0xff]   ;;  %v8952_v15 = vld [vmem:[%s12015_s1 + $0x170c] ss:$16 sps:$4 sm:$0xff]  }
 0x2a7   :  { %5432 = vmatpush1.bf16.msra.mxu0 %v8857_v16  ;;  %5965 = vmatpush1.bf16.msra.mxu1 %v8860_v17  ;;  %v8947_v16 = vld [vmem:[%s12015_s1 + $0x1700] ss:$16 sps:$4 sm:$0xff]   ;;  %v8950_v17 = vld [vmem:[%s12015_s1 + $0x1708] ss:$16 sps:$4 sm:$0xff]  }
 0x2a8   :  { %5433 = vmatprep.subr.bf16.mxu0 %v8865_v18  ;;  %5966 = vmatprep.subr.bf16.mxu1 %v8868_v19  ;;  %v8955_v18 = vld [vmem:[%s12015_s1 + $0x1724] ss:$16 sps:$4 sm:$0xff]   ;;  %v8958_v19 = vld [vmem:[%s12015_s1 + $0x172c] ss:$16 sps:$4 sm:$0xff]  }
 0x2ab   :  { %5434 = vmatpush1.bf16.msra.mxu0 %v8863_v20  ;;  %5967 = vmatpush1.bf16.msra.mxu1 %v8866_v21  ;;  %v8953_v20 = vld [vmem:[%s12015_s1 + $0x1720] ss:$16 sps:$4 sm:$0xff]   ;;  %v8956_v21 = vld [vmem:[%s12015_s1 + $0x1728] ss:$16 sps:$4 sm:$0xff]  }
 0x2ac   :  { %5435 = vmatprep.subr.bf16.mxu0 %v8871_v22  ;;  %5968 = vmatprep.subr.bf16.mxu1 %v8874_v23  ;;  %v8961_v22 = vld [vmem:[%s12015_s1 + $0x1744] ss:$16 sps:$4 sm:$0xff]   ;;  %v8964_v23 = vld [vmem:[%s12015_s1 + $0x174c] ss:$16 sps:$4 sm:$0xff]  }
 0x2af   :  { %5436 = vmatpush1.bf16.msra.mxu0 %v8869_v24  ;;  %5969 = vmatpush1.bf16.msra.mxu1 %v8872_v25  ;;  %v8959_v24 = vld [vmem:[%s12015_s1 + $0x1740] ss:$16 sps:$4 sm:$0xff]   ;;  %v8962_v25 = vld [vmem:[%s12015_s1 + $0x1748] ss:$16 sps:$4 sm:$0xff]  }
 0x2b0   :  { %5437 = vmatprep.subr.bf16.mxu0 %v8877_v26  ;;  %5970 = vmatprep.subr.bf16.mxu1 %v8880_v27  ;;  %v8967_v26 = vld [vmem:[%s12015_s1 + $0x1764] ss:$16 sps:$4 sm:$0xff]   ;;  %v8970_v27 = vld [vmem:[%s12015_s1 + $0x176c] ss:$16 sps:$4 sm:$0xff]  }
 0x2b3   :  { %5438 = vmatpush1.bf16.msra.mxu0 %v8875_v28  ;;  %5971 = vmatpush1.bf16.msra.mxu1 %v8878_v29  ;;  %v8965_v28 = vld [vmem:[%s12015_s1 + $0x1760] ss:$16 sps:$4 sm:$0xff]   ;;  %v8968_v29 = vld [vmem:[%s12015_s1 + $0x1768] ss:$16 sps:$4 sm:$0xff]  }
 0x2b4   :  { %5439 = vmatprep.subr.bf16.mxu0 %v8883_v30  ;;  %5972 = vmatprep.subr.bf16.mxu1 %v8886_v31  ;;  %v8973_v30 = vld [vmem:[%s12015_s1 + $0x1784] ss:$16 sps:$4 sm:$0xff]   ;;  %v8976_v31 = vld [vmem:[%s12015_s1 + $0x178c] ss:$16 sps:$4 sm:$0xff]  }
 0x2b7   :  { %5440 = vmatpush1.bf16.msra.mxu0 %v8881_v32  ;;  %5973 = vmatpush1.bf16.msra.mxu1 %v8884_v33  ;;  %v8971_v32 = vld [vmem:[%s12015_s1 + $0x1780] ss:$16 sps:$4 sm:$0xff]   ;;  %v8974_v33 = vld [vmem:[%s12015_s1 + $0x1788] ss:$16 sps:$4 sm:$0xff]  }
 0x2b8   :  { %5441 = vmatprep.subr.bf16.mxu0 %v8889_v34  ;;  %5974 = vmatprep.subr.bf16.mxu1 %v8892_v35  ;;  %v8979_v34 = vld [vmem:[%s12015_s1 + $0x17a4] ss:$16 sps:$4 sm:$0xff]   ;;  %v8982_v35 = vld [vmem:[%s12015_s1 + $0x17ac] ss:$16 sps:$4 sm:$0xff]  }
 0x2bb   :  { %5442 = vmatpush1.bf16.msra.mxu0 %v8887_v36  ;;  %5975 = vmatpush1.bf16.msra.mxu1 %v8890_v37  ;;  %v8977_v36 = vld [vmem:[%s12015_s1 + $0x17a0] ss:$16 sps:$4 sm:$0xff]   ;;  %v8980_v37 = vld [vmem:[%s12015_s1 + $0x17a8] ss:$16 sps:$4 sm:$0xff]  }
 0x2bc   :  { %5443 = vmatprep.subr.bf16.mxu0 %v8895_v38  ;;  %5976 = vmatprep.subr.bf16.mxu1 %v8898_v39  ;;  %v8985_v38 = vld [vmem:[%s12015_s1 + $0x17c4] ss:$16 sps:$4 sm:$0xff]   ;;  %v8988_v39 = vld [vmem:[%s12015_s1 + $0x17cc] ss:$16 sps:$4 sm:$0xff]  }
 0x2bf   :  { %5444 = vmatpush1.bf16.msra.mxu0 %v8893_v40  ;;  %5977 = vmatpush1.bf16.msra.mxu1 %v8896_v41  ;;  %v8983_v40 = vld [vmem:[%s12015_s1 + $0x17c0] ss:$16 sps:$4 sm:$0xff]   ;;  %v8986_v41 = vld [vmem:[%s12015_s1 + $0x17c8] ss:$16 sps:$4 sm:$0xff]  }
 0x2c0   :  { %5454 = vmatprep.subr.bf16.mxu0 %v8901_v42  ;;  %5987 = vmatprep.subr.bf16.mxu1 %v8904_v43  ;;  %v8991_v42 = vld [vmem:[%s12015_s1 + $0x17e4] ss:$16 sps:$4 sm:$0xff]   ;;  %v8994_v43 = vld [vmem:[%s12015_s1 + $0x17ec] ss:$16 sps:$4 sm:$0xff]  }
 0x2c2   :  { %5446 = vmatmul.mubr.bf16.vlgmr.msra.gmra.mrb[0].mxu0 %v75_v48  ;;  %5979 = vmatmul.mubr.bf16.vlgmr.msra.gmra.mrb[0].mxu1 %v75_v48  ;;  %v9000_v48 = vld [vmem:[%s12015_s1 + $0x180c] ss:$16 sps:$4 sm:$0xff]  }
 0x2c3   :  { %5455 = vmatpush1.bf16.msra.mxu0 %v8899_v46  ;;  %5988 = vmatpush1.bf16.msra.mxu1 %v8902_v47  ;;  %v51_v46 = vld [vmem:[%s12016_s0 + $0xb0] sm:$0xff] }
 0x2c4   :  { %5456 = vmatprep.subr.bf16.mxu0 %v8907_v49  ;;  %5989 = vmatprep.subr.bf16.mxu1 %v8910_v50  ;;  %v8997_v47 = vld [vmem:[%s12015_s1 + $0x1804] ss:$16 sps:$4 sm:$0xff]   ;;  %v77_v49 = vpack.c.bf16 %v51_v46, %v51_v46  ;;  %v54_v50 = vld [vmem:[%s12016_s0 + $0xc8] sm:$0xff]  ;;  %v9073_v46 = vld [vmem:[%s12017_s3 + $0x30] ss:$12 sps:$4 sm:$0xff]  }
 0x2c5   :  { %5486 = vmatprep.mubr.bf16.mxu0 %v78_v53  ;;  %6019 = vmatprep.mubr.bf16.mxu1 %v78_v53  ;;  %v9003_v53 = vld [vmem:[%s12015_s1 + $0x1824] ss:$16 sps:$4 sm:$0xff]  }
 0x2c7   :  { %5457 = vmatpush1.bf16.msra.mxu0 %v8905_v51  ;;  %5990 = vmatpush1.bf16.msra.mxu1 %v8908_v52  ;;  %v8995_v51 = vld [vmem:[%s12015_s1 + $0x1800] ss:$16 sps:$4 sm:$0xff]   ;;  %v8998_v52 = vld [vmem:[%s12015_s1 + $0x1808] ss:$16 sps:$4 sm:$0xff]  }
 0x2c8   :  { %5458 = vmatprep.subr.bf16.mxu0 %v8913_v54  ;;  %5991 = vmatprep.subr.bf16.mxu1 %v8916_v55  ;;  %v9006_v54 = vld [vmem:[%s12015_s1 + $0x182c] ss:$16 sps:$4 sm:$0xff]   ;;  %v80_v55 = vpack.c.bf16 %v54_v50, %v54_v50  ;;  %v9076_v50 = vld [vmem:[%s12017_s3 + $0x48] ss:$12 sps:$4 sm:$0xff]  }
 0x2cb   :  { %5459 = vmatpush1.bf16.msra.mxu0 %v8911_v56  ;;  %5992 = vmatpush1.bf16.msra.mxu1 %v8914_v57  ;;  %v9001_v56 = vld [vmem:[%s12015_s1 + $0x1820] ss:$16 sps:$4 sm:$0xff]   ;;  %v9004_v57 = vld [vmem:[%s12015_s1 + $0x1828] ss:$16 sps:$4 sm:$0xff]  }
 0x2cc   :  { %5460 = vmatprep.subr.bf16.mxu0 %v8919_v58  ;;  %5993 = vmatprep.subr.bf16.mxu1 %v8922_v59  ;;  %v9009_v58 = vld [vmem:[%s12015_s1 + $0x1844] ss:$16 sps:$4 sm:$0xff]   ;;  %v9012_v59 = vld [vmem:[%s12015_s1 + $0x184c] ss:$16 sps:$4 sm:$0xff]  }
 0x2cf   :  { %5461 = vmatpush1.bf16.msra.mxu0 %v8917_v60  ;;  %5994 = vmatpush1.bf16.msra.mxu1 %v8920_v61  ;;  %v9007_v60 = vld [vmem:[%s12015_s1 + $0x1840] ss:$16 sps:$4 sm:$0xff]   ;;  %v9010_v61 = vld [vmem:[%s12015_s1 + $0x1848] ss:$16 sps:$4 sm:$0xff]  }
 0x2d0   :  { %5462 = vmatprep.subr.bf16.mxu0 %v8925_v62  ;;  %5995 = vmatprep.subr.bf16.mxu1 %v8928_v63  ;;  %v9015_v62 = vld [vmem:[%s12015_s1 + $0x1864] ss:$16 sps:$4 sm:$0xff]   ;;  %v9018_v63 = vld [vmem:[%s12015_s1 + $0x186c] ss:$16 sps:$4 sm:$0xff]  }
 0x2d3   :  { %5463 = vmatpush1.bf16.msra.mxu0 %v8923_v0  ;;  %5996 = vmatpush1.bf16.msra.mxu1 %v8926_v1  ;;  %v9013_v0 = vld [vmem:[%s12015_s1 + $0x1860] ss:$16 sps:$4 sm:$0xff]   ;;  %v9016_v1 = vld [vmem:[%s12015_s1 + $0x1868] ss:$16 sps:$4 sm:$0xff]  }
 0x2d4   :  { %5464 = vmatprep.subr.bf16.mxu0 %v8931_v2  ;;  %5997 = vmatprep.subr.bf16.mxu1 %v8934_v3  ;;  %v9021_v2 = vld [vmem:[%s12015_s1 + $0x1884] ss:$16 sps:$4 sm:$0xff]   ;;  %v9024_v3 = vld [vmem:[%s12015_s1 + $0x188c] ss:$16 sps:$4 sm:$0xff]  }
 0x2d7   :  { %5465 = vmatpush1.bf16.msra.mxu0 %v8929_v4  ;;  %5998 = vmatpush1.bf16.msra.mxu1 %v8932_v5  ;;  %v9019_v4 = vld [vmem:[%s12015_s1 + $0x1880] ss:$16 sps:$4 sm:$0xff]   ;;  %v9022_v5 = vld [vmem:[%s12015_s1 + $0x1888] ss:$16 sps:$4 sm:$0xff]  }
 0x2d8   :  { %5466 = vmatprep.subr.bf16.mxu0 %v8937_v6  ;;  %5999 = vmatprep.subr.bf16.mxu1 %v8940_v7  ;;  %v9027_v6 = vld [vmem:[%s12015_s1 + $0x18a4] ss:$16 sps:$4 sm:$0xff]   ;;  %v9030_v7 = vld [vmem:[%s12015_s1 + $0x18ac] ss:$16 sps:$4 sm:$0xff]  }
 0x2db   :  { %5467 = vmatpush1.bf16.msra.mxu0 %v8935_v8  ;;  %6000 = vmatpush1.bf16.msra.mxu1 %v8938_v9  ;;  %v9025_v8 = vld [vmem:[%s12015_s1 + $0x18a0] ss:$16 sps:$4 sm:$0xff]   ;;  %v9028_v9 = vld [vmem:[%s12015_s1 + $0x18a8] ss:$16 sps:$4 sm:$0xff]  }
 0x2dc   :  { %5468 = vmatprep.subr.bf16.mxu0 %v8943_v10  ;;  %6001 = vmatprep.subr.bf16.mxu1 %v8946_v11  ;;  %v9033_v10 = vld [vmem:[%s12015_s1 + $0x18c4] ss:$16 sps:$4 sm:$0xff]   ;;  %v9036_v11 = vld [vmem:[%s12015_s1 + $0x18cc] ss:$16 sps:$4 sm:$0xff]  }
 0x2df   :  { %5469 = vmatpush1.bf16.msra.mxu0 %v8941_v12  ;;  %6002 = vmatpush1.bf16.msra.mxu1 %v8944_v13  ;;  %v9031_v12 = vld [vmem:[%s12015_s1 + $0x18c0] ss:$16 sps:$4 sm:$0xff]   ;;  %v9034_v13 = vld [vmem:[%s12015_s1 + $0x18c8] ss:$16 sps:$4 sm:$0xff]  }
 0x2e0   :  { %5470 = vmatprep.subr.bf16.mxu0 %v8949_v14  ;;  %6003 = vmatprep.subr.bf16.mxu1 %v8952_v15  ;;  %v9039_v14 = vld [vmem:[%s12015_s1 + $0x18e4] ss:$16 sps:$4 sm:$0xff]   ;;  %v9042_v15 = vld [vmem:[%s12015_s1 + $0x18ec] ss:$16 sps:$4 sm:$0xff]  }
 0x2e3   :  { %5471 = vmatpush1.bf16.msra.mxu0 %v8947_v16  ;;  %6004 = vmatpush1.bf16.msra.mxu1 %v8950_v17  ;;  %v9037_v16 = vld [vmem:[%s12015_s1 + $0x18e0] ss:$16 sps:$4 sm:$0xff]   ;;  %v9040_v17 = vld [vmem:[%s12015_s1 + $0x18e8] ss:$16 sps:$4 sm:$0xff]  }
 0x2e4   :  { %5472 = vmatprep.subr.bf16.mxu0 %v8955_v18  ;;  %6005 = vmatprep.subr.bf16.mxu1 %v8958_v19  ;;  %v9045_v18 = vld [vmem:[%s12015_s1 + $0x1904] ss:$16 sps:$4 sm:$0xff]   ;;  %v9048_v19 = vld [vmem:[%s12015_s1 + $0x190c] ss:$16 sps:$4 sm:$0xff]  }
 0x2e7   :  { %5473 = vmatpush1.bf16.msra.mxu0 %v8953_v20  ;;  %6006 = vmatpush1.bf16.msra.mxu1 %v8956_v21  ;;  %v9043_v20 = vld [vmem:[%s12015_s1 + $0x1900] ss:$16 sps:$4 sm:$0xff]   ;;  %v9046_v21 = vld [vmem:[%s12015_s1 + $0x1908] ss:$16 sps:$4 sm:$0xff]  }
 0x2e8   :  { %5474 = vmatprep.subr.bf16.mxu0 %v8961_v22  ;;  %6007 = vmatprep.subr.bf16.mxu1 %v8964_v23  ;;  %v9051_v22 = vld [vmem:[%s12015_s1 + $0x1924] ss:$16 sps:$4 sm:$0xff]   ;;  %v9054_v23 = vld [vmem:[%s12015_s1 + $0x192c] ss:$16 sps:$4 sm:$0xff]  }
 0x2eb   :  { %5475 = vmatpush1.bf16.msra.mxu0 %v8959_v24  ;;  %6008 = vmatpush1.bf16.msra.mxu1 %v8962_v25  ;;  %v9049_v24 = vld [vmem:[%s12015_s1 + $0x1920] ss:$16 sps:$4 sm:$0xff]   ;;  %v9052_v25 = vld [vmem:[%s12015_s1 + $0x1928] ss:$16 sps:$4 sm:$0xff]  }
 0x2ec   :  { %5476 = vmatprep.subr.bf16.mxu0 %v8967_v26  ;;  %6009 = vmatprep.subr.bf16.mxu1 %v8970_v27  ;;  %v9057_v26 = vld [vmem:[%s12015_s1 + $0x1944] ss:$16 sps:$4 sm:$0xff]   ;;  %v9060_v27 = vld [vmem:[%s12015_s1 + $0x194c] ss:$16 sps:$4 sm:$0xff]  }
 0x2ef   :  { %5477 = vmatpush1.bf16.msra.mxu0 %v8965_v28  ;;  %6010 = vmatpush1.bf16.msra.mxu1 %v8968_v29  ;;  %v9055_v28 = vld [vmem:[%s12015_s1 + $0x1940] ss:$16 sps:$4 sm:$0xff]   ;;  %v9058_v29 = vld [vmem:[%s12015_s1 + $0x1948] ss:$16 sps:$4 sm:$0xff]  }
 0x2f0   :  { %5478 = vmatprep.subr.bf16.mxu0 %v8973_v30  ;;  %6011 = vmatprep.subr.bf16.mxu1 %v8976_v31  ;;  %v9063_v30 = vld [vmem:[%s12015_s1 + $0x1964] ss:$16 sps:$4 sm:$0xff]   ;;  %v9066_v31 = vld [vmem:[%s12015_s1 + $0x196c] ss:$16 sps:$4 sm:$0xff]  }
 0x2f3   :  { %5479 = vmatpush1.bf16.msra.mxu0 %v8971_v32  ;;  %6012 = vmatpush1.bf16.msra.mxu1 %v8974_v33  ;;  %v9061_v32 = vld [vmem:[%s12015_s1 + $0x1960] ss:$16 sps:$4 sm:$0xff]   ;;  %v9064_v33 = vld [vmem:[%s12015_s1 + $0x1968] ss:$16 sps:$4 sm:$0xff]  }
 0x2f4   :  { %5480 = vmatprep.subr.bf16.mxu0 %v8979_v34  ;;  %6013 = vmatprep.subr.bf16.mxu1 %v8982_v35  ;;  %v53_v34 = vld [vmem:[%s12016_s0 + $0xc0] sm:$0xff] }
 0x2f5   :  { %v9069_v35 = vld [vmem:[%s12017_s3 + $0x4] ss:$12 sps:$4 sm:$0xff]  }
 0x2f7   :  { %5481 = vmatpush1.bf16.msra.mxu0 %v8977_v36  ;;  %6014 = vmatpush1.bf16.msra.mxu1 %v8980_v37  ;;  %v9094_v36 = vld [vmem:[%s12017_s3 + $0xc8] ss:$12 sps:$4 sm:$0xff]   ;;  %v79_v37 = vpack.c.bf16 %v53_v34, %v53_v34 }
 0x2f8   :  { %5482 = vmatprep.subr.bf16.mxu0 %v8985_v38  ;;  %6015 = vmatprep.subr.bf16.mxu1 %v8988_v39  ;;  %v9067_v38 = vld [vmem:[%s12017_s3] ss:$12 sps:$4 sm:$0xff]   ;;  %v9095_v39 = vld [vmem:[%s12017_s3 + $0x8] ss:$12 sps:$4 sm:$0xff]  }
 0x2fb   :  { %5483 = vmatpush1.bf16.msra.mxu0 %v8983_v40  ;;  %6016 = vmatpush1.bf16.msra.mxu1 %v8986_v41  ;;  %v9072_v40 = vld [vmem:[%s12017_s3 + $0x1c] ss:$12 sps:$4 sm:$0xff]   ;;  %v9099_v41 = vld [vmem:[%s12017_s3 + $0xe0] ss:$12 sps:$4 sm:$0xff]  }
 0x2fc   :  { %5484 = vmatprep.subr.bf16.mxu0 %v8991_v42  ;;  %6017 = vmatprep.subr.bf16.mxu1 %v8994_v43  ;;  %v9070_v42 = vld [vmem:[%s12017_s3 + $0x18] ss:$12 sps:$4 sm:$0xff]   ;;  %v9100_v43 = vld [vmem:[%s12017_s3 + $0x20] ss:$12 sps:$4 sm:$0xff]  }
 0x2ff   :  { %5485 = vmatpush1.bf16.msra.mxu0 %v8989_v44  ;;  %6018 = vmatpush1.bf16.msra.mxu1 %v8992_v45  ;;  %v9075_v44 = vld [vmem:[%s12017_s3 + $0x34] ss:$12 sps:$4 sm:$0xff]   ;;  %v9104_v45 = vld [vmem:[%s12017_s3 + $0xf8] ss:$12 sps:$4 sm:$0xff]  }
 0x300   :  { %5495 = vmatprep.subr.bf16.mxu0 %v8997_v47  ;;  %6028 = vmatprep.subr.bf16.mxu1 %v9000_v48  ;;  %v9105_v47 = vld [vmem:[%s12017_s3 + $0x38] ss:$12 sps:$4 sm:$0xff]  }
 0x301   :  { %v9078_v48 = vld [vmem:[%s12017_s3 + $0x4c] ss:$12 sps:$4 sm:$0xff]  }
 0x302   :  { %5487 = vmatmul.mubr.bf16.vlgmr.msra.gmra.mrb[0].mxu0 %v77_v49  ;;  %6020 = vmatmul.mubr.bf16.vlgmr.msra.gmra.mrb[0].mxu1 %v77_v49  ;;  %v9109_v49 = vld [vmem:[%s12017_s3 + $0x110] ss:$12 sps:$4 sm:$0xff]  }
 0x303   :  { %5496 = vmatpush1.bf16.msra.mxu0 %v8995_v51  ;;  %6029 = vmatpush1.bf16.msra.mxu1 %v8998_v52  ;;  %v9110_v51 = vld [vmem:[%s12017_s3 + $0x50] ss:$12 sps:$4 sm:$0xff]  }
 0x304   :  { %5497 = vmatprep.subr.bf16.mxu0 %v9003_v53  ;;  %6030 = vmatprep.subr.bf16.mxu1 %v9006_v54  ;;  %v9081_v52 = vld [vmem:[%s12017_s3 + $0x64] ss:$12 sps:$4 sm:$0xff]   ;;  %v9114_v53 = vld [vmem:[%s12017_s3 + $0x128] ss:$12 sps:$4 sm:$0xff]   ;;  %v9079_v54 = vld [vmem:[%s12017_s3 + $0x60] ss:$12 sps:$4 sm:$0xff]  }
 0x305   :  { %7634 = vmatprep.mubr.msk.bf16.mxu0 %vm4999_vm0, %v80_v55  ;;  %7635 = vmatprep.mubr.msk.bf16.mxu1 %vm4999_vm0, %v80_v55  ;;  %v9115_v55 = vld [vmem:[%s12017_s3 + $0x68] ss:$12 sps:$4 sm:$0xff]  }
 0x307   :  { %5498 = vmatpush1.bf16.msra.mxu0 %v9001_v56  ;;  %6031 = vmatpush1.bf16.msra.mxu1 %v9004_v57  ;;  %v9084_v56 = vld [vmem:[%s12017_s3 + $0x7c] ss:$12 sps:$4 sm:$0xff]   ;;  %v9119_v57 = vld [vmem:[%s12017_s3 + $0x140] ss:$12 sps:$4 sm:$0xff]  }
 0x308   :  { %5499 = vmatprep.subr.bf16.mxu0 %v9009_v58  ;;  %6032 = vmatprep.subr.bf16.mxu1 %v9012_v59  ;;  %v9082_v58 = vld [vmem:[%s12017_s3 + $0x78] ss:$12 sps:$4 sm:$0xff]   ;;  %v9120_v59 = vld [vmem:[%s12017_s3 + $0x80] ss:$12 sps:$4 sm:$0xff]  }
 0x30b   :  { %5500 = vmatpush1.bf16.msra.mxu0 %v9007_v60  ;;  %6033 = vmatpush1.bf16.msra.mxu1 %v9010_v61  ;;  %v9087_v60 = vld [vmem:[%s12017_s3 + $0x94] ss:$12 sps:$4 sm:$0xff]   ;;  %v9085_v61 = vld [vmem:[%s12017_s3 + $0x90] ss:$12 sps:$4 sm:$0xff]  }
 0x30c   :  { %5501 = vmatprep.subr.bf16.mxu0 %v9015_v62  ;;  %6034 = vmatprep.subr.bf16.mxu1 %v9018_v63  ;;  %v9090_v62 = vld [vmem:[%s12017_s3 + $0xac] ss:$12 sps:$4 sm:$0xff]   ;;  %v9088_v63 = vld [vmem:[%s12017_s3 + $0xa8] ss:$12 sps:$4 sm:$0xff]  }
 0x30f   :  { %5502 = vmatpush1.bf16.msra.mxu0 %v9013_v0  ;;  %6035 = vmatpush1.bf16.msra.mxu1 %v9016_v1  ;;  %v9093_v0 = vld [vmem:[%s12017_s3 + $0xc4] ss:$12 sps:$4 sm:$0xff]   ;;  %v9091_v1 = vld [vmem:[%s12017_s3 + $0xc0] ss:$12 sps:$4 sm:$0xff]  }
 0x310   :  { %5503 = vmatprep.subr.bf16.mxu0 %v9021_v2  ;;  %6036 = vmatprep.subr.bf16.mxu1 %v9024_v3  ;;  %v9098_v2 = vld [vmem:[%s12017_s3 + $0xdc] ss:$12 sps:$4 sm:$0xff]   ;;  %v9096_v3 = vld [vmem:[%s12017_s3 + $0xd8] ss:$12 sps:$4 sm:$0xff]  }
 0x313   :  { %5504 = vmatpush1.bf16.msra.mxu0 %v9019_v4  ;;  %6037 = vmatpush1.bf16.msra.mxu1 %v9022_v5  ;;  %v9103_v4 = vld [vmem:[%s12017_s3 + $0xf4] ss:$12 sps:$4 sm:$0xff]   ;;  %v9101_v5 = vld [vmem:[%s12017_s3 + $0xf0] ss:$12 sps:$4 sm:$0xff]  }
 0x314   :  { %5505 = vmatprep.subr.bf16.mxu0 %v9027_v6  ;;  %6038 = vmatprep.subr.bf16.mxu1 %v9030_v7  ;;  %v9108_v6 = vld [vmem:[%s12017_s3 + $0x10c] ss:$12 sps:$4 sm:$0xff]   ;;  %v9106_v7 = vld [vmem:[%s12017_s3 + $0x108] ss:$12 sps:$4 sm:$0xff]  }
 0x317   :  { %5506 = vmatpush1.bf16.msra.mxu0 %v9025_v8  ;;  %6039 = vmatpush1.bf16.msra.mxu1 %v9028_v9  ;;  %v9113_v8 = vld [vmem:[%s12017_s3 + $0x124] ss:$12 sps:$4 sm:$0xff]   ;;  %v9111_v9 = vld [vmem:[%s12017_s3 + $0x120] ss:$12 sps:$4 sm:$0xff]  }
 0x318   :  { %5507 = vmatprep.subr.bf16.mxu0 %v9033_v10  ;;  %6040 = vmatprep.subr.bf16.mxu1 %v9036_v11  ;;  %v9118_v10 = vld [vmem:[%s12017_s3 + $0x13c] ss:$12 sps:$4 sm:$0xff]   ;;  %v9116_v11 = vld [vmem:[%s12017_s3 + $0x138] ss:$12 sps:$4 sm:$0xff]  }
 0x31b   :  { %5508 = vmatpush1.bf16.msra.mxu0 %v9031_v12  ;;  %6041 = vmatpush1.bf16.msra.mxu1 %v9034_v13  ;;  %v9123_v12 = vld [vmem:[%s12017_s3 + $0x154] ss:$12 sps:$4 sm:$0xff]   ;;  %v9124_v13 = vld [vmem:[%s12017_s3 + $0x158] ss:$12 sps:$4 sm:$0xff]  }
 0x31c   :  { %5509 = vmatprep.subr.bf16.mxu0 %v9039_v14  ;;  %6042 = vmatprep.subr.bf16.mxu1 %v9042_v15  ;;  %v9121_v14 = vld [vmem:[%s12017_s3 + $0x150] ss:$12 sps:$4 sm:$0xff]   ;;  %v9125_v15 = vld [vmem:[%s12017_s3 + $0x98] ss:$12 sps:$4 sm:$0xff]  }
 0x31f   :  { %5510 = vmatpush1.bf16.msra.mxu0 %v9037_v16  ;;  %6043 = vmatpush1.bf16.msra.mxu1 %v9040_v17  ;;  %v9128_v16 = vld [vmem:[%s12017_s3 + $0x16c] ss:$12 sps:$4 sm:$0xff]   ;;  %v9129_v17 = vld [vmem:[%s12017_s3 + $0x170] ss:$12 sps:$4 sm:$0xff]  }
 0x320   :  { %5511 = vmatprep.subr.bf16.mxu0 %v9045_v18  ;;  %6044 = vmatprep.subr.bf16.mxu1 %v9048_v19  ;;  %v9126_v18 = vld [vmem:[%s12017_s3 + $0x168] ss:$12 sps:$4 sm:$0xff]   ;;  %v9130_v19 = vld [vmem:[%s12017_s3 + $0xb0] ss:$12 sps:$4 sm:$0xff]  }
 0x323   :  { %5512 = vmatpush1.bf16.msra.mxu0 %v9043_v20  ;;  %6045 = vmatpush1.bf16.msra.mxu1 %v9046_v21  ;;  %v9133_v20 = vld [vmem:[%s12017_s3 + $0x184] ss:$12 sps:$4 sm:$0xff]   ;;  %v9169_v21 = vmov 0  }
 0x324   :  { %5513 = vmatprep.subr.bf16.mxu0 %v9051_v22  ;;  %6046 = vmatprep.subr.bf16.mxu1 %v9054_v23  ;;  %v899_v22 = vlaneseq }
 0x326   :  { %v11884_v23 = vshrl.u32 %v899_v22, 7 }
 0x327   :  { %5514 = vmatpush1.bf16.msra.mxu0 %v9049_v24  ;;  %6047 = vmatpush1.bf16.msra.mxu1 %v9052_v25  ;;  %v11892_v25 = vld [vmem:[%s12018_s2] sm:$0xf] }
 0x328   :  { %5515 = vmatprep.subr.bf16.mxu0 %v9057_v26  ;;  %6048 = vmatprep.subr.bf16.mxu1 %v9060_v27  ;;  %v11887_v24 = vsub.s32 0, %v11884_v23  ;;  %v11895_v26 = vsub.s32 1, %v11884_v23  ;;  %v913_v27 = vsub.s32 3, %v11884_v23 }
 0x32b   :  { %5516 = vmatpush1.bf16.msra.mxu0 %v9055_v28  ;;  %6049 = vmatpush1.bf16.msra.mxu1 %v9058_v29  ;;  %v902_v28 = vrot.slane %v11892_v25, %v11887_v24  ;;  %v906_v29 = vrot.slane %v11892_v25, %v11895_v26 }
 0x32c   :  { %5517 = vmatprep.subr.bf16.mxu0 %v9063_v30  ;;  %6050 = vmatprep.subr.bf16.mxu1 %v9066_v31  ;;  %v914_v30 = vrot.slane %v11892_v25, %v913_v27 }
 0x32f   :  { %5518 = vmatpush1.bf16.msra.mxu0 %v9061_v32  ;;  %6051 = vmatpush1.bf16.msra.mxu1 %v9064_v33 }
 0x330   :  { %6606 = vmatprep.subr.bf16.mxu0 %v9069_v35  ;;  %7714 = vmatprep.subr.bf16.mxu1 %v9094_v36 }
 0x332   :  { %5528 = vmatmul.mubr.bf16.vlgmr.msra.gmra.mrb[0].mxu0 %v79_v37  ;;  %6061 = vmatmul.mubr.bf16.vlgmr.msra.gmra.mrb[0].mxu1 %v79_v37 }
 0x333   :  { %6607 = vmatpush1.bf16.msra.mxu0 %v9067_v38  ;;  %7715 = vmatpush3.bf16.msra.mxu1 %v9095_v39 }
 0x334   :  { %6608 = vmatprep.subr.bf16.mxu0 %v9072_v40  ;;  %7716 = vmatprep.subr.bf16.mxu1 %v9099_v41 }
 0x337   :  { %6609 = vmatpush1.bf16.msra.mxu0 %v9070_v42  ;;  %7717 = vmatpush3.bf16.msra.mxu1 %v9100_v43 }
 0x338   :  { %6610 = vmatprep.subr.bf16.mxu0 %v9075_v44  ;;  %7718 = vmatprep.subr.bf16.mxu1 %v9104_v45 }
 0x33b   :  { %6611 = vmatpush1.bf16.msra.mxu0 %v9073_v46  ;;  %7719 = vmatpush3.bf16.msra.mxu1 %v9105_v47 }
 0x33c   :  { %6612 = vmatprep.subr.bf16.mxu0 %v9078_v48  ;;  %7720 = vmatprep.subr.bf16.mxu1 %v9109_v49  ;;  %v9131_v49 = vld [vmem:[%s12017_s3 + $0x180] ss:$12 sps:$4 sm:$0xff]  }
 0x33f   :  { %6613 = vmatpush1.bf16.msra.mxu0 %v9076_v50  ;;  %7721 = vmatpush3.bf16.msra.mxu1 %v9110_v51  ;;  %v9134_v50 = vld [vmem:[%s12017_s3 + $0x188] ss:$12 sps:$4 sm:$0xff]  }
 0x340   :  { %6614 = vmatprep.subr.bf16.mxu0 %v9081_v52  ;;  %7722 = vmatprep.subr.bf16.mxu1 %v9114_v53  ;;  %v9137_v52 = vld [vmem:[%s12017_s3 + $0x19c] ss:$12 sps:$4 sm:$0xff]  }
 0x343   :  { %6615 = vmatpush1.bf16.msra.mxu0 %v9079_v54  ;;  %7723 = vmatpush3.bf16.msra.mxu1 %v9115_v55  ;;  %v9135_v54 = vld [vmem:[%s12017_s3 + $0x198] ss:$12 sps:$4 sm:$0xff]   ;;  %v9138_v55 = vld [vmem:[%s12017_s3 + $0x1a0] ss:$12 sps:$4 sm:$0xff]  }
 0x344   :  { %6616 = vmatprep.subr.bf16.mxu0 %v9084_v56  ;;  %7724 = vmatprep.subr.bf16.mxu1 %v9119_v57  ;;  %v9141_v56 = vld [vmem:[%s12017_s3 + $0x1b4] ss:$12 sps:$4 sm:$0xff]   ;;  %v9139_v57 = vld [vmem:[%s12017_s3 + $0x1b0] ss:$12 sps:$4 sm:$0xff]  }
 0x347   :  { %6617 = vmatpush1.bf16.msra.mxu0 %v9082_v58  ;;  %7725 = vmatpush3.bf16.msra.mxu1 %v9120_v59  ;;  %v9142_v58 = vld [vmem:[%s12017_s3 + $0x1b8] ss:$12 sps:$4 sm:$0xff]  }
 0x348   :  { %6618 = vmatprep.subr.bf16.mxu0 %v9087_v60  ;;  %7726 = vmatprep.subr.bf16.mxu1 %v9124_v13  ;;  %v9145_v59 = vld [vmem:[%s12017_s3 + $0x1cc] ss:$12 sps:$4 sm:$0xff]   ;;  %v9143_v60 = vld [vmem:[%s12017_s3 + $0x1c8] ss:$12 sps:$4 sm:$0xff]   ;;  %v9165_v13 = vld [vmem:[%s12017_s3 + $0x244] ss:$12 sps:$4 sm:$0xff]  }
 0x34b   :  { %6619 = vmatpush1.bf16.msra.mxu0 %v9085_v61  ;;  %7727 = vmatpush3.bf16.msra.mxu1 %v9125_v15  ;;  %v9146_v61 = vld [vmem:[%s12017_s3 + $0x1d0] ss:$12 sps:$4 sm:$0xff]   ;;  %v9163_v15 = vld [vmem:[%s12017_s3 + $0x240] ss:$12 sps:$4 sm:$0xff]  }
 0x34c   :  { %6620 = vmatprep.subr.bf16.mxu0 %v9090_v62  ;;  %7728 = vmatprep.subr.bf16.mxu1 %v9129_v17  ;;  %v9149_v62 = vld [vmem:[%s12017_s3 + $0x1e4] ss:$12 sps:$4 sm:$0xff]  }
 0x34f   :  { %6621 = vmatpush1.bf16.msra.mxu0 %v9088_v63  ;;  %7729 = vmatpush3.bf16.msra.mxu1 %v9130_v19  ;;  %v9147_v63 = vld [vmem:[%s12017_s3 + $0x1e0] ss:$12 sps:$4 sm:$0xff]   ;;  %v12_v19 = vstv %s12019_s6 }
 0x350   :  { %6622 = vmatprep.subr.bf16.mxu0 %v9093_v0  ;;  %6728 = vmatprep.subr.bf16.mxu1 %v9169_v21  ;;  %v9150_v0 = vld [vmem:[%s12017_s3 + $0x1e8] ss:$12 sps:$4 sm:$0xff]   ;;  %13 = vst [vmem:[#allocation2] sm:$0x1] %v12_v19 }
 0x353   :  { %6623 = vmatpush1.bf16.msra.mxu0 %v9091_v1  ;;  %v9153_v1 = vld [vmem:[%s12017_s3 + $0x1fc] ss:$12 sps:$4 sm:$0xff]  }
 0x354   :  { %6624 = vmatprep.subr.bf16.mxu0 %v9098_v2  ;;  %v11955_v2 = vsub.s32 2, %v11884_v23 }
 0x357   :  { %6625 = vmatpush1.bf16.msra.mxu0 %v9096_v3  ;;  %v9151_v3 = vld [vmem:[%s12017_s3 + $0x1f8] ss:$12 sps:$4 sm:$0xff]  }
 0x358   :  { %6626 = vmatprep.subr.bf16.mxu0 %v9103_v4  ;;  %v9154_v4 = vld [vmem:[%s12017_s3 + $0x200] ss:$12 sps:$4 sm:$0xff]  }
 0x35b   :  { %6627 = vmatpush1.bf16.msra.mxu0 %v9101_v5  ;;  %v9157_v5 = vld [vmem:[%s12017_s3 + $0x214] ss:$12 sps:$4 sm:$0xff]  }
 0x35c   :  { %6628 = vmatprep.subr.bf16.mxu0 %v9108_v6  ;;  %v910_v6 = vrot.slane %v11892_v25, %v11955_v2 }
 0x35f   :  { %6629 = vmatpush1.bf16.msra.mxu0 %v9106_v7  ;;  %v9155_v7 = vld [vmem:[%s12017_s3 + $0x210] ss:$12 sps:$4 sm:$0xff]  }
 0x360   :  { %6630 = vmatprep.subr.bf16.mxu0 %v9113_v8  ;;  %v9158_v8 = vld [vmem:[%s12017_s3 + $0x218] ss:$12 sps:$4 sm:$0xff]  }
 0x363   :  { %6631 = vmatpush1.bf16.msra.mxu0 %v9111_v9  ;;  %v9161_v9 = vld [vmem:[%s12017_s3 + $0x22c] ss:$12 sps:$4 sm:$0xff]  }
 0x364   :  { %6632 = vmatprep.subr.bf16.mxu0 %v9118_v10 }
 0x367   :  { %6633 = vmatpush1.bf16.msra.mxu0 %v9116_v11  ;;  %v9159_v11 = vld [vmem:[%s12017_s3 + $0x228] ss:$12 sps:$4 sm:$0xff]  }
 0x368   :  { %6634 = vmatprep.subr.bf16.mxu0 %v9123_v12  ;;  %v9162_v12 = vld [vmem:[%s12017_s3 + $0x230] ss:$12 sps:$4 sm:$0xff]  }
 0x36b   :  { %6635 = vmatpush1.bf16.msra.mxu0 %v9121_v14 }
 0x36c   :  { %6636 = vmatprep.subr.bf16.mxu0 %v9128_v16  ;;  %v9166_v16 = vld [vmem:[%s12017_s3 + $0x248] ss:$12 sps:$4 sm:$0xff]  }
 0x36f   :  { %6637 = vmatpush1.bf16.msra.mxu0 %v9126_v18 }
 0x370   :  { %6647 = vmatprep.subr.bf16.mxu0 %v9133_v20 }
 0x405   :  { %v5529_v31 = vpop.f32.mrb[0].mxu0  ;;  %v11903_v32 = vpop.f32.mrb[0].mxu1 }
 0x406   :  { %v7736_v33 = vadd.f32 %v5529_v31, %v902_v28  ;;  %v5531_v34 = vpop.f32.mrb[1].mxu0  ;;  %v6064_v35 = vpop.f32.mrb[1].mxu1  ;;  %v7738_v10 = vadd.f32 %v11903_v32, %v910_v6  ;;  %v6777_v32 = vld [vmem:[%s12021_s5] sm:$0x7] }
 0x407   :  { %v7737_v36 = vadd.f32 %v5531_v34, %v906_v29  ;;  %v7739_v37 = vadd.f32 %v6064_v35, %v914_v30  ;;  %v5533_v38 = vpop.f32.mrb[2].mxu0  ;;  %v6066_v39 = vpop.f32.mrb[2].mxu1 }
 0x408   :  { %vm6069_vm1 = vcmp.gt.f32.partialorder %v7736_v33, 0.0  ;;  %v6073_v40 = vmul.f32 0.01, %v7736_v33  ;;  %v5534_v44 = vpop.f32.mrb[3].mxu0  ;;  %v6067_v45 = vpop.f32.mrb[3].mxu1  ;;  %vm6071_vm5 = vcmp.gt.f32.partialorder %v7738_v10, 0.0 }
 0x409   :  { %vm6070_vm2 = vcmp.gt.f32.partialorder %v7737_v36, 0.0  ;;  %v6074_v41 = vmul.f32 0.01, %v7737_v36  ;;  %vm6072_vm3 = vcmp.gt.f32.partialorder %v7739_v37, 0.0  ;;  %v6076_v42 = vmul.f32 0.01, %v7739_v37 }
 0x40a   :  { %v6077_v43 = vsel %vm6069_vm1, %v7736_v33, %v6073_v40  ;;  %v6075_v14 = vmul.f32 0.01, %v7738_v10  ;;  %v6790_v44 = vrot.slane %v6777_v32, %v11955_v2 }
 0x40b   :  { %v6078_v46 = vsel %vm6070_vm2, %v7737_v36, %v6074_v41  ;;  %v6080_v47 = vsel %vm6072_vm3, %v7739_v37, %v6076_v42  ;;  %v6081_v51 = vpack.c.bf16 %v6077_v43, %v6077_v43  ;;  %v6782_v42 = vrot.slane %v6777_v32, %v11887_v24 }
 0x40c   :  { %v6082_v48 = vpack.c.bf16 %v6078_v46, %v6078_v46  ;;  %v6084_v53 = vpack.c.bf16 %v6080_v47, %v6080_v47  ;;  %v6079_v17 = vsel %vm6071_vm5, %v7738_v10, %v6075_v14  ;;  %v6786_v43 = vrot.slane %v6777_v32, %v11895_v26 }
 0x40d   :  { %v6083_v18 = vpack.c.bf16 %v6079_v17, %v6079_v17 }
 0x40e   :  { %6638 = vmatprep.mubr.bf16.mxu0 %v6082_v48  ;;  %6720 = vmatprep.mubr.bf16.mxu1 %v6082_v48 }
 0x40f   :  { %6639 = vmatmul.mubr.bf16.vlgmr.msra.gmra.mrb[4].mxu0 %v6081_v51  ;;  %6721 = vmatmul.mubr.bf16.vlgmr.msra.gmra.mrb[4].mxu1 %v6081_v51 }
 0x410   :  { %6648 = vmatpush1.bf16.msra.mxu0 %v9131_v49  ;;  %6729 = vmatpush1.bf16.msra.mxu1 %v9134_v50 }
 0x411   :  { %7711 = vmatprep.mubr.msk.bf16.mxu0 %vm6602_vm4, %v6084_v53  ;;  %7712 = vmatprep.mubr.msk.bf16.mxu1 %vm6602_vm4, %v6084_v53 }
 0x412   :  { %6649 = vmatprep.subr.bf16.mxu0 %v9137_v52  ;;  %6730 = vmatprep.subr.bf16.mxu1 %v9169_v21 }
 0x414   :  { %6650 = vmatpush1.bf16.msra.mxu0 %v9135_v54  ;;  %6731 = vmatpush1.bf16.msra.mxu1 %v9138_v55 }
 0x415   :  { %6651 = vmatprep.subr.bf16.mxu0 %v9141_v56  ;;  %6732 = vmatprep.subr.bf16.mxu1 %v9169_v21 }
 0x418   :  { %6652 = vmatpush1.bf16.msra.mxu0 %v9139_v57  ;;  %6733 = vmatpush1.bf16.msra.mxu1 %v9142_v58  ;;  %v7713_v57 = vld [vmem:[#allocation2] ss:$0 sm:$0xff] }
 0x419   :  { %6653 = vmatprep.subr.bf16.mxu0 %v9145_v59  ;;  %6734 = vmatprep.subr.bf16.mxu1 %v9169_v21 }
 0x41c   :  { %6654 = vmatpush1.bf16.msra.mxu0 %v9143_v60  ;;  %6735 = vmatpush1.bf16.msra.mxu1 %v9146_v61 }
 0x41d   :  { %6655 = vmatprep.subr.bf16.mxu0 %v9149_v62  ;;  %6736 = vmatprep.subr.bf16.mxu1 %v9169_v21 }
 0x420   :  { %6656 = vmatpush1.bf16.msra.mxu0 %v9147_v63  ;;  %6737 = vmatpush1.bf16.msra.mxu1 %v9150_v0 }
 0x421   :  { %6657 = vmatprep.subr.bf16.mxu0 %v9153_v1  ;;  %6738 = vmatprep.subr.bf16.mxu1 %v9169_v21 }
 0x424   :  { %6658 = vmatpush1.bf16.msra.mxu0 %v9151_v3  ;;  %6739 = vmatpush1.bf16.msra.mxu1 %v9154_v4 }
 0x425   :  { %6659 = vmatprep.subr.bf16.mxu0 %v9157_v5  ;;  %6740 = vmatprep.subr.bf16.mxu1 %v9169_v21 }
 0x428   :  { %6660 = vmatpush1.bf16.msra.mxu0 %v9155_v7  ;;  %6741 = vmatpush1.bf16.msra.mxu1 %v9158_v8 }
 0x429   :  { %6661 = vmatprep.subr.bf16.mxu0 %v9161_v9  ;;  %6742 = vmatprep.subr.bf16.mxu1 %v9169_v21 }
 0x42c   :  { %6662 = vmatpush1.bf16.msra.mxu0 %v9159_v11  ;;  %6743 = vmatpush1.bf16.msra.mxu1 %v9162_v12 }
 0x42d   :  { %6663 = vmatprep.subr.bf16.mxu0 %v9165_v13  ;;  %6744 = vmatprep.subr.bf16.mxu1 %v9169_v21  ;;  %v6185_v21 = vld [vmem:[%s12020_s4] sm:$0x7] }
 0x42e   :  { %v6198_v28 = vrot.slane %v6185_v21, %v11955_v2  ;;  %v6190_v29 = vrot.slane %v6185_v21, %v11887_v24  ;;  %v6194_v30 = vrot.slane %v6185_v21, %v11895_v26 }
 0x430   :  { %6664 = vmatpush1.bf16.msra.mxu0 %v9163_v15  ;;  %6745 = vmatpush1.bf16.msra.mxu1 %v9166_v16 }
 0x433   :  { %6680 = vmatmul.mubr.bf16.vlgmr.msra.gmra.mrb[4].mxu0 %v6083_v18  ;;  %6761 = vmatmul.mubr.bf16.vlgmr.msra.gmra.mrb[8].mxu1 %v6083_v18 }
 0x4e2   :  { %v7730_v20 = vpop.f32.mrb[4].mxu1 }
 0x4e3   :  { %v7731_v22 = vpop.f32.mrb[5].mxu1 }
 0x4e4   :  { %v7732_v23 = vadd.f32 %v7731_v22, %v7730_v20  ;;  %v7733_v25 = vpop.f32.mrb[6].mxu1 }
 0x4e5   :  { %v7734_v27 = vpop.f32.mrb[7].mxu1 }
 0x4e6   :  { %v6723_v31 = vadd.f32 %v7732_v23, %v6198_v28 }
 0x506   :  { %v6681_v33 = vpop.f32.mrb[4].mxu0  ;;  %v6762_v34 = vpop.f32.mrb[8].mxu1 }
 0x507   :  { %v7740_v35 = vadd.f32 %v6681_v33, %v6190_v29  ;;  %v6763_v36 = vadd.f32 %v6762_v34, %v6723_v31  ;;  %v6683_v37 = vpop.f32.mrb[5].mxu0  ;;  %v6764_v38 = vpop.f32.mrb[9].mxu1 }
 0x508   :  { %v7741_v39 = vadd.f32 %v6683_v37, %v6194_v30  ;;  %v6685_v40 = vpop.f32.mrb[6].mxu0  ;;  %v6765_v41 = vpop.f32.mrb[10].mxu1 }
 0x509   :  { %vm6768_vm6 = vcmp.gt.f32.partialorder %v7740_v35, 0.0  ;;  %v6771_v45 = vmul.f32 0.01, %v7740_v35  ;;  %vm6770_vm7 = vcmp.gt.f32.partialorder %v6763_v36, 0.0  ;;  %v6773_v46 = vmul.f32 0.01, %v6763_v36 }
 0x50a   :  { %vm6769_vm8 = vcmp.gt.f32.partialorder %v7741_v39, 0.0  ;;  %v6772_v47 = vmul.f32 0.01, %v7741_v39  ;;  %v6686_v48 = vpop.f32.mrb[7].mxu0  ;;  %v6766_v49 = vpop.f32.mrb[11].mxu1 }
 0x50b   :  { %v6774_v50 = vsel %vm6768_vm6, %v7740_v35, %v6771_v45  ;;  %v6776_v51 = vsel %vm6770_vm7, %v6763_v36, %v6773_v46 }
 0x50c   :  { %v6775_v52 = vsel %vm6769_vm8, %v7741_v39, %v6772_v47  ;;  %v6794_v53 = vmul.f32 %v6782_v42, %v6774_v50  ;;  %v6796_v54 = vmul.f32 %v6790_v44, %v6776_v51 }
 0x50d   :  { %v6795_v55 = vmul.f32 %v6786_v43, %v6775_v52 }
 0x50e   :  { %v6799_v56 = vsel %vm6798_vm9, %v6796_v54, 0.0 }
 0x50f   :  { %v6797_v24 = vadd.f32 %v6795_v55, %v6794_v53 }
 0x511   :  { %v6800_v26 = vadd.f32 %v6799_v56, %v6797_v24 }
 0x513   :  { %6801 = vadd.xlane.f32.xlu0 %v6800_v26 }
 0x5a0   :  { %v6802_v58 = vpop.xlane.xlu0 %6801 }
 0x5a1   :  { %v6810_v59 = vadd.f32 %v7713_v57, %v6802_v58 }
 0x5a3   :  { %9167 = vtanh.f32 %v6810_v59 }
 0x5ad   :  { %v9168_v60 = vpop.eup %9167 }
 0x5ae   :  { %6813 = vst.msk [vmem:[%s12022_s7] sm:$0xff] %vm6812_vm10, %v9168_v60 }

</bundles_post_ra>
